<compile_context>
chip_gen: v7x
topology: tpu7x:2x2x1
jax: 0.10.0
libtpu: 0.0.40
codegen_flags: <defaults>
</compile_context>

<pallas_src>
import jax
import jax.numpy as jnp
import numpy as np
from jax.experimental import pallas as pl
from jax.experimental.pallas import tpu as pltpu

_BN_EPS = 1e-5
_NORM_EPS_SQ = 1e-24  # (1e-12)**2 ; sqrt(max(s, eps^2)) == max(sqrt(s), eps)

D_ENZY = 1280
D_SMILES = 133
D_SMILES_PAD = 256          # 133 padded up to a multiple of 128 (exact, see below)
D_OUT = 128


def _batchnorm_train(x, gamma, beta):
    # BatchNorm1d training mode: biased variance over the batch axis.
    mean = jnp.mean(x, axis=0, keepdims=True)
    var = jnp.mean(jnp.square(x - mean), axis=0, keepdims=True)
    return (x - mean) * jax.lax.rsqrt(var + _BN_EPS) * gamma + beta


def _l2_normalize_rows(x):
    # F.normalize(dim=1): x / max(||x||, 1e-12) == x * rsqrt(max(sumsq, 1e-24))
    sumsq = jnp.sum(jnp.square(x), axis=1, keepdims=True)
    return x * jax.lax.rsqrt(jnp.maximum(sumsq, _NORM_EPS_SQ))


# --------------------------------------------------------------------------
# Single fused kernel: both branches, both BNs, ReLU, shared BN, L2-normalize.
# Everything (weights + activations, ~4 MB) lives in VMEM for the one step.
# --------------------------------------------------------------------------
def fused_projection_kernel(enzy_ref, smiles_ref,
                            we1_ref, g_e_ref, b_e_ref, we2_ref,
                            ws1_ref, g_s_ref, b_s_ref, ws2_ref,
                            g_sh_ref, b_sh_ref,
                            out_e_ref, out_s_ref,
                            spad_ref):
    # ------------- enzyme branch -------------
    h = jnp.dot(enzy_ref[...], we1_ref[...],
                preferred_element_type=jnp.float32)              # [B, 1280] f32
    h = _batchnorm_train(h, g_e_ref[...], b_e_ref[...])
    h = jnp.maximum(h, 0.0)
    e = jnp.dot(h.astype(jnp.bfloat16), we2_ref[...],
                preferred_element_type=jnp.float32)              # [B, 128] f32
    e = _batchnorm_train(e, g_sh_ref[...], b_sh_ref[...])
    out_e_ref[...] = _l2_normalize_rows(e)

    # ------------- smiles branch (133 -> 256 zero-pad in VMEM, exact) --------
    # Padded columns are zero; padded BN features (gamma=1, beta=0) map 0 -> 0
    # through BN (0 * rsqrt(eps)) and ReLU, and the padded rows of ws2 are
    # zero, so the padding contributes nothing to the output.
    spad_ref[...] = jnp.zeros_like(spad_ref)
    spad_ref[:, :D_SMILES] = smiles_ref[...]
    s = jnp.dot(spad_ref[...].astype(jnp.bfloat16), ws1_ref[...],
                preferred_element_type=jnp.float32)              # [B, 256] f32
    s = _batchnorm_train(s, g_s_ref[...], b_s_ref[...])
    s = jnp.maximum(s, 0.0)
    s = jnp.dot(s.astype(jnp.bfloat16), ws2_ref[...],
                preferred_element_type=jnp.float32)              # [B, 128] f32
    s = _batchnorm_train(s, g_sh_ref[...], b_sh_ref[...])
    out_s_ref[...] = _l2_normalize_rows(s)


def projection_layer_forward(enzy, smiles, kp):
    """Forward pass. `kp` is the output of prepare_kernel_params()."""
    B = enzy.shape[0]
    vmem = pl.BlockSpec(memory_space=pltpu.MemorySpace.VMEM)

    # TODO(synk): for steady-state serving, keep kp["we1"]/kp["we2"] resident
    # in VMEM across calls (cross-call prefetch / memory-space constraint)
    # instead of re-streaming ~3.6 MB of weights per invocation.
    out_e, out_s = pl.pallas_call(
        fused_projection_kernel,
        out_shape=(jax.ShapeDtypeStruct((B, D_OUT), jnp.float32),
                   jax.ShapeDtypeStruct((B, D_OUT), jnp.float32)),
        in_specs=[vmem] * 12,
        out_specs=(vmem, vmem),
        scratch_shapes=[pltpu.VMEM((B, D_SMILES_PAD), jnp.float32)],
        compiler_params=pltpu.CompilerParams(
            vmem_limit_bytes=32 * 1024 * 1024),   # footprint ~4 MB; fits v7x 64 MiB
    )(enzy.astype(jnp.bfloat16), smiles,
      kp["we1"], kp["g_enzy"], kp["b_enzy"], kp["we2"],
      kp["ws1"], kp["g_smiles"], kp["b_smiles"], kp["ws2"],
      kp["g_shared"], kp["b_shared"])
    return out_e, out_s


# --------------------------------------------------------------------------
# Parameter handling.
# --------------------------------------------------------------------------
def init_params(key):
    """PyTorch-faithful params (f32, Linear biases, BN gamma=1 / beta=0).
    Linear weights stored pre-transposed as [in_features, out_features]."""
    ks = jax.random.split(key, 8)

    def linear(kw, kb, fan_in, fan_out):
        bound = 1.0 / np.sqrt(fan_in)
        w = jax.random.uniform(kw, (fan_in, fan_out), jnp.float32, -bound, bound)
        b = jax.random.uniform(kb, (1, fan_out), jnp.float32, -bound, bound)
        return w, b

    we1, be1 = linear(ks[0], ks[1], 1280, 1280)   # enzy_refine_layer_1
    ws1, bs1 = linear(ks[2], ks[3], 133, 133)     # smiles_refine_layer_1
    we2, be2 = linear(ks[4], ks[5], 1280, 128)    # enzy_refine_layer_2
    ws2, bs2 = linear(ks[6], ks[7], 133, 128)     # smiles_refine_layer_2
    return dict(
        we1=we1, be1=be1, we2=we2, be2=be2,
        ws1=ws1, bs1=bs1, ws2=ws2, bs2=bs2,
        g_enzy=jnp.ones((1, 1280), jnp.float32),
        b_enzy=jnp.zeros((1, 1280), jnp.float32),
        g_smiles=jnp.ones((1, 133), jnp.float32),
        b_smiles=jnp.zeros((1, 133), jnp.float32),
        g_shared=jnp.ones((1, 128), jnp.float32),
        b_shared=jnp.zeros((1, 128), jnp.float32),
    )


def prepare_kernel_params(p):
    """One-time host-side packing for the kernel:
       - drop Linear biases (exactly cancelled by training-mode BatchNorm),
       - cast weights to bf16 (halves weight DMA; MXU-native operand dtype),
       - zero-pad the smiles weights 133 -> 256 (exact; gamma padded with 1)."""
    pad = D_SMILES_PAD - D_SMILES
    return dict(
        we1=p["we1"].astype(jnp.bfloat16),
        we2=p["we2"].astype(jnp.bfloat16),
        ws1=jnp.pad(p["ws1"], ((0, pad), (0, pad))).astype(jnp.bfloat16),
        ws2=jnp.pad(p["ws2"], ((0, pad), (0, 0))).astype(jnp.bfloat16),
        g_enzy=p["g_enzy"], b_enzy=p["b_enzy"],
        g_smiles=jnp.pad(p["g_smiles"], ((0, 0), (0, pad)), constant_values=1.0),
        b_smiles=jnp.pad(p["b_smiles"], ((0, 0), (0, pad))),
        g_shared=p["g_shared"], b_shared=p["b_shared"],
    )


def reference_forward(enzy, smiles, p):
    """Faithful transcription of the PyTorch forward (biases included, no
    padding), with matmuls at the kernel's precision (bf16 operands, f32
    accumulation)."""
    def dot(x, w):
        return jnp.dot(x.astype(jnp.bfloat16), w.astype(jnp.bfloat16),
                       preferred_element_type=jnp.float32)

    e = dot(enzy, p["we1"]) + p["be1"]
    e = _batchnorm_train(e, p["g_enzy"], p["b_enzy"])
    e = jnp.maximum(e, 0.0)
    e = dot(e, p["we2"]) + p["be2"]
    e = _batchnorm_train(e, p["g_shared"], p["b_shared"])
    e = _l2_normalize_rows(e)

    s = dot(smiles, p["ws1"]) + p["bs1"]
    s = _batchnorm_train(s, p["g_smiles"], p["b_smiles"])
    s = jnp.maximum(s, 0.0)
    s = dot(s, p["ws2"]) + p["bs2"]
    s = _batchnorm_train(s, p["g_shared"], p["b_shared"])
    s = _l2_normalize_rows(s)
    return e, s


if __name__ == "__main__":
    key = jax.random.PRNGKey(0)
    k_enzy, k_smiles, k_params = jax.random.split(key, 3)

    B = 8
    enzy_embed = jax.random.normal(k_enzy, (B, D_ENZY), jnp.float32)
    smiles_embed = jax.random.normal(k_smiles, (B, D_SMILES), jnp.float32)

    params = init_params(k_params)
    kparams = prepare_kernel_params(params)

    forward = jax.jit(projection_layer_forward)
    out_e, out_s = jax.block_until_ready(forward(enzy_embed, smiles_embed, kparams))

    ref_e, ref_s = reference_forward(enzy_embed, smiles_embed, params)
    np.testing.assert_allclose(np.asarray(out_e), np.asarray(ref_e),
                               rtol=5e-3, atol=5e-3)
    np.testing.assert_allclose(np.asarray(out_s), np.asarray(ref_s),
                               rtol=5e-3, atol=5e-3)

    print("KERNEL_OK")
</pallas_src>

<mosaic_0001>
module attributes {stable_mosaic.version = 11 : i64} {
  func.func @fused_projection_kernel(%arg0: memref<8x1280xbf16, #tpu.memory_space<vmem>>, %arg1: memref<8x133xf32, #tpu.memory_space<vmem>>, %arg2: memref<1280x1280xbf16, #tpu.memory_space<vmem>>, %arg3: memref<1x1280xf32, #tpu.memory_space<vmem>>, %arg4: memref<1x1280xf32, #tpu.memory_space<vmem>>, %arg5: memref<1280x128xbf16, #tpu.memory_space<vmem>>, %arg6: memref<256x256xbf16, #tpu.memory_space<vmem>>, %arg7: memref<1x256xf32, #tpu.memory_space<vmem>>, %arg8: memref<1x256xf32, #tpu.memory_space<vmem>>, %arg9: memref<256x128xbf16, #tpu.memory_space<vmem>>, %arg10: memref<1x128xf32, #tpu.memory_space<vmem>>, %arg11: memref<1x128xf32, #tpu.memory_space<vmem>>, %arg12: memref<8x128xf32, #tpu.memory_space<vmem>>, %arg13: memref<8x128xf32, #tpu.memory_space<vmem>>, %arg14: memref<8x256xf32, #tpu.memory_space<vmem>>) attributes {dimension_semantics = [], scalar_prefetch = 0 : i64, scratch_operands = 1 : i64, tpu.core_type = #tpu.core_type<tc>} {
    %c0 = arith.constant 0 : index
    %c0_0 = arith.constant 0 : index
    %0 = vector.load %arg0[%c0, %c0_0] : memref<8x1280xbf16, #tpu.memory_space<vmem>>, vector<8x1280xbf16>
    %c0_1 = arith.constant 0 : index
    %c0_2 = arith.constant 0 : index
    %1 = vector.load %arg2[%c0_1, %c0_2] : memref<1280x1280xbf16, #tpu.memory_space<vmem>>, vector<1280x1280xbf16>
    %cst = arith.constant dense<0.000000e+00> : vector<8x1280xf32>
    %2 = tpu.matmul %0, %1, %cst {dimension_numbers = #tpu.dot_dimension_numbers<[1], [0], [0], [1], [0, 0, 1, 1], [], []>} : vector<8x1280xbf16>, vector<1280x1280xbf16>, vector<8x1280xf32> -> vector<8x1280xf32>
    %c0_3 = arith.constant 0 : index
    %c0_4 = arith.constant 0 : index
    %3 = vector.load %arg3[%c0_3, %c0_4] : memref<1x1280xf32, #tpu.memory_space<vmem>>, vector<1x1280xf32>
    %c0_5 = arith.constant 0 : index
    %c0_6 = arith.constant 0 : index
    %4 = vector.load %arg4[%c0_5, %c0_6] : memref<1x1280xf32, #tpu.memory_space<vmem>>, vector<1x1280xf32>
    %cst_7 = arith.constant dense<0.000000e+00> : vector<1280xf32>
    %5 = vector.multi_reduction <add>, %2, %cst_7 [0] : vector<8x1280xf32> to vector<1280xf32>
    %6 = vector.shape_cast %5 : vector<1280xf32> to vector<1x1280xf32>
    %cst_8 = arith.constant 8.000000e+00 : f32
    %7 = vector.broadcast %cst_8 : f32 to vector<1x1280xf32>
    %8 = arith.divf %6, %7 : vector<1x1280xf32>
    %9 = vector.broadcast %8 : vector<1x1280xf32> to vector<8x1280xf32>
    %10 = arith.subf %2, %9 : vector<8x1280xf32>
    %11 = arith.mulf %10, %10 : vector<8x1280xf32>
    %cst_9 = arith.constant dense<0.000000e+00> : vector<1280xf32>
    %12 = vector.multi_reduction <add>, %11, %cst_9 [0] : vector<8x1280xf32> to vector<1280xf32>
    %13 = vector.shape_cast %12 : vector<1280xf32> to vector<1x1280xf32>
    %cst_10 = arith.constant 8.000000e+00 : f32
    %14 = vector.broadcast %cst_10 : f32 to vector<1x1280xf32>
    %15 = arith.divf %13, %14 : vector<1x1280xf32>
    %16 = vector.broadcast %8 : vector<1x1280xf32> to vector<8x1280xf32>
    %17 = arith.subf %2, %16 : vector<8x1280xf32>
    %cst_11 = arith.constant 9.99999974E-6 : f32
    %18 = vector.broadcast %cst_11 : f32 to vector<1x1280xf32>
    %19 = arith.addf %15, %18 : vector<1x1280xf32>
    %20 = math.rsqrt %19 : vector<1x1280xf32>
    %21 = vector.broadcast %20 : vector<1x1280xf32> to vector<8x1280xf32>
    %22 = arith.mulf %17, %21 : vector<8x1280xf32>
    %23 = vector.broadcast %3 : vector<1x1280xf32> to vector<8x1280xf32>
    %24 = arith.mulf %22, %23 : vector<8x1280xf32>
    %25 = vector.broadcast %4 : vector<1x1280xf32> to vector<8x1280xf32>
    %26 = arith.addf %24, %25 : vector<8x1280xf32>
    %cst_12 = arith.constant 0.000000e+00 : f32
    %27 = vector.broadcast %cst_12 : f32 to vector<8x1280xf32>
    %28 = arith.maximumf %26, %27 : vector<8x1280xf32>
    %29 = arith.truncf %28 : vector<8x1280xf32> to vector<8x1280xbf16>
    %c0_13 = arith.constant 0 : index
    %c0_14 = arith.constant 0 : index
    %30 = vector.load %arg5[%c0_13, %c0_14] : memref<1280x128xbf16, #tpu.memory_space<vmem>>, vector<1280x128xbf16>
    %cst_15 = arith.constant dense<0.000000e+00> : vector<8x128xf32>
    %31 = tpu.matmul %29, %30, %cst_15 {dimension_numbers = #tpu.dot_dimension_numbers<[1], [0], [0], [1], [0, 0, 1, 1], [], []>} : vector<8x1280xbf16>, vector<1280x128xbf16>, vector<8x128xf32> -> vector<8x128xf32>
    %c0_16 = arith.constant 0 : index
    %c0_17 = arith.constant 0 : index
    %32 = vector.load %arg10[%c0_16, %c0_17] : memref<1x128xf32, #tpu.memory_space<vmem>>, vector<1x128xf32>
    %c0_18 = arith.constant 0 : index
    %c0_19 = arith.constant 0 : index
    %33 = vector.load %arg11[%c0_18, %c0_19] : memref<1x128xf32, #tpu.memory_space<vmem>>, vector<1x128xf32>
    %cst_20 = arith.constant dense<0.000000e+00> : vector<128xf32>
    %34 = vector.multi_reduction <add>, %31, %cst_20 [0] : vector<8x128xf32> to vector<128xf32>
    %35 = vector.shape_cast %34 : vector<128xf32> to vector<1x128xf32>
    %cst_21 = arith.constant 8.000000e+00 : f32
    %36 = vector.broadcast %cst_21 : f32 to vector<1x128xf32>
    %37 = arith.divf %35, %36 : vector<1x128xf32>
    %38 = vector.broadcast %37 : vector<1x128xf32> to vector<8x128xf32>
    %39 = arith.subf %31, %38 : vector<8x128xf32>
    %40 = arith.mulf %39, %39 : vector<8x128xf32>
    %cst_22 = arith.constant dense<0.000000e+00> : vector<128xf32>
    %41 = vector.multi_reduction <add>, %40, %cst_22 [0] : vector<8x128xf32> to vector<128xf32>
    %42 = vector.shape_cast %41 : vector<128xf32> to vector<1x128xf32>
    %cst_23 = arith.constant 8.000000e+00 : f32
    %43 = vector.broadcast %cst_23 : f32 to vector<1x128xf32>
    %44 = arith.divf %42, %43 : vector<1x128xf32>
    %45 = vector.broadcast %37 : vector<1x128xf32> to vector<8x128xf32>
    %46 = arith.subf %31, %45 : vector<8x128xf32>
    %cst_24 = arith.constant 9.99999974E-6 : f32
    %47 = vector.broadcast %cst_24 : f32 to vector<1x128xf32>
    %48 = arith.addf %44, %47 : vector<1x128xf32>
    %49 = math.rsqrt %48 : vector<1x128xf32>
    %50 = vector.broadcast %49 : vector<1x128xf32> to vector<8x128xf32>
    %51 = arith.mulf %46, %50 : vector<8x128xf32>
    %52 = vector.broadcast %32 : vector<1x128xf32> to vector<8x128xf32>
    %53 = arith.mulf %51, %52 : vector<8x128xf32>
    %54 = vector.broadcast %33 : vector<1x128xf32> to vector<8x128xf32>
    %55 = arith.addf %53, %54 : vector<8x128xf32>
    %56 = arith.mulf %55, %55 : vector<8x128xf32>
    %cst_25 = arith.constant dense<0.000000e+00> : vector<8xf32>
    %57 = vector.multi_reduction <add>, %56, %cst_25 [1] : vector<8x128xf32> to vector<8xf32>
    %58 = vector.shape_cast %57 : vector<8xf32> to vector<8x1xf32>
    %cst_26 = arith.constant 1.000000e-24 : f32
    %59 = vector.broadcast %cst_26 : f32 to vector<8x1xf32>
    %60 = arith.maximumf %58, %59 : vector<8x1xf32>
    %61 = math.rsqrt %60 : vector<8x1xf32>
    %62 = vector.broadcast %61 : vector<8x1xf32> to vector<8x128xf32>
    %63 = arith.mulf %55, %62 : vector<8x128xf32>
    %c0_27 = arith.constant 0 : index
    %c0_28 = arith.constant 0 : index
    %64 = vector.load %arg12[%c0_27, %c0_28] : memref<8x128xf32, #tpu.memory_space<vmem>>, vector<8x128xf32>
    tpu.vector_store %arg12[%c0_27, %c0_28], %63 {strides = array<i32>} : memref<8x128xf32, #tpu.memory_space<vmem>>, vector<8x128xf32>,
    %cst_29 = arith.constant 0.000000e+00 : f32
    %65 = vector.broadcast %cst_29 : f32 to vector<8x256xf32>
    %c0_30 = arith.constant 0 : index
    %c0_31 = arith.constant 0 : index
    %66 = vector.load %arg14[%c0_30, %c0_31] : memref<8x256xf32, #tpu.memory_space<vmem>>, vector<8x256xf32>
    tpu.vector_store %arg14[%c0_30, %c0_31], %65 {strides = array<i32>} : memref<8x256xf32, #tpu.memory_space<vmem>>, vector<8x256xf32>,
    %c0_32 = arith.constant 0 : index
    %c0_33 = arith.constant 0 : index
    %67 = vector.load %arg1[%c0_32, %c0_33] : memref<8x133xf32, #tpu.memory_space<vmem>>, vector<8x133xf32>
    %c0_34 = arith.constant 0 : index
    %c0_35 = arith.constant 0 : index
    %68 = vector.load %arg14[%c0_34, %c0_35] : memref<8x256xf32, #tpu.memory_space<vmem>>, vector<8x133xf32>
    tpu.vector_store %arg14[%c0_34, %c0_35], %67 {strides = array<i32>} : memref<8x256xf32, #tpu.memory_space<vmem>>, vector<8x133xf32>,
    %c0_36 = arith.constant 0 : index
    %c0_37 = arith.constant 0 : index
    %69 = vector.load %arg14[%c0_36, %c0_37] : memref<8x256xf32, #tpu.memory_space<vmem>>, vector<8x256xf32>
    %70 = arith.truncf %69 : vector<8x256xf32> to vector<8x256xbf16>
    %c0_38 = arith.constant 0 : index
    %c0_39 = arith.constant 0 : index
    %71 = vector.load %arg6[%c0_38, %c0_39] : memref<256x256xbf16, #tpu.memory_space<vmem>>, vector<256x256xbf16>
    %cst_40 = arith.constant dense<0.000000e+00> : vector<8x256xf32>
    %72 = tpu.matmul %70, %71, %cst_40 {dimension_numbers = #tpu.dot_dimension_numbers<[1], [0], [0], [1], [0, 0, 1, 1], [], []>} : vector<8x256xbf16>, vector<256x256xbf16>, vector<8x256xf32> -> vector<8x256xf32>
    %c0_41 = arith.constant 0 : index
    %c0_42 = arith.constant 0 : index
    %73 = vector.load %arg7[%c0_41, %c0_42] : memref<1x256xf32, #tpu.memory_space<vmem>>, vector<1x256xf32>
    %c0_43 = arith.constant 0 : index
    %c0_44 = arith.constant 0 : index
    %74 = vector.load %arg8[%c0_43, %c0_44] : memref<1x256xf32, #tpu.memory_space<vmem>>, vector<1x256xf32>
    %cst_45 = arith.constant dense<0.000000e+00> : vector<256xf32>
    %75 = vector.multi_reduction <add>, %72, %cst_45 [0] : vector<8x256xf32> to vector<256xf32>
    %76 = vector.shape_cast %75 : vector<256xf32> to vector<1x256xf32>
    %cst_46 = arith.constant 8.000000e+00 : f32
    %77 = vector.broadcast %cst_46 : f32 to vector<1x256xf32>
    %78 = arith.divf %76, %77 : vector<1x256xf32>
    %79 = vector.broadcast %78 : vector<1x256xf32> to vector<8x256xf32>
    %80 = arith.subf %72, %79 : vector<8x256xf32>
    %81 = arith.mulf %80, %80 : vector<8x256xf32>
    %cst_47 = arith.constant dense<0.000000e+00> : vector<256xf32>
    %82 = vector.multi_reduction <add>, %81, %cst_47 [0] : vector<8x256xf32> to vector<256xf32>
    %83 = vector.shape_cast %82 : vector<256xf32> to vector<1x256xf32>
    %cst_48 = arith.constant 8.000000e+00 : f32
    %84 = vector.broadcast %cst_48 : f32 to vector<1x256xf32>
    %85 = arith.divf %83, %84 : vector<1x256xf32>
    %86 = vector.broadcast %78 : vector<1x256xf32> to vector<8x256xf32>
    %87 = arith.subf %72, %86 : vector<8x256xf32>
    %cst_49 = arith.constant 9.99999974E-6 : f32
    %88 = vector.broadcast %cst_49 : f32 to vector<1x256xf32>
    %89 = arith.addf %85, %88 : vector<1x256xf32>
    %90 = math.rsqrt %89 : vector<1x256xf32>
    %91 = vector.broadcast %90 : vector<1x256xf32> to vector<8x256xf32>
    %92 = arith.mulf %87, %91 : vector<8x256xf32>
    %93 = vector.broadcast %73 : vector<1x256xf32> to vector<8x256xf32>
    %94 = arith.mulf %92, %93 : vector<8x256xf32>
    %95 = vector.broadcast %74 : vector<1x256xf32> to vector<8x256xf32>
    %96 = arith.addf %94, %95 : vector<8x256xf32>
    %cst_50 = arith.constant 0.000000e+00 : f32
    %97 = vector.broadcast %cst_50 : f32 to vector<8x256xf32>
    %98 = arith.maximumf %96, %97 : vector<8x256xf32>
    %99 = arith.truncf %98 : vector<8x256xf32> to vector<8x256xbf16>
    %c0_51 = arith.constant 0 : index
    %c0_52 = arith.constant 0 : index
    %100 = vector.load %arg9[%c0_51, %c0_52] : memref<256x128xbf16, #tpu.memory_space<vmem>>, vector<256x128xbf16>
    %cst_53 = arith.constant dense<0.000000e+00> : vector<8x128xf32>
    %101 = tpu.matmul %99, %100, %cst_53 {dimension_numbers = #tpu.dot_dimension_numbers<[1], [0], [0], [1], [0, 0, 1, 1], [], []>} : vector<8x256xbf16>, vector<256x128xbf16>, vector<8x128xf32> -> vector<8x128xf32>
    %c0_54 = arith.constant 0 : index
    %c0_55 = arith.constant 0 : index
    %102 = vector.load %arg10[%c0_54, %c0_55] : memref<1x128xf32, #tpu.memory_space<vmem>>, vector<1x128xf32>
    %c0_56 = arith.constant 0 : index
    %c0_57 = arith.constant 0 : index
    %103 = vector.load %arg11[%c0_56, %c0_57] : memref<1x128xf32, #tpu.memory_space<vmem>>, vector<1x128xf32>
    %cst_58 = arith.constant dense<0.000000e+00> : vector<128xf32>
    %104 = vector.multi_reduction <add>, %101, %cst_58 [0] : vector<8x128xf32> to vector<128xf32>
    %105 = vector.shape_cast %104 : vector<128xf32> to vector<1x128xf32>
    %cst_59 = arith.constant 8.000000e+00 : f32
    %106 = vector.broadcast %cst_59 : f32 to vector<1x128xf32>
    %107 = arith.divf %105, %106 : vector<1x128xf32>
    %108 = vector.broadcast %107 : vector<1x128xf32> to vector<8x128xf32>
    %109 = arith.subf %101, %108 : vector<8x128xf32>
    %110 = arith.mulf %109, %109 : vector<8x128xf32>
    %cst_60 = arith.constant dense<0.000000e+00> : vector<128xf32>
    %111 = vector.multi_reduction <add>, %110, %cst_60 [0] : vector<8x128xf32> to vector<128xf32>
    %112 = vector.shape_cast %111 : vector<128xf32> to vector<1x128xf32>
    %cst_61 = arith.constant 8.000000e+00 : f32
    %113 = vector.broadcast %cst_61 : f32 to vector<1x128xf32>
    %114 = arith.divf %112, %113 : vector<1x128xf32>
    %115 = vector.broadcast %107 : vector<1x128xf32> to vector<8x128xf32>
    %116 = arith.subf %101, %115 : vector<8x128xf32>
    %cst_62 = arith.constant 9.99999974E-6 : f32
    %117 = vector.broadcast %cst_62 : f32 to vector<1x128xf32>
    %118 = arith.addf %114, %117 : vector<1x128xf32>
    %119 = math.rsqrt %118 : vector<1x128xf32>
    %120 = vector.broadcast %119 : vector<1x128xf32> to vector<8x128xf32>
    %121 = arith.mulf %116, %120 : vector<8x128xf32>
    %122 = vector.broadcast %102 : vector<1x128xf32> to vector<8x128xf32>
    %123 = arith.mulf %121, %122 : vector<8x128xf32>
    %124 = vector.broadcast %103 : vector<1x128xf32> to vector<8x128xf32>
    %125 = arith.addf %123, %124 : vector<8x128xf32>
    %126 = arith.mulf %125, %125 : vector<8x128xf32>
    %cst_63 = arith.constant dense<0.000000e+00> : vector<8xf32>
    %127 = vector.multi_reduction <add>, %126, %cst_63 [1] : vector<8x128xf32> to vector<8xf32>
    %128 = vector.shape_cast %127 : vector<8xf32> to vector<8x1xf32>
    %cst_64 = arith.constant 1.000000e-24 : f32
    %129 = vector.broadcast %cst_64 : f32 to vector<8x1xf32>
    %130 = arith.maximumf %128, %129 : vector<8x1xf32>
    %131 = math.rsqrt %130 : vector<8x1xf32>
    %132 = vector.broadcast %131 : vector<8x1xf32> to vector<8x128xf32>
    %133 = arith.mulf %125, %132 : vector<8x128xf32>
    %c0_65 = arith.constant 0 : index
    %c0_66 = arith.constant 0 : index
    %134 = vector.load %arg13[%c0_65, %c0_66] : memref<8x128xf32, #tpu.memory_space<vmem>>, vector<8x128xf32>
    tpu.vector_store %arg13[%c0_65, %c0_66], %133 {strides = array<i32>} : memref<8x128xf32, #tpu.memory_space<vmem>>, vector<8x128xf32>,
    return
  }
}

</mosaic_0001>

<bundles_post_ra>
// kernel: projection_layer_forward.1
= control target key start
LH: loop header
LB: loop body
LE: loop exit
PB: predicated region body
PF: predicated region fallthrough
CT: control target
= control target key end

     0   :  { %19 = vsyncpa [#allocation4], 0  ;;  %s11193_s0 = inlined_call_operand.vmem [shape: bf16[8,1280], index: 0, kind: input, shape index: {}]   ;;  %s11194_s1 = inlined_call_operand.hbm [shape: f32[8,133], index: 1, kind: input, shape index: {}]   ;;  %s11195_s2 = inlined_call_operand.hbm [shape: bf16[1280,1280], index: 2, kind: input, shape index: {}]   ;;  %s11196_s3 = inlined_call_operand.hbm [shape: f32[1,1280], index: 3, kind: input, shape index: {}]   ;;  %s11197_s4 = inlined_call_operand.hbm [shape: f32[1,1280], index: 4, kind: input, shape index: {}]   ;;  %s11198_s5 = inlined_call_operand.hbm [shape: bf16[1280,128], index: 5, kind: input, shape index: {}]   ;;  %s11199_s6 = inlined_call_operand.hbm [shape: bf16[256,256], index: 6, kind: input, shape index: {}]   ;;  %s11200_s7 = inlined_call_operand.hbm [shape: f32[1,256], index: 7, kind: input, shape index: {}]   ;;  %s11201_s8 = inlined_call_operand.hbm [shape: f32[1,256], index: 8, kind: input, shape index: {}]   ;;  %s11202_s9 = inlined_call_operand.hbm [shape: bf16[256,128], index: 9, kind: input, shape index: {}]   ;;  %s11203_s10 = inlined_call_operand.hbm [shape: f32[1,128], index: 10, kind: input, shape index: {}]   ;;  %s11204_s11 = inlined_call_operand.hbm [shape: f32[1,128], index: 11, kind: input, shape index: {}]   ;;  %s11205_s12 = inlined_call_operand.hbm [shape: f32[8,128], index: 12, kind: output, shape index: {0}]   ;;  %s11206_s13 = inlined_call_operand.hbm [shape: f32[8,128], index: 13, kind: output, shape index: {1}]  }
   0x1   :  { %20 = vsyncpa [#allocation7], 0 }
   0x2   :  { %21 = vsyncpa [#allocation10], 0 }
   0x3   :  { %22 = vsyncpa [#allocation13], 0 }
   0x4   :  { %23 = vsyncpa [#allocation16], 0 }
   0x5   :  { %24 = vsyncpa [#allocation19], 0 }
   0x6   :  { %25 = vsyncpa [#allocation5], 0 }
   0x7   :  { %26 = vsyncpa [#allocation23], 0  ;;  %s10689_s25 = smov [#allocation6]   ;;  %s10387_s29 = scalar_lea.hbm %s11195_s2, 102400 }
   0x8   :  { %s44_s26 = sshll.u32 %s10689_s25, 4  ;;  %p10388_p0 = scmp.ne.s32.totalorder %s11195_s2, %s10387_s29  ;;  %s45_s26 = int_to_ptr.vmem [resolvable:$true] %s44_s26 }
   0x9   :  { %p10391_p1 = scmp.lt.u32.totalorder %s10387_s29, %s11195_s2 }
   0xb   :  { %p10393_p2 = pnand %p10391_p1, %p10388_p0 }
   0xd   :  { %10396 = shalt.err (!%p10393_p2)
}
   0xe   :  { %s10397_s17 = scalar_lea.vmem %s45_s26, 102400  ;;  %p10402_p4 = scmp.lt.s32.totalorder %s45_s26, %s45_s26 }
   0xf   :  { %p10398_p3 = scmp.ne.s32.totalorder %s45_s26, %s10397_s17  ;;  %p10403_p5 = scmp.lt.s32.totalorder %s10397_s17, %s10397_s17 }
  0x11   :  { %p10404_p6 = por %p10403_p5, %p10402_p4 }
  0x13   :  { %p10405_p7 = pnand %p10404_p6, %p10398_p3 }
  0x15   :  { %10408 = shalt.err (!%p10405_p7)
}
  0x16   :  { %s10690_s18 = smov 640   ;;  %s10691_s19 = smov 40  }
  0x17   :  { %50 = dma.hbm_to_vmem [thread:$0]  %s11195_s2, 102400, %s45_s26, [#allocation7], %s10690_s18, %s10690_s18, %s10691_s19  }
  0x18   :  { %s10692_s22 = smov [#allocation9]   ;;  %s10693_s24 = smov [#allocation12]  }
  0x19   :  { %s67_s23 = sshll.u32 %s10692_s22, 4  ;;  %s88_s25 = sshll.u32 %s10693_s24, 4  ;;  %s68_s23 = int_to_ptr.vmem [resolvable:$true] %s67_s23  ;;  %s89_s25 = int_to_ptr.vmem [resolvable:$true] %s88_s25 }
  0x1a   :  { %s10409_s29 = scalar_lea.hbm %s11197_s4, 160 }
  0x1b   :  { %p10410_p8 = scmp.ne.s32.totalorder %s11197_s4, %s10409_s29  ;;  %p10413_p9 = scmp.lt.u32.totalorder %s10409_s29, %s11197_s4 }
  0x1d   :  { %p10415_p10 = pnand %p10413_p9, %p10410_p8 }
  0x1f   :  { %10418 = shalt.err (!%p10415_p10)
}
  0x20   :  { %s10419_s2 = scalar_lea.vmem %s68_s23, 160  ;;  %p10424_p12 = scmp.lt.s32.totalorder %s68_s23, %s68_s23 }
  0x21   :  { %p10420_p11 = scmp.ne.s32.totalorder %s68_s23, %s10419_s2  ;;  %p10425_p13 = scmp.lt.s32.totalorder %s10419_s2, %s10419_s2 }
  0x23   :  { %p10426_p0 = por %p10425_p13, %p10424_p12 }
  0x25   :  { %p10427_p1 = pnand %p10426_p0, %p10420_p11 }
  0x27   :  { %10430 = shalt.err (!%p10427_p1)
}
  0x28   :  { %70 = dma.hbm_to_vmem [thread:$0]  %s11197_s4, 160, %s68_s23, [#allocation10]  }
  0x29   :  { %s10431_s20 = scalar_lea.hbm %s11199_s6, 4096 }
  0x2a   :  { %p10432_p2 = scmp.ne.s32.totalorder %s11199_s6, %s10431_s20  ;;  %p10435_p3 = scmp.lt.u32.totalorder %s10431_s20, %s11199_s6 }
  0x2c   :  { %p10437_p4 = pnand %p10435_p3, %p10432_p2 }
  0x2e   :  { %10440 = shalt.err (!%p10437_p4)
}
  0x2f   :  { %s10441_s28 = scalar_lea.vmem %s89_s25, 4096  ;;  %p10446_p6 = scmp.lt.s32.totalorder %s89_s25, %s89_s25 }
  0x30   :  { %p10442_p5 = scmp.ne.s32.totalorder %s89_s25, %s10441_s28  ;;  %p10447_p7 = scmp.lt.s32.totalorder %s10441_s28, %s10441_s28 }
  0x32   :  { %p10448_p8 = por %p10447_p7, %p10446_p6 }
  0x34   :  { %p10449_p9 = pnand %p10448_p8, %p10442_p5 }
  0x36   :  { %10452 = shalt.err (!%p10449_p9)
}
  0x37   :  { %s10694_s4 = smov 128   ;;  %s10695_s23 = smov 8  }
  0x38   :  { %94 = dma.hbm_to_vmem [thread:$0]  %s11199_s6, 4096, %s89_s25, [#allocation13], %s10694_s4, %s10694_s4, %s10695_s23  }
  0x39   :  { %s10696_s14 = smov [#allocation15]   ;;  %s10697_s16 = smov [#allocation18]  }
  0x3a   :  { %s111_s15 = sshll.u32 %s10696_s14, 4  ;;  %s133_s2 = sshll.u32 %s10697_s16, 4  ;;  %s112_s15 = int_to_ptr.vmem [resolvable:$true] %s111_s15  ;;  %s134_s2 = int_to_ptr.vmem [resolvable:$true] %s133_s2 }
  0x3b   :  { %s10453_s18 = scalar_lea.hbm %s11201_s8, 32 }
  0x3c   :  { %p10454_p10 = scmp.ne.s32.totalorder %s11201_s8, %s10453_s18  ;;  %p10457_p11 = scmp.lt.u32.totalorder %s10453_s18, %s11201_s8 }
  0x3e   :  { %p10459_p12 = pnand %p10457_p11, %p10454_p10 }
  0x40   :  { %10462 = shalt.err (!%p10459_p12)
}
  0x41   :  { %s10463_s6 = scalar_lea.vmem %s112_s15, 32  ;;  %p10468_p0 = scmp.lt.s32.totalorder %s112_s15, %s112_s15 }
  0x42   :  { %p10464_p13 = scmp.ne.s32.totalorder %s112_s15, %s10463_s6  ;;  %p10469_p1 = scmp.lt.s32.totalorder %s10463_s6, %s10463_s6 }
  0x44   :  { %p10470_p2 = por %p10469_p1, %p10468_p0 }
  0x46   :  { %p10471_p3 = pnand %p10470_p2, %p10464_p13 }
  0x48   :  { %10474 = shalt.err (!%p10471_p3)
}
  0x49   :  { %114 = dma.hbm_to_vmem [thread:$0]  %s11201_s8, 32, %s112_s15, [#allocation16]  }
  0x4a   :  { %s10475_s4 = scalar_lea.hbm %s11203_s10, 16 }
  0x4b   :  { %p10476_p4 = scmp.ne.s32.totalorder %s11203_s10, %s10475_s4  ;;  %p10479_p5 = scmp.lt.u32.totalorder %s10475_s4, %s11203_s10 }
  0x4d   :  { %p10481_p6 = pnand %p10479_p5, %p10476_p4 }
  0x4f   :  { %10484 = shalt.err (!%p10481_p6)
}
  0x50   :  { %s10485_s16 = scalar_lea.vmem %s134_s2, 16  ;;  %s10489_s26 = scalar_lea.vmem %s134_s2, 32 }
  0x51   :  { %p10486_p7 = scmp.ne.s32.totalorder %s134_s2, %s10485_s16  ;;  %p10490_p8 = scmp.lt.s32.totalorder %s134_s2, %s134_s2 }
  0x52   :  { %p10491_p9 = scmp.lt.s32.totalorder %s10489_s26, %s10485_s16 }
  0x54   :  { %p10492_p10 = por %p10491_p9, %p10490_p8 }
  0x56   :  { %p10493_p11 = pnand %p10492_p10, %p10486_p7 }
  0x58   :  { %10496 = shalt.err (!%p10493_p11)
}
  0x59   :  { %136 = dma.hbm_to_vmem [thread:$0]  %s11203_s10, 16, %s134_s2, [#allocation19]  }
  0x5a   :  { %s10698_s17 = smov [#allocation3]   ;;  %s10699_s19 = smov [#allocation8]  }
  0x5b   :  { %s35_s18 = sshll.u32 %s10698_s17, 4  ;;  %s57_s20 = sshll.u32 %s10699_s19, 4  ;;  %s36_s18 = int_to_ptr.vmem [resolvable:$true] %s35_s18  ;;  %s58_s20 = int_to_ptr.vmem [resolvable:$true] %s57_s20 }
  0x5c   :  { %s10497_s6 = scalar_lea.hbm %s11194_s1, 256 }
  0x5d   :  { %p10498_p12 = scmp.ne.s32.totalorder %s11194_s1, %s10497_s6  ;;  %p10501_p13 = scmp.lt.u32.totalorder %s10497_s6, %s11194_s1 }
  0x5f   :  { %p10503_p0 = pnand %p10501_p13, %p10498_p12 }
  0x61   :  { %10506 = shalt.err (!%p10503_p0)
}
  0x62   :  { %s10507_s10 = scalar_lea.vmem %s36_s18, 256  ;;  %p10512_p2 = scmp.lt.s32.totalorder %s36_s18, %s36_s18 }
  0x63   :  { %p10508_p1 = scmp.ne.s32.totalorder %s36_s18, %s10507_s10  ;;  %p10513_p3 = scmp.lt.s32.totalorder %s10507_s10, %s10507_s10 }
  0x65   :  { %p10514_p4 = por %p10513_p3, %p10512_p2 }
  0x67   :  { %p10515_p5 = pnand %p10514_p4, %p10508_p1 }
  0x69   :  { %10518 = shalt.err (!%p10515_p5)
}
  0x6a   :  { %38 = dma.hbm_to_vmem [thread:$0]  %s11194_s1, 256, %s36_s18, [#allocation4]  }
  0x6b   :  { %s10519_s30 = scalar_lea.hbm %s11196_s3, 160 }
  0x6c   :  { %p10520_p6 = scmp.ne.s32.totalorder %s11196_s3, %s10519_s30  ;;  %p10523_p7 = scmp.lt.u32.totalorder %s10519_s30, %s11196_s3 }
  0x6e   :  { %p10525_p8 = pnand %p10523_p7, %p10520_p6 }
  0x70   :  { %10528 = shalt.err (!%p10525_p8)
}
  0x71   :  { %s10529_s15 = scalar_lea.vmem %s58_s20, 160  ;;  %p10534_p10 = scmp.lt.s32.totalorder %s58_s20, %s58_s20 }
  0x72   :  { %p10530_p9 = scmp.ne.s32.totalorder %s58_s20, %s10529_s15  ;;  %p10535_p11 = scmp.lt.s32.totalorder %s10529_s15, %s10529_s15 }
  0x74   :  { %p10536_p12 = por %p10535_p11, %p10534_p10 }
  0x76   :  { %p10537_p13 = pnand %p10536_p12, %p10530_p9 }
  0x78   :  { %10540 = shalt.err (!%p10537_p13)
}
  0x79   :  { %60 = dma.hbm_to_vmem [thread:$0]  %s11196_s3, 160, %s58_s20, [#allocation7]  }
  0x7a   :  { %s10700_s18 = smov [#allocation11]   ;;  %s10541_s6 = scalar_lea.hbm %s11198_s5, 10240 }
  0x7b   :  { %s76_s19 = sshll.u32 %s10700_s18, 4  ;;  %p10542_p0 = scmp.ne.s32.totalorder %s11198_s5, %s10541_s6  ;;  %s77_s19 = int_to_ptr.vmem [resolvable:$true] %s76_s19 }
  0x7c   :  { %p10545_p1 = scmp.lt.u32.totalorder %s10541_s6, %s11198_s5 }
  0x7e   :  { %p10547_p2 = pnand %p10545_p1, %p10542_p0 }
  0x80   :  { %10550 = shalt.err (!%p10547_p2)
}
  0x81   :  { %s10551_s10 = scalar_lea.vmem %s77_s19, 10240  ;;  %p10556_p4 = scmp.lt.s32.totalorder %s77_s19, %s77_s19 }
  0x82   :  { %p10552_p3 = scmp.ne.s32.totalorder %s77_s19, %s10551_s10  ;;  %p10557_p5 = scmp.lt.s32.totalorder %s10551_s10, %s10551_s10 }
  0x84   :  { %p10558_p6 = por %p10557_p5, %p10556_p4 }
  0x86   :  { %p10559_p7 = pnand %p10558_p6, %p10552_p3 }
  0x88   :  { %10562 = shalt.err (!%p10559_p7)
}
  0x89   :  { %s10701_s3 = smov 64   ;;  %s10702_s20 = smov 4  }
  0x8a   :  { %82 = dma.hbm_to_vmem [thread:$0]  %s11198_s5, 10240, %s77_s19, [#allocation10], %s10701_s3, %s10701_s3, %s10702_s20  }
  0x8b   :  { %s10703_s23 = smov [#allocation14]   ;;  %s10704_s30 = smov [#allocation17]  }
  0x8c   :  { %s101_s29 = sshll.u32 %s10703_s23, 4  ;;  %s120_s14 = sshll.u32 %s10704_s30, 4  ;;  %s102_s29 = int_to_ptr.vmem [resolvable:$true] %s101_s29  ;;  %s10878_s14 = int_to_ptr.vmem [resolvable:$true] %s120_s14 }
  0x8d   :  { %s10563_s8 = scalar_lea.hbm %s11200_s7, 32 }
  0x8e   :  { %p10564_p8 = scmp.ne.s32.totalorder %s11200_s7, %s10563_s8  ;;  %p10567_p9 = scmp.lt.u32.totalorder %s10563_s8, %s11200_s7 }
  0x90   :  { %p10569_p10 = pnand %p10567_p9, %p10564_p8 }
  0x92   :  { %10572 = shalt.err (!%p10569_p10)
}
  0x93   :  { %s10573_s5 = scalar_lea.vmem %s102_s29, 32  ;;  %p10578_p12 = scmp.lt.s32.totalorder %s102_s29, %s102_s29 }
  0x94   :  { %p10574_p11 = scmp.ne.s32.totalorder %s102_s29, %s10573_s5  ;;  %p10579_p13 = scmp.lt.s32.totalorder %s10573_s5, %s10573_s5 }
  0x96   :  { %p10580_p0 = por %p10579_p13, %p10578_p12 }
  0x98   :  { %p10581_p1 = pnand %p10580_p0, %p10574_p11 }
  0x9a   :  { %10584 = shalt.err (!%p10581_p1)
}
  0x9b   :  { %104 = dma.hbm_to_vmem [thread:$0]  %s11200_s7, 32, %s102_s29, [#allocation13]  }
  0x9c   :  { %s10585_s25 = scalar_lea.hbm %s11202_s9, 2048 }
  0x9d   :  { %p10586_p2 = scmp.ne.s32.totalorder %s11202_s9, %s10585_s25  ;;  %p10589_p3 = scmp.lt.u32.totalorder %s10585_s25, %s11202_s9 }
  0x9f   :  { %p10591_p4 = pnand %p10589_p3, %p10586_p2 }
  0xa1   :  { %10594 = shalt.err (!%p10591_p4)
}
  0xa2   :  { %s10595_s2 = scalar_lea.vmem %s10878_s14, 2048  ;;  %p10600_p6 = scmp.lt.s32.totalorder %s10878_s14, %s10878_s14 }
  0xa3   :  { %p10596_p5 = scmp.ne.s32.totalorder %s10878_s14, %s10595_s2  ;;  %p10601_p7 = scmp.lt.s32.totalorder %s10595_s2, %s10595_s2 }
  0xa5   :  { %p10602_p8 = por %p10601_p7, %p10600_p6 }
  0xa7   :  { %p10603_p9 = pnand %p10602_p8, %p10596_p5 }
  0xa9   :  { %10606 = shalt.err (!%p10603_p9)
}
  0xaa   :  { %126 = dma.hbm_to_vmem [thread:$0]  %s11202_s9, 2048, %s10878_s14, [#allocation16], %s10701_s3, %s10701_s3, %s10702_s20  }
  0xab   :  { %s10705_s23 = smov [#allocation20]   ;;  %s10607_s26 = scalar_lea.hbm %s11204_s11, 16 }
  0xac   :  { %s143_s29 = sshll.u32 %s10705_s23, 4  ;;  %p10608_p10 = scmp.ne.s32.totalorder %s11204_s11, %s10607_s26  ;;  %s144_s29 = int_to_ptr.vmem [resolvable:$true] %s143_s29 }
  0xad   :  { %p10611_p11 = scmp.lt.u32.totalorder %s10607_s26, %s11204_s11 }
  0xaf   :  { %p10613_p12 = pnand %p10611_p11, %p10608_p10 }
  0xb1   :  { %10616 = shalt.err (!%p10613_p12)
}
  0xb2   :  { %s10617_s18 = scalar_lea.vmem %s144_s29, 16  ;;  %s10621_s9 = scalar_lea.vmem %s144_s29, 32 }
  0xb3   :  { %p10618_p13 = scmp.ne.s32.totalorder %s144_s29, %s10617_s18  ;;  %p10622_p0 = scmp.lt.s32.totalorder %s144_s29, %s144_s29 }
  0xb4   :  { %p10623_p1 = scmp.lt.s32.totalorder %s10621_s9, %s10617_s18 }
  0xb6   :  { %p10624_p2 = por %p10623_p1, %p10622_p0 }
  0xb8   :  { %p10625_p3 = pnand %p10624_p2, %p10618_p13 }
  0xba   :  { %10628 = shalt.err (!%p10625_p3)
}
  0xbb   :  { %146 = dma.hbm_to_vmem [thread:$0]  %s11204_s11, 16, %s144_s29, [#allocation19]  }
  0xbc   :  { %10673 = dma.done.wait [#allocation4], 256  }
  0xbd   :  { %10674 = vsyncadd [#allocation4], 4294967040 }
  0xbe   :  { %10675 = dma.done.wait [#allocation7], 102560  }
  0xbf   :  { %10676 = vsyncadd [#allocation7], 4294864736 }
  0xc0   :  { %10677 = dma.done.wait [#allocation10], 10400  }
  0xc1   :  { %10678 = vsyncadd [#allocation10], 4294956896 }
  0xc2   :  { %10679 = dma.done.wait [#allocation13], 4128  }
  0xc3   :  { %10680 = vsyncadd [#allocation13], 4294963168 }
  0xc4   :  { %10681 = dma.done.wait [#allocation16], 2080  }
  0xc5   :  { %10682 = vsyncadd [#allocation16], 4294965216 }
  0xc6   :  { %10683 = dma.done.wait [#allocation19], 32  }
  0xc7   :  { %10684 = vsyncadd [#allocation19], 4294967264  ;;  %v8999_v0 = vld [vmem:[#allocation6 + $0x4] ss:$40 sps:$4 sm:$0xff]   ;;  %v9003_v2 = vld [vmem:[#allocation6] ss:$40 sps:$4 sm:$0xff]  }
  0xc8   :  { %v9001_v1 = vld [vmem:[#allocation6 + $0xc] ss:$40 sps:$4 sm:$0xff]   ;;  %5021 = vmatprep.subr.bf16.mxu0 %v8999_v0  ;;  %v9004_v3 = vld [vmem:[#allocation6 + $0x8] ss:$40 sps:$4 sm:$0xff]   ;;  %v9007_v5 = vld [vmem:[#allocation6 + $0x5c] ss:$40 sps:$4 sm:$0xff]  }
  0xc9   :  { %5226 = vmatprep.subr.bf16.mxu1 %v9001_v1  ;;  %v9005_v4 = vld [vmem:[#allocation6 + $0x54] ss:$40 sps:$4 sm:$0xff]   ;;  %5022 = vmatpush1.bf16.msra.mxu0 %v9003_v2  ;;  %v9009_v6 = vld [vmem:[#allocation6 + $0x50] ss:$40 sps:$4 sm:$0xff]   ;;  %v9011_v8 = vld [vmem:[#allocation6 + $0xa4] ss:$40 sps:$4 sm:$0xff]  }
  0xca   :  { %5227 = vmatpush1.bf16.msra.mxu1 %v9004_v3  ;;  %5023 = vmatprep.subr.bf16.mxu0 %v9005_v4  ;;  %v9010_v7 = vld [vmem:[#allocation6 + $0x58] ss:$40 sps:$4 sm:$0xff]   ;;  %v9013_v9 = vld [vmem:[#allocation6 + $0xac] ss:$40 sps:$4 sm:$0xff]   ;;  %v9016_v11 = vld [vmem:[#allocation6 + $0xa8] ss:$40 sps:$4 sm:$0xff]  }
  0xcb   :  { %5228 = vmatprep.subr.bf16.mxu1 %v9007_v5  ;;  %v9015_v10 = vld [vmem:[#allocation6 + $0xa0] ss:$40 sps:$4 sm:$0xff]   ;;  %v9017_v12 = vld [vmem:[#allocation6 + $0xf4] ss:$40 sps:$4 sm:$0xff]   ;;  %v9021_v14 = vld [vmem:[#allocation6 + $0xf0] ss:$40 sps:$4 sm:$0xff]  }
  0xcc   :  { %v9019_v13 = vld [vmem:[#allocation6 + $0xfc] ss:$40 sps:$4 sm:$0xff]   ;;  %v9022_v15 = vld [vmem:[#allocation6 + $0xf8] ss:$40 sps:$4 sm:$0xff]   ;;  %v9025_v17 = vld [vmem:[#allocation6 + $0x14c] ss:$40 sps:$4 sm:$0xff]  }
  0xcd   :  { %5024 = vmatpush1.bf16.msra.mxu0 %v9009_v6  ;;  %v9023_v16 = vld [vmem:[#allocation6 + $0x144] ss:$40 sps:$4 sm:$0xff]   ;;  %v9027_v18 = vld [vmem:[#allocation6 + $0x140] ss:$40 sps:$4 sm:$0xff]   ;;  %v9029_v20 = vld [vmem:[#allocation6 + $0x194] ss:$40 sps:$4 sm:$0xff]  }
  0xce   :  { %5229 = vmatpush1.bf16.msra.mxu1 %v9010_v7  ;;  %5025 = vmatprep.subr.bf16.mxu0 %v9011_v8  ;;  %v9028_v19 = vld [vmem:[#allocation6 + $0x148] ss:$40 sps:$4 sm:$0xff]   ;;  %v9031_v21 = vld [vmem:[#allocation6 + $0x19c] ss:$40 sps:$4 sm:$0xff]   ;;  %v9034_v23 = vld [vmem:[#allocation6 + $0x198] ss:$40 sps:$4 sm:$0xff]  }
  0xcf   :  { %5230 = vmatprep.subr.bf16.mxu1 %v9013_v9  ;;  %v9033_v22 = vld [vmem:[#allocation6 + $0x190] ss:$40 sps:$4 sm:$0xff]   ;;  %v9035_v24 = vld [vmem:[#allocation6 + $0x1e4] ss:$40 sps:$4 sm:$0xff]   ;;  %v9039_v26 = vld [vmem:[#allocation6 + $0x1e0] ss:$40 sps:$4 sm:$0xff]  }
  0xd0   :  { %v9037_v25 = vld [vmem:[#allocation6 + $0x1ec] ss:$40 sps:$4 sm:$0xff]   ;;  %v9040_v27 = vld [vmem:[#allocation6 + $0x1e8] ss:$40 sps:$4 sm:$0xff]   ;;  %v9043_v29 = vld [vmem:[#allocation6 + $0x23c] ss:$40 sps:$4 sm:$0xff]  }
  0xd1   :  { %5026 = vmatpush1.bf16.msra.mxu0 %v9015_v10  ;;  %v9041_v28 = vld [vmem:[#allocation6 + $0x234] ss:$40 sps:$4 sm:$0xff]   ;;  %v9045_v30 = vld [vmem:[#allocation6 + $0x230] ss:$40 sps:$4 sm:$0xff]   ;;  %v9047_v32 = vld [vmem:[#allocation6 + $0x284] ss:$40 sps:$4 sm:$0xff]  }
  0xd2   :  { %5231 = vmatpush1.bf16.msra.mxu1 %v9016_v11  ;;  %5027 = vmatprep.subr.bf16.mxu0 %v9017_v12  ;;  %v9046_v31 = vld [vmem:[#allocation6 + $0x238] ss:$40 sps:$4 sm:$0xff]   ;;  %v9049_v33 = vld [vmem:[#allocation6 + $0x28c] ss:$40 sps:$4 sm:$0xff]   ;;  %v9052_v35 = vld [vmem:[#allocation6 + $0x288] ss:$40 sps:$4 sm:$0xff]  }
  0xd3   :  { %5232 = vmatprep.subr.bf16.mxu1 %v9019_v13  ;;  %v9051_v34 = vld [vmem:[#allocation6 + $0x280] ss:$40 sps:$4 sm:$0xff]   ;;  %v9053_v36 = vld [vmem:[#allocation6 + $0x2d4] ss:$40 sps:$4 sm:$0xff]   ;;  %v9057_v38 = vld [vmem:[#allocation6 + $0x2d0] ss:$40 sps:$4 sm:$0xff]  }
  0xd4   :  { %v9055_v37 = vld [vmem:[#allocation6 + $0x2dc] ss:$40 sps:$4 sm:$0xff]   ;;  %v9058_v39 = vld [vmem:[#allocation6 + $0x2d8] ss:$40 sps:$4 sm:$0xff]   ;;  %v9061_v41 = vld [vmem:[#allocation6 + $0x32c] ss:$40 sps:$4 sm:$0xff]  }
  0xd5   :  { %5028 = vmatpush1.bf16.msra.mxu0 %v9021_v14  ;;  %v9059_v40 = vld [vmem:[#allocation6 + $0x324] ss:$40 sps:$4 sm:$0xff]   ;;  %v9063_v42 = vld [vmem:[#allocation6 + $0x320] ss:$40 sps:$4 sm:$0xff]   ;;  %v9065_v44 = vld [vmem:[#allocation6 + $0x374] ss:$40 sps:$4 sm:$0xff]  }
  0xd6   :  { %5233 = vmatpush1.bf16.msra.mxu1 %v9022_v15  ;;  %5029 = vmatprep.subr.bf16.mxu0 %v9023_v16  ;;  %v9064_v43 = vld [vmem:[#allocation6 + $0x328] ss:$40 sps:$4 sm:$0xff]   ;;  %v9067_v45 = vld [vmem:[#allocation6 + $0x37c] ss:$40 sps:$4 sm:$0xff]   ;;  %v9070_v49 = vld [vmem:[#allocation6 + $0x378] ss:$40 sps:$4 sm:$0xff]  }
  0xd7   :  { %5234 = vmatprep.subr.bf16.mxu1 %v9025_v17  ;;  %v181_v46 = vld [vmem:[%s11193_s0] sm:$0xff]  ;;  %v9071_v50 = vld [vmem:[#allocation6 + $0x3c4] ss:$40 sps:$4 sm:$0xff]   ;;  %v9075_v52 = vld [vmem:[#allocation6 + $0x3c0] ss:$40 sps:$4 sm:$0xff]   ;;  %vm7272_vm0 = vcmask 39936  }
  0xd8   :  { %v9069_v47 = vld [vmem:[#allocation6 + $0x370] ss:$40 sps:$4 sm:$0xff]   ;;  %v10927_v48 = vcombine.high %v181_v46, %v181_v46  ;;  %v9073_v51 = vld [vmem:[#allocation6 + $0x3cc] ss:$40 sps:$4 sm:$0xff]   ;;  %v9079_v55 = vld [vmem:[#allocation6 + $0x41c] ss:$40 sps:$4 sm:$0xff]   ;;  %v10931_v5 = vcombine.low %v181_v46, %v181_v46 }
  0xd9   :  { %5030 = vmatpush1.bf16.msra.mxu0 %v9027_v18  ;;  %v9076_v53 = vld [vmem:[#allocation6 + $0x3c8] ss:$40 sps:$4 sm:$0xff]   ;;  %v9077_v54 = vld [vmem:[#allocation6 + $0x414] ss:$40 sps:$4 sm:$0xff]   ;;  %v9082_v57 = vld [vmem:[#allocation6 + $0x418] ss:$40 sps:$4 sm:$0xff]  }
  0xda   :  { %5235 = vmatpush1.bf16.msra.mxu1 %v9028_v19  ;;  %5031 = vmatprep.subr.bf16.mxu0 %v9029_v20  ;;  %v9081_v56 = vld [vmem:[#allocation6 + $0x410] ss:$40 sps:$4 sm:$0xff]   ;;  %v9083_v58 = vld [vmem:[#allocation6 + $0x464] ss:$40 sps:$4 sm:$0xff]   ;;  %v9087_v60 = vld [vmem:[#allocation6 + $0x460] ss:$40 sps:$4 sm:$0xff]  }
  0xdb   :  { %5236 = vmatprep.subr.bf16.mxu1 %v9031_v21  ;;  %5053 = vmatprep.mubr.bf16.mxu0 %v10927_v48  ;;  %v9085_v59 = vld [vmem:[#allocation6 + $0x46c] ss:$40 sps:$4 sm:$0xff]   ;;  %v9088_v61 = vld [vmem:[#allocation6 + $0x468] ss:$40 sps:$4 sm:$0xff]   ;;  %v9091_v63 = vld [vmem:[#allocation6 + $0x4bc] ss:$40 sps:$4 sm:$0xff]  }
  0xdc   :  { %5258 = vmatprep.mubr.bf16.mxu1 %v10927_v48  ;;  %v9089_v62 = vld [vmem:[#allocation6 + $0x4b4] ss:$40 sps:$4 sm:$0xff]   ;;  %v9093_v0 = vld [vmem:[#allocation6 + $0x4b0] ss:$40 sps:$4 sm:$0xff]   ;;  %v9098_v2 = vld [vmem:[#allocation6 + $0x504] ss:$40 sps:$4 sm:$0xff]  }
  0xdd   :  { %5032 = vmatpush1.bf16.msra.mxu0 %v9033_v22  ;;  %v9094_v1 = vld [vmem:[#allocation6 + $0x4b8] ss:$40 sps:$4 sm:$0xff]   ;;  %v9101_v3 = vld [vmem:[#allocation6 + $0x50c] ss:$40 sps:$4 sm:$0xff]   ;;  %v9099_v6 = vld [vmem:[#allocation6 + $0x508] ss:$40 sps:$4 sm:$0xff]  }
  0xde   :  { %5237 = vmatpush1.bf16.msra.mxu1 %v9034_v23  ;;  %5033 = vmatprep.subr.bf16.mxu0 %v9035_v24  ;;  %v9096_v4 = vld [vmem:[#allocation6 + $0x500] ss:$40 sps:$4 sm:$0xff]   ;;  %v9105_v7 = vld [vmem:[#allocation6 + $0x554] ss:$40 sps:$4 sm:$0xff]   ;;  %v9103_v9 = vld [vmem:[#allocation6 + $0x550] ss:$40 sps:$4 sm:$0xff]  }
  0xdf   :  { %5238 = vmatprep.subr.bf16.mxu1 %v9037_v25  ;;  %v9108_v8 = vld [vmem:[#allocation6 + $0x55c] ss:$40 sps:$4 sm:$0xff]   ;;  %v9106_v10 = vld [vmem:[#allocation6 + $0x558] ss:$40 sps:$4 sm:$0xff]   ;;  %v9114_v12 = vld [vmem:[#allocation6 + $0x5ac] ss:$40 sps:$4 sm:$0xff]  }
  0xe0   :  { %v9111_v11 = vld [vmem:[#allocation6 + $0x5a4] ss:$40 sps:$4 sm:$0xff]   ;;  %v9109_v13 = vld [vmem:[#allocation6 + $0x5a0] ss:$40 sps:$4 sm:$0xff]   ;;  %v9117_v15 = vld [vmem:[#allocation6 + $0x5f4] ss:$40 sps:$4 sm:$0xff]  }
  0xe1   :  { %5034 = vmatpush1.bf16.msra.mxu0 %v9039_v26  ;;  %v9112_v14 = vld [vmem:[#allocation6 + $0x5a8] ss:$40 sps:$4 sm:$0xff]   ;;  %v9120_v16 = vld [vmem:[#allocation6 + $0x5fc] ss:$40 sps:$4 sm:$0xff]   ;;  %v9118_v18 = vld [vmem:[#allocation6 + $0x5f8] ss:$40 sps:$4 sm:$0xff]  }
  0xe2   :  { %5239 = vmatpush1.bf16.msra.mxu1 %v9040_v27  ;;  %5035 = vmatprep.subr.bf16.mxu0 %v9041_v28  ;;  %v9115_v17 = vld [vmem:[#allocation6 + $0x5f0] ss:$40 sps:$4 sm:$0xff]   ;;  %v9123_v19 = vld [vmem:[#allocation6 + $0x644] ss:$40 sps:$4 sm:$0xff]   ;;  %v9121_v21 = vld [vmem:[#allocation6 + $0x640] ss:$40 sps:$4 sm:$0xff]  }
  0xe3   :  { %5240 = vmatprep.subr.bf16.mxu1 %v9043_v29  ;;  %v9126_v20 = vld [vmem:[#allocation6 + $0x64c] ss:$40 sps:$4 sm:$0xff]   ;;  %v9124_v22 = vld [vmem:[#allocation6 + $0x648] ss:$40 sps:$4 sm:$0xff]   ;;  %v9132_v24 = vld [vmem:[#allocation6 + $0x69c] ss:$40 sps:$4 sm:$0xff]  }
  0xe4   :  { %v9129_v23 = vld [vmem:[#allocation6 + $0x694] ss:$40 sps:$4 sm:$0xff]   ;;  %v9127_v25 = vld [vmem:[#allocation6 + $0x690] ss:$40 sps:$4 sm:$0xff]   ;;  %v9135_v27 = vld [vmem:[#allocation6 + $0x6e4] ss:$40 sps:$4 sm:$0xff]  }
  0xe5   :  { %5036 = vmatpush1.bf16.msra.mxu0 %v9045_v30  ;;  %v9130_v26 = vld [vmem:[#allocation6 + $0x698] ss:$40 sps:$4 sm:$0xff]   ;;  %v9138_v28 = vld [vmem:[#allocation6 + $0x6ec] ss:$40 sps:$4 sm:$0xff]  }
  0xe6   :  { %5241 = vmatpush1.bf16.msra.mxu1 %v9046_v31  ;;  %5037 = vmatprep.subr.bf16.mxu0 %v9047_v32  ;;  %v10938_v29 = vld [vmem:[%s11193_s0 + $0x8] sm:$0xff]  ;;  %v9136_v32 = vld [vmem:[#allocation6 + $0x6e8] ss:$40 sps:$4 sm:$0xff]   ;;  %v9162_v46 = vld [vmem:[#allocation6 + $0x82c] ss:$40 sps:$4 sm:$0xff]  }
  0xe7   :  { %5242 = vmatprep.subr.bf16.mxu1 %v9049_v33  ;;  %v10942_v30 = vcombine.high %v10938_v29, %v10938_v29  ;;  %v9133_v31 = vld [vmem:[#allocation6 + $0x6e0] ss:$40 sps:$4 sm:$0xff]   ;;  %v9141_v33 = vld [vmem:[#allocation6 + $0x734] ss:$40 sps:$4 sm:$0xff]  }
  0xe9   :  { %5038 = vmatpush1.bf16.msra.mxu0 %v9051_v34  ;;  %v9144_v34 = vld [vmem:[#allocation6 + $0x73c] ss:$40 sps:$4 sm:$0xff]  }
  0xea   :  { %5243 = vmatpush1.bf16.msra.mxu1 %v9052_v35  ;;  %5039 = vmatprep.subr.bf16.mxu0 %v9053_v36  ;;  %v9139_v35 = vld [vmem:[#allocation6 + $0x730] ss:$40 sps:$4 sm:$0xff]  }
  0xeb   :  { %5244 = vmatprep.subr.bf16.mxu1 %v9055_v37  ;;  %v9142_v36 = vld [vmem:[#allocation6 + $0x738] ss:$40 sps:$4 sm:$0xff]   ;;  %v9147_v37 = vld [vmem:[#allocation6 + $0x784] ss:$40 sps:$4 sm:$0xff]  }
  0xed   :  { %5040 = vmatpush1.bf16.msra.mxu0 %v9057_v38  ;;  %v9150_v38 = vld [vmem:[#allocation6 + $0x78c] ss:$40 sps:$4 sm:$0xff]  }
  0xee   :  { %5245 = vmatpush1.bf16.msra.mxu1 %v9058_v39  ;;  %5041 = vmatprep.subr.bf16.mxu0 %v9059_v40  ;;  %v9145_v39 = vld [vmem:[#allocation6 + $0x780] ss:$40 sps:$4 sm:$0xff]  }
  0xef   :  { %5246 = vmatprep.subr.bf16.mxu1 %v9061_v41  ;;  %v9148_v40 = vld [vmem:[#allocation6 + $0x788] ss:$40 sps:$4 sm:$0xff]   ;;  %v9153_v41 = vld [vmem:[#allocation6 + $0x7d4] ss:$40 sps:$4 sm:$0xff]  }
  0xf1   :  { %5042 = vmatpush1.bf16.msra.mxu0 %v9063_v42  ;;  %v9156_v42 = vld [vmem:[#allocation6 + $0x7dc] ss:$40 sps:$4 sm:$0xff]  }
  0xf2   :  { %5247 = vmatpush1.bf16.msra.mxu1 %v9064_v43  ;;  %5043 = vmatprep.subr.bf16.mxu0 %v9065_v44  ;;  %v9151_v43 = vld [vmem:[#allocation6 + $0x7d0] ss:$40 sps:$4 sm:$0xff]  }
  0xf3   :  { %5248 = vmatprep.subr.bf16.mxu1 %v9067_v45  ;;  %v9154_v44 = vld [vmem:[#allocation6 + $0x7d8] ss:$40 sps:$4 sm:$0xff]   ;;  %v9159_v45 = vld [vmem:[#allocation6 + $0x824] ss:$40 sps:$4 sm:$0xff]  }
  0xf5   :  { %5044 = vmatpush1.bf16.msra.mxu0 %v9069_v47  ;;  %v9157_v47 = vld [vmem:[#allocation6 + $0x820] ss:$40 sps:$4 sm:$0xff]  }
  0xf6   :  { %5249 = vmatpush1.bf16.msra.mxu1 %v9070_v49  ;;  %5045 = vmatprep.subr.bf16.mxu0 %v9071_v50  ;;  %v9160_v49 = vld [vmem:[#allocation6 + $0x828] ss:$40 sps:$4 sm:$0xff]   ;;  %v9165_v50 = vld [vmem:[#allocation6 + $0x874] ss:$40 sps:$4 sm:$0xff]  }
  0xf7   :  { %5250 = vmatprep.subr.bf16.mxu1 %v9073_v51  ;;  %v9168_v51 = vld [vmem:[#allocation6 + $0x87c] ss:$40 sps:$4 sm:$0xff]  }
  0xf9   :  { %5046 = vmatpush1.bf16.msra.mxu0 %v9075_v52  ;;  %v9163_v52 = vld [vmem:[#allocation6 + $0x870] ss:$40 sps:$4 sm:$0xff]  }
  0xfa   :  { %5251 = vmatpush1.bf16.msra.mxu1 %v9076_v53  ;;  %5047 = vmatprep.subr.bf16.mxu0 %v9077_v54  ;;  %v9166_v53 = vld [vmem:[#allocation6 + $0x878] ss:$40 sps:$4 sm:$0xff]   ;;  %v9171_v54 = vld [vmem:[#allocation6 + $0x8c4] ss:$40 sps:$4 sm:$0xff]  }
  0xfb   :  { %5252 = vmatprep.subr.bf16.mxu1 %v9079_v55  ;;  %v9174_v55 = vld [vmem:[#allocation6 + $0x8cc] ss:$40 sps:$4 sm:$0xff]  }
  0xfd   :  { %5048 = vmatpush1.bf16.msra.mxu0 %v9081_v56  ;;  %v9169_v56 = vld [vmem:[#allocation6 + $0x8c0] ss:$40 sps:$4 sm:$0xff]  }
  0xfe   :  { %5253 = vmatpush1.bf16.msra.mxu1 %v9082_v57  ;;  %5049 = vmatprep.subr.bf16.mxu0 %v9083_v58  ;;  %v9172_v57 = vld [vmem:[#allocation6 + $0x8c8] ss:$40 sps:$4 sm:$0xff]   ;;  %v9177_v58 = vld [vmem:[#allocation6 + $0x914] ss:$40 sps:$4 sm:$0xff]  }
  0xff   :  { %5254 = vmatprep.subr.bf16.mxu1 %v9085_v59  ;;  %v9180_v59 = vld [vmem:[#allocation6 + $0x91c] ss:$40 sps:$4 sm:$0xff]  }
 0x101   :  { %5050 = vmatpush1.bf16.msra.mxu0 %v9087_v60  ;;  %v9175_v60 = vld [vmem:[#allocation6 + $0x910] ss:$40 sps:$4 sm:$0xff]  }
 0x102   :  { %5255 = vmatpush1.bf16.msra.mxu1 %v9088_v61  ;;  %5051 = vmatprep.subr.bf16.mxu0 %v9089_v62  ;;  %v9178_v61 = vld [vmem:[#allocation6 + $0x918] ss:$40 sps:$4 sm:$0xff]   ;;  %v9183_v62 = vld [vmem:[#allocation6 + $0x964] ss:$40 sps:$4 sm:$0xff]  }
 0x103   :  { %5256 = vmatprep.subr.bf16.mxu1 %v9091_v63  ;;  %v9186_v63 = vld [vmem:[#allocation6 + $0x96c] ss:$40 sps:$4 sm:$0xff]  }
 0x105   :  { %5052 = vmatpush1.bf16.msra.mxu0 %v9093_v0  ;;  %v9181_v0 = vld [vmem:[#allocation6 + $0x960] ss:$40 sps:$4 sm:$0xff]  }
 0x106   :  { %5257 = vmatpush1.bf16.msra.mxu1 %v9094_v1  ;;  %5062 = vmatprep.subr.bf16.mxu0 %v9098_v2  ;;  %v9184_v1 = vld [vmem:[#allocation6 + $0x968] ss:$40 sps:$4 sm:$0xff]   ;;  %v9189_v2 = vld [vmem:[#allocation6 + $0x9b4] ss:$40 sps:$4 sm:$0xff]  }
 0x107   :  { %5267 = vmatprep.subr.bf16.mxu1 %v9101_v3  ;;  %v9192_v3 = vld [vmem:[#allocation6 + $0x9bc] ss:$40 sps:$4 sm:$0xff]  }
 0x108   :  { %5054 = vmatmul.mubr.bf16.vlgmr.msra.gmra.mrb[0].mxu0 %v10931_v5 }
 0x109   :  { %5259 = vmatmul.mubr.bf16.vlgmr.msra.gmra.mrb[0].mxu1 %v10931_v5  ;;  %5063 = vmatpush1.bf16.msra.mxu0 %v9096_v4  ;;  %v9187_v4 = vld [vmem:[#allocation6 + $0x9b0] ss:$40 sps:$4 sm:$0xff]  }
 0x10a   :  { %5268 = vmatpush1.bf16.msra.mxu1 %v9099_v6  ;;  %5064 = vmatprep.subr.bf16.mxu0 %v9105_v7  ;;  %v9190_v6 = vld [vmem:[#allocation6 + $0x9b8] ss:$40 sps:$4 sm:$0xff]   ;;  %v9196_v7 = vld [vmem:[#allocation6 + $0xa04] ss:$40 sps:$4 sm:$0xff]  }
 0x10b   :  { %5269 = vmatprep.subr.bf16.mxu1 %v9108_v8  ;;  %5094 = vmatprep.mubr.bf16.mxu0 %v10942_v30  ;;  %v9199_v8 = vld [vmem:[#allocation6 + $0xa0c] ss:$40 sps:$4 sm:$0xff]  }
 0x10c   :  { %5299 = vmatprep.mubr.bf16.mxu1 %v10942_v30 }
 0x10d   :  { %5065 = vmatpush1.bf16.msra.mxu0 %v9103_v9  ;;  %v9194_v9 = vld [vmem:[#allocation6 + $0xa00] ss:$40 sps:$4 sm:$0xff]  }
 0x10e   :  { %5270 = vmatpush1.bf16.msra.mxu1 %v9106_v10  ;;  %5066 = vmatprep.subr.bf16.mxu0 %v9111_v11  ;;  %v10948_v10 = vcombine.low %v10938_v29, %v10938_v29  ;;  %v9197_v11 = vld [vmem:[#allocation6 + $0xa08] ss:$40 sps:$4 sm:$0xff]  }
 0x10f   :  { %5271 = vmatprep.subr.bf16.mxu1 %v9114_v12  ;;  %v9203_v12 = vld [vmem:[#allocation6 + $0xa54] ss:$40 sps:$4 sm:$0xff]   ;;  %v9222_v29 = vld [vmem:[#allocation6 + $0xb48] ss:$40 sps:$4 sm:$0xff]  }
 0x111   :  { %5067 = vmatpush1.bf16.msra.mxu0 %v9109_v13  ;;  %v10953_v13 = vld [vmem:[%s11193_s0 + $0x10] sm:$0xff] }
 0x112   :  { %5272 = vmatpush1.bf16.msra.mxu1 %v9112_v14  ;;  %5068 = vmatprep.subr.bf16.mxu0 %v9117_v15  ;;  %v9206_v14 = vld [vmem:[#allocation6 + $0xa5c] ss:$40 sps:$4 sm:$0xff]   ;;  %v10957_v15 = vcombine.high %v10953_v13, %v10953_v13 }
 0x113   :  { %5273 = vmatprep.subr.bf16.mxu1 %v9120_v16  ;;  %v9201_v16 = vld [vmem:[#allocation6 + $0xa50] ss:$40 sps:$4 sm:$0xff]  }
 0x115   :  { %5069 = vmatpush1.bf16.msra.mxu0 %v9115_v17  ;;  %v9204_v17 = vld [vmem:[#allocation6 + $0xa58] ss:$40 sps:$4 sm:$0xff]  }
 0x116   :  { %5274 = vmatpush1.bf16.msra.mxu1 %v9118_v18  ;;  %5070 = vmatprep.subr.bf16.mxu0 %v9123_v19  ;;  %v9209_v18 = vld [vmem:[#allocation6 + $0xaa4] ss:$40 sps:$4 sm:$0xff]  }
 0x117   :  { %5275 = vmatprep.subr.bf16.mxu1 %v9126_v20  ;;  %v9212_v19 = vld [vmem:[#allocation6 + $0xaac] ss:$40 sps:$4 sm:$0xff]   ;;  %v9207_v20 = vld [vmem:[#allocation6 + $0xaa0] ss:$40 sps:$4 sm:$0xff]  }
 0x119   :  { %5071 = vmatpush1.bf16.msra.mxu0 %v9121_v21  ;;  %v9210_v21 = vld [vmem:[#allocation6 + $0xaa8] ss:$40 sps:$4 sm:$0xff]  }
 0x11a   :  { %5276 = vmatpush1.bf16.msra.mxu1 %v9124_v22  ;;  %5072 = vmatprep.subr.bf16.mxu0 %v9129_v23  ;;  %v9215_v22 = vld [vmem:[#allocation6 + $0xaf4] ss:$40 sps:$4 sm:$0xff]  }
 0x11b   :  { %5277 = vmatprep.subr.bf16.mxu1 %v9132_v24  ;;  %v9218_v23 = vld [vmem:[#allocation6 + $0xafc] ss:$40 sps:$4 sm:$0xff]   ;;  %v9213_v24 = vld [vmem:[#allocation6 + $0xaf0] ss:$40 sps:$4 sm:$0xff]  }
 0x11d   :  { %5073 = vmatpush1.bf16.msra.mxu0 %v9127_v25  ;;  %v9216_v25 = vld [vmem:[#allocation6 + $0xaf8] ss:$40 sps:$4 sm:$0xff]  }
 0x11e   :  { %5278 = vmatpush1.bf16.msra.mxu1 %v9130_v26  ;;  %5074 = vmatprep.subr.bf16.mxu0 %v9135_v27  ;;  %v9221_v26 = vld [vmem:[#allocation6 + $0xb44] ss:$40 sps:$4 sm:$0xff]  }
 0x11f   :  { %5279 = vmatprep.subr.bf16.mxu1 %v9138_v28  ;;  %v9224_v27 = vld [vmem:[#allocation6 + $0xb4c] ss:$40 sps:$4 sm:$0xff]   ;;  %v9219_v28 = vld [vmem:[#allocation6 + $0xb40] ss:$40 sps:$4 sm:$0xff]  }
 0x121   :  { %5075 = vmatpush1.bf16.msra.mxu0 %v9133_v31  ;;  %v9227_v31 = vld [vmem:[#allocation6 + $0xb94] ss:$40 sps:$4 sm:$0xff]  }
 0x122   :  { %5280 = vmatpush1.bf16.msra.mxu1 %v9136_v32  ;;  %5076 = vmatprep.subr.bf16.mxu0 %v9141_v33  ;;  %v9230_v32 = vld [vmem:[#allocation6 + $0xb9c] ss:$40 sps:$4 sm:$0xff]   ;;  %v9225_v33 = vld [vmem:[#allocation6 + $0xb90] ss:$40 sps:$4 sm:$0xff]  }
 0x123   :  { %5281 = vmatprep.subr.bf16.mxu1 %v9144_v34  ;;  %v9228_v34 = vld [vmem:[#allocation6 + $0xb98] ss:$40 sps:$4 sm:$0xff]  }
 0x125   :  { %5077 = vmatpush1.bf16.msra.mxu0 %v9139_v35  ;;  %v9233_v35 = vld [vmem:[#allocation6 + $0xbe4] ss:$40 sps:$4 sm:$0xff]  }
 0x126   :  { %5282 = vmatpush1.bf16.msra.mxu1 %v9142_v36  ;;  %5078 = vmatprep.subr.bf16.mxu0 %v9147_v37  ;;  %v9236_v36 = vld [vmem:[#allocation6 + $0xbec] ss:$40 sps:$4 sm:$0xff]   ;;  %v9231_v37 = vld [vmem:[#allocation6 + $0xbe0] ss:$40 sps:$4 sm:$0xff]  }
 0x127   :  { %5283 = vmatprep.subr.bf16.mxu1 %v9150_v38  ;;  %v9234_v38 = vld [vmem:[#allocation6 + $0xbe8] ss:$40 sps:$4 sm:$0xff]  }
 0x129   :  { %5079 = vmatpush1.bf16.msra.mxu0 %v9145_v39  ;;  %v9239_v39 = vld [vmem:[#allocation6 + $0xc34] ss:$40 sps:$4 sm:$0xff]  }
 0x12a   :  { %5284 = vmatpush1.bf16.msra.mxu1 %v9148_v40  ;;  %5080 = vmatprep.subr.bf16.mxu0 %v9153_v41  ;;  %v9242_v40 = vld [vmem:[#allocation6 + $0xc3c] ss:$40 sps:$4 sm:$0xff]   ;;  %v9237_v41 = vld [vmem:[#allocation6 + $0xc30] ss:$40 sps:$4 sm:$0xff]  }
 0x12b   :  { %5285 = vmatprep.subr.bf16.mxu1 %v9156_v42  ;;  %v9240_v42 = vld [vmem:[#allocation6 + $0xc38] ss:$40 sps:$4 sm:$0xff]  }
 0x12d   :  { %5081 = vmatpush1.bf16.msra.mxu0 %v9151_v43  ;;  %v9245_v43 = vld [vmem:[#allocation6 + $0xc84] ss:$40 sps:$4 sm:$0xff]  }
 0x12e   :  { %5286 = vmatpush1.bf16.msra.mxu1 %v9154_v44  ;;  %5082 = vmatprep.subr.bf16.mxu0 %v9159_v45  ;;  %v9248_v44 = vld [vmem:[#allocation6 + $0xc8c] ss:$40 sps:$4 sm:$0xff]   ;;  %v9243_v45 = vld [vmem:[#allocation6 + $0xc80] ss:$40 sps:$4 sm:$0xff]  }
 0x12f   :  { %5287 = vmatprep.subr.bf16.mxu1 %v9162_v46  ;;  %v9246_v46 = vld [vmem:[#allocation6 + $0xc88] ss:$40 sps:$4 sm:$0xff]  }
 0x131   :  { %5083 = vmatpush1.bf16.msra.mxu0 %v9157_v47  ;;  %v9251_v47 = vld [vmem:[#allocation6 + $0xcd4] ss:$40 sps:$4 sm:$0xff]  }
 0x132   :  { %5288 = vmatpush1.bf16.msra.mxu1 %v9160_v49  ;;  %5084 = vmatprep.subr.bf16.mxu0 %v9165_v50  ;;  %v9254_v49 = vld [vmem:[#allocation6 + $0xcdc] ss:$40 sps:$4 sm:$0xff]   ;;  %v9249_v50 = vld [vmem:[#allocation6 + $0xcd0] ss:$40 sps:$4 sm:$0xff]  }
 0x133   :  { %5289 = vmatprep.subr.bf16.mxu1 %v9168_v51  ;;  %v9252_v51 = vld [vmem:[#allocation6 + $0xcd8] ss:$40 sps:$4 sm:$0xff]  }
 0x135   :  { %5085 = vmatpush1.bf16.msra.mxu0 %v9163_v52  ;;  %v9257_v52 = vld [vmem:[#allocation6 + $0xd24] ss:$40 sps:$4 sm:$0xff]  }
 0x136   :  { %5290 = vmatpush1.bf16.msra.mxu1 %v9166_v53  ;;  %5086 = vmatprep.subr.bf16.mxu0 %v9171_v54  ;;  %v9260_v53 = vld [vmem:[#allocation6 + $0xd2c] ss:$40 sps:$4 sm:$0xff]   ;;  %v9255_v54 = vld [vmem:[#allocation6 + $0xd20] ss:$40 sps:$4 sm:$0xff]  }
 0x137   :  { %5291 = vmatprep.subr.bf16.mxu1 %v9174_v55  ;;  %v9258_v55 = vld [vmem:[#allocation6 + $0xd28] ss:$40 sps:$4 sm:$0xff]  }
 0x139   :  { %5087 = vmatpush1.bf16.msra.mxu0 %v9169_v56  ;;  %v9263_v56 = vld [vmem:[#allocation6 + $0xd74] ss:$40 sps:$4 sm:$0xff]  }
 0x13a   :  { %5292 = vmatpush1.bf16.msra.mxu1 %v9172_v57  ;;  %5088 = vmatprep.subr.bf16.mxu0 %v9177_v58  ;;  %v9266_v57 = vld [vmem:[#allocation6 + $0xd7c] ss:$40 sps:$4 sm:$0xff]   ;;  %v9261_v58 = vld [vmem:[#allocation6 + $0xd70] ss:$40 sps:$4 sm:$0xff]  }
 0x13b   :  { %5293 = vmatprep.subr.bf16.mxu1 %v9180_v59  ;;  %v9264_v59 = vld [vmem:[#allocation6 + $0xd78] ss:$40 sps:$4 sm:$0xff]  }
 0x13d   :  { %5089 = vmatpush1.bf16.msra.mxu0 %v9175_v60  ;;  %v9269_v60 = vld [vmem:[#allocation6 + $0xdc4] ss:$40 sps:$4 sm:$0xff]  }
 0x13e   :  { %5294 = vmatpush1.bf16.msra.mxu1 %v9178_v61  ;;  %5090 = vmatprep.subr.bf16.mxu0 %v9183_v62  ;;  %v9272_v61 = vld [vmem:[#allocation6 + $0xdcc] ss:$40 sps:$4 sm:$0xff]   ;;  %v9267_v62 = vld [vmem:[#allocation6 + $0xdc0] ss:$40 sps:$4 sm:$0xff]  }
 0x13f   :  { %5295 = vmatprep.subr.bf16.mxu1 %v9186_v63  ;;  %v9270_v63 = vld [vmem:[#allocation6 + $0xdc8] ss:$40 sps:$4 sm:$0xff]  }
 0x141   :  { %5091 = vmatpush1.bf16.msra.mxu0 %v9181_v0  ;;  %v9275_v0 = vld [vmem:[#allocation6 + $0xe14] ss:$40 sps:$4 sm:$0xff]  }
 0x142   :  { %5296 = vmatpush1.bf16.msra.mxu1 %v9184_v1  ;;  %5092 = vmatprep.subr.bf16.mxu0 %v9189_v2  ;;  %v9278_v1 = vld [vmem:[#allocation6 + $0xe1c] ss:$40 sps:$4 sm:$0xff]   ;;  %v9273_v2 = vld [vmem:[#allocation6 + $0xe10] ss:$40 sps:$4 sm:$0xff]  }
 0x143   :  { %5297 = vmatprep.subr.bf16.mxu1 %v9192_v3  ;;  %v9276_v3 = vld [vmem:[#allocation6 + $0xe18] ss:$40 sps:$4 sm:$0xff]  }
 0x145   :  { %5093 = vmatpush1.bf16.msra.mxu0 %v9187_v4  ;;  %v9281_v4 = vld [vmem:[#allocation6 + $0xe64] ss:$40 sps:$4 sm:$0xff]  }
 0x146   :  { %5298 = vmatpush1.bf16.msra.mxu1 %v9190_v6  ;;  %5103 = vmatprep.subr.bf16.mxu0 %v9196_v7  ;;  %v9284_v6 = vld [vmem:[#allocation6 + $0xe6c] ss:$40 sps:$4 sm:$0xff]   ;;  %v9279_v7 = vld [vmem:[#allocation6 + $0xe60] ss:$40 sps:$4 sm:$0xff]  }
 0x147   :  { %5308 = vmatprep.subr.bf16.mxu1 %v9199_v8  ;;  %v9282_v8 = vld [vmem:[#allocation6 + $0xe68] ss:$40 sps:$4 sm:$0xff]  }
 0x148   :  { %5095 = vmatmul.mubr.bf16.vlgmr.msra.gmra.mrb[0].mxu0 %v10948_v10 }
 0x149   :  { %5300 = vmatmul.mubr.bf16.vlgmr.msra.gmra.mrb[0].mxu1 %v10948_v10  ;;  %5104 = vmatpush1.bf16.msra.mxu0 %v9194_v9  ;;  %v9287_v9 = vld [vmem:[#allocation6 + $0xeb4] ss:$40 sps:$4 sm:$0xff]  }
 0x14a   :  { %5309 = vmatpush1.bf16.msra.mxu1 %v9197_v11  ;;  %5105 = vmatprep.subr.bf16.mxu0 %v9203_v12  ;;  %v9290_v11 = vld [vmem:[#allocation6 + $0xebc] ss:$40 sps:$4 sm:$0xff]   ;;  %v9285_v12 = vld [vmem:[#allocation6 + $0xeb0] ss:$40 sps:$4 sm:$0xff]  }
 0x14b   :  { %5310 = vmatprep.subr.bf16.mxu1 %v9206_v14  ;;  %5135 = vmatprep.mubr.bf16.mxu0 %v10957_v15  ;;  %v9288_v14 = vld [vmem:[#allocation6 + $0xeb8] ss:$40 sps:$4 sm:$0xff]  }
 0x14c   :  { %5340 = vmatprep.mubr.bf16.mxu1 %v10957_v15 }
 0x14d   :  { %5106 = vmatpush1.bf16.msra.mxu0 %v9201_v16  ;;  %v9294_v16 = vld [vmem:[#allocation6 + $0xf04] ss:$40 sps:$4 sm:$0xff]  }
 0x14e   :  { %5311 = vmatpush1.bf16.msra.mxu1 %v9204_v17  ;;  %5107 = vmatprep.subr.bf16.mxu0 %v9209_v18  ;;  %v9297_v17 = vld [vmem:[#allocation6 + $0xf0c] ss:$40 sps:$4 sm:$0xff]   ;;  %v9292_v18 = vld [vmem:[#allocation6 + $0xf00] ss:$40 sps:$4 sm:$0xff]  }
 0x14f   :  { %5312 = vmatprep.subr.bf16.mxu1 %v9212_v19  ;;  %v9295_v19 = vld [vmem:[#allocation6 + $0xf08] ss:$40 sps:$4 sm:$0xff]  }
 0x151   :  { %5108 = vmatpush1.bf16.msra.mxu0 %v9207_v20  ;;  %v10965_v20 = vcombine.low %v10953_v13, %v10953_v13  ;;  %v9299_v13 = vld [vmem:[#allocation6 + $0xf50] ss:$40 sps:$4 sm:$0xff]  }
 0x152   :  { %5313 = vmatpush1.bf16.msra.mxu1 %v9210_v21  ;;  %5109 = vmatprep.subr.bf16.mxu0 %v9215_v22  ;;  %v10970_v21 = vld [vmem:[%s11193_s0 + $0x18] sm:$0xff] }
 0x153   :  { %5314 = vmatprep.subr.bf16.mxu1 %v9218_v23  ;;  %v9301_v22 = vld [vmem:[#allocation6 + $0xf54] ss:$40 sps:$4 sm:$0xff]  }
 0x154   :  { %v9304_v23 = vld [vmem:[#allocation6 + $0xf5c] ss:$40 sps:$4 sm:$0xff]  }
 0x155   :  { %5110 = vmatpush1.bf16.msra.mxu0 %v9213_v24  ;;  %v10974_v24 = vcombine.high %v10970_v21, %v10970_v21 }
 0x156   :  { %5315 = vmatpush1.bf16.msra.mxu1 %v9216_v25  ;;  %5111 = vmatprep.subr.bf16.mxu0 %v9221_v26  ;;  %v9302_v25 = vld [vmem:[#allocation6 + $0xf58] ss:$40 sps:$4 sm:$0xff]   ;;  %v9307_v26 = vld [vmem:[#allocation6 + $0xfa4] ss:$40 sps:$4 sm:$0xff]  }
 0x157   :  { %5316 = vmatprep.subr.bf16.mxu1 %v9224_v27  ;;  %v9310_v27 = vld [vmem:[#allocation6 + $0xfac] ss:$40 sps:$4 sm:$0xff]  }
 0x159   :  { %5112 = vmatpush1.bf16.msra.mxu0 %v9219_v28  ;;  %v9305_v28 = vld [vmem:[#allocation6 + $0xfa0] ss:$40 sps:$4 sm:$0xff]  }
 0x15a   :  { %5317 = vmatpush1.bf16.msra.mxu1 %v9222_v29  ;;  %5113 = vmatprep.subr.bf16.mxu0 %v9227_v31  ;;  %v9308_v29 = vld [vmem:[#allocation6 + $0xfa8] ss:$40 sps:$4 sm:$0xff]   ;;  %v9313_v31 = vld [vmem:[#allocation6 + $0xff4] ss:$40 sps:$4 sm:$0xff]  }
 0x15b   :  { %5318 = vmatprep.subr.bf16.mxu1 %v9230_v32  ;;  %v9316_v32 = vld [vmem:[#allocation6 + $0xffc] ss:$40 sps:$4 sm:$0xff]  }
 0x15d   :  { %5114 = vmatpush1.bf16.msra.mxu0 %v9225_v33  ;;  %v9311_v33 = vld [vmem:[#allocation6 + $0xff0] ss:$40 sps:$4 sm:$0xff]  }
 0x15e   :  { %5319 = vmatpush1.bf16.msra.mxu1 %v9228_v34  ;;  %5115 = vmatprep.subr.bf16.mxu0 %v9233_v35  ;;  %v9314_v34 = vld [vmem:[#allocation6 + $0xff8] ss:$40 sps:$4 sm:$0xff]   ;;  %v9319_v35 = vld [vmem:[#allocation6 + $0x1044] ss:$40 sps:$4 sm:$0xff]  }
 0x15f   :  { %5320 = vmatprep.subr.bf16.mxu1 %v9236_v36  ;;  %v9322_v36 = vld [vmem:[#allocation6 + $0x104c] ss:$40 sps:$4 sm:$0xff]  }
 0x161   :  { %5116 = vmatpush1.bf16.msra.mxu0 %v9231_v37  ;;  %v9317_v37 = vld [vmem:[#allocation6 + $0x1040] ss:$40 sps:$4 sm:$0xff]  }
 0x162   :  { %5321 = vmatpush1.bf16.msra.mxu1 %v9234_v38  ;;  %5117 = vmatprep.subr.bf16.mxu0 %v9239_v39  ;;  %v9320_v38 = vld [vmem:[#allocation6 + $0x1048] ss:$40 sps:$4 sm:$0xff]   ;;  %v9325_v39 = vld [vmem:[#allocation6 + $0x1094] ss:$40 sps:$4 sm:$0xff]  }
 0x163   :  { %5322 = vmatprep.subr.bf16.mxu1 %v9242_v40  ;;  %v9328_v40 = vld [vmem:[#allocation6 + $0x109c] ss:$40 sps:$4 sm:$0xff]  }
 0x165   :  { %5118 = vmatpush1.bf16.msra.mxu0 %v9237_v41  ;;  %v9323_v41 = vld [vmem:[#allocation6 + $0x1090] ss:$40 sps:$4 sm:$0xff]  }
 0x166   :  { %5323 = vmatpush1.bf16.msra.mxu1 %v9240_v42  ;;  %5119 = vmatprep.subr.bf16.mxu0 %v9245_v43  ;;  %v9326_v42 = vld [vmem:[#allocation6 + $0x1098] ss:$40 sps:$4 sm:$0xff]   ;;  %v9331_v43 = vld [vmem:[#allocation6 + $0x10e4] ss:$40 sps:$4 sm:$0xff]  }
 0x167   :  { %5324 = vmatprep.subr.bf16.mxu1 %v9248_v44  ;;  %v9334_v44 = vld [vmem:[#allocation6 + $0x10ec] ss:$40 sps:$4 sm:$0xff]  }
 0x169   :  { %5120 = vmatpush1.bf16.msra.mxu0 %v9243_v45  ;;  %v9329_v45 = vld [vmem:[#allocation6 + $0x10e0] ss:$40 sps:$4 sm:$0xff]  }
 0x16a   :  { %5325 = vmatpush1.bf16.msra.mxu1 %v9246_v46  ;;  %5121 = vmatprep.subr.bf16.mxu0 %v9251_v47  ;;  %v9332_v46 = vld [vmem:[#allocation6 + $0x10e8] ss:$40 sps:$4 sm:$0xff]   ;;  %v9337_v47 = vld [vmem:[#allocation6 + $0x1134] ss:$40 sps:$4 sm:$0xff]  }
 0x16b   :  { %5326 = vmatprep.subr.bf16.mxu1 %v9254_v49  ;;  %v9340_v49 = vld [vmem:[#allocation6 + $0x113c] ss:$40 sps:$4 sm:$0xff]  }
 0x16d   :  { %5122 = vmatpush1.bf16.msra.mxu0 %v9249_v50  ;;  %v9335_v50 = vld [vmem:[#allocation6 + $0x1130] ss:$40 sps:$4 sm:$0xff]  }
 0x16e   :  { %5327 = vmatpush1.bf16.msra.mxu1 %v9252_v51  ;;  %5123 = vmatprep.subr.bf16.mxu0 %v9257_v52  ;;  %v9338_v51 = vld [vmem:[#allocation6 + $0x1138] ss:$40 sps:$4 sm:$0xff]   ;;  %v9343_v52 = vld [vmem:[#allocation6 + $0x1184] ss:$40 sps:$4 sm:$0xff]  }
 0x16f   :  { %5328 = vmatprep.subr.bf16.mxu1 %v9260_v53  ;;  %v9346_v53 = vld [vmem:[#allocation6 + $0x118c] ss:$40 sps:$4 sm:$0xff]  }
 0x171   :  { %5124 = vmatpush1.bf16.msra.mxu0 %v9255_v54  ;;  %v9341_v54 = vld [vmem:[#allocation6 + $0x1180] ss:$40 sps:$4 sm:$0xff]  }
 0x172   :  { %5329 = vmatpush1.bf16.msra.mxu1 %v9258_v55  ;;  %5125 = vmatprep.subr.bf16.mxu0 %v9263_v56  ;;  %v9344_v55 = vld [vmem:[#allocation6 + $0x1188] ss:$40 sps:$4 sm:$0xff]   ;;  %v9349_v56 = vld [vmem:[#allocation6 + $0x11d4] ss:$40 sps:$4 sm:$0xff]  }
 0x173   :  { %5330 = vmatprep.subr.bf16.mxu1 %v9266_v57  ;;  %v9352_v57 = vld [vmem:[#allocation6 + $0x11dc] ss:$40 sps:$4 sm:$0xff]  }
 0x175   :  { %5126 = vmatpush1.bf16.msra.mxu0 %v9261_v58  ;;  %v9347_v58 = vld [vmem:[#allocation6 + $0x11d0] ss:$40 sps:$4 sm:$0xff]  }
 0x176   :  { %5331 = vmatpush1.bf16.msra.mxu1 %v9264_v59  ;;  %5127 = vmatprep.subr.bf16.mxu0 %v9269_v60  ;;  %v9350_v59 = vld [vmem:[#allocation6 + $0x11d8] ss:$40 sps:$4 sm:$0xff]   ;;  %v9355_v60 = vld [vmem:[#allocation6 + $0x1224] ss:$40 sps:$4 sm:$0xff]  }
 0x177   :  { %5332 = vmatprep.subr.bf16.mxu1 %v9272_v61  ;;  %v9358_v61 = vld [vmem:[#allocation6 + $0x122c] ss:$40 sps:$4 sm:$0xff]  }
 0x179   :  { %5128 = vmatpush1.bf16.msra.mxu0 %v9267_v62  ;;  %v9353_v62 = vld [vmem:[#allocation6 + $0x1220] ss:$40 sps:$4 sm:$0xff]  }
 0x17a   :  { %5333 = vmatpush1.bf16.msra.mxu1 %v9270_v63  ;;  %5129 = vmatprep.subr.bf16.mxu0 %v9275_v0  ;;  %v9356_v63 = vld [vmem:[#allocation6 + $0x1228] ss:$40 sps:$4 sm:$0xff]   ;;  %v9361_v0 = vld [vmem:[#allocation6 + $0x1274] ss:$40 sps:$4 sm:$0xff]  }
 0x17b   :  { %5334 = vmatprep.subr.bf16.mxu1 %v9278_v1  ;;  %v9364_v1 = vld [vmem:[#allocation6 + $0x127c] ss:$40 sps:$4 sm:$0xff]  }
 0x17d   :  { %5130 = vmatpush1.bf16.msra.mxu0 %v9273_v2  ;;  %v9359_v2 = vld [vmem:[#allocation6 + $0x1270] ss:$40 sps:$4 sm:$0xff]  }
 0x17e   :  { %5335 = vmatpush1.bf16.msra.mxu1 %v9276_v3  ;;  %5131 = vmatprep.subr.bf16.mxu0 %v9281_v4  ;;  %v9362_v3 = vld [vmem:[#allocation6 + $0x1278] ss:$40 sps:$4 sm:$0xff]   ;;  %v9367_v4 = vld [vmem:[#allocation6 + $0x12c4] ss:$40 sps:$4 sm:$0xff]  }
 0x17f   :  { %5336 = vmatprep.subr.bf16.mxu1 %v9284_v6  ;;  %v9370_v6 = vld [vmem:[#allocation6 + $0x12cc] ss:$40 sps:$4 sm:$0xff]  }
 0x181   :  { %5132 = vmatpush1.bf16.msra.mxu0 %v9279_v7  ;;  %v9365_v7 = vld [vmem:[#allocation6 + $0x12c0] ss:$40 sps:$4 sm:$0xff]  }
 0x182   :  { %5337 = vmatpush1.bf16.msra.mxu1 %v9282_v8  ;;  %5133 = vmatprep.subr.bf16.mxu0 %v9287_v9  ;;  %v9368_v8 = vld [vmem:[#allocation6 + $0x12c8] ss:$40 sps:$4 sm:$0xff]   ;;  %v9373_v9 = vld [vmem:[#allocation6 + $0x1314] ss:$40 sps:$4 sm:$0xff]  }
 0x183   :  { %5338 = vmatprep.subr.bf16.mxu1 %v9290_v11  ;;  %v9376_v11 = vld [vmem:[#allocation6 + $0x131c] ss:$40 sps:$4 sm:$0xff]  }
 0x185   :  { %5134 = vmatpush1.bf16.msra.mxu0 %v9285_v12  ;;  %v9371_v12 = vld [vmem:[#allocation6 + $0x1310] ss:$40 sps:$4 sm:$0xff]  }
 0x186   :  { %5339 = vmatpush1.bf16.msra.mxu1 %v9288_v14  ;;  %5144 = vmatprep.subr.bf16.mxu0 %v9294_v16  ;;  %v9374_v14 = vld [vmem:[#allocation6 + $0x1318] ss:$40 sps:$4 sm:$0xff]   ;;  %v9379_v16 = vld [vmem:[#allocation6 + $0x1364] ss:$40 sps:$4 sm:$0xff]  }
 0x187   :  { %5349 = vmatprep.subr.bf16.mxu1 %v9297_v17  ;;  %v9382_v17 = vld [vmem:[#allocation6 + $0x136c] ss:$40 sps:$4 sm:$0xff]  }
 0x188   :  { %5136 = vmatmul.mubr.bf16.vlgmr.msra.gmra.mrb[0].mxu0 %v10965_v20 }
 0x189   :  { %5341 = vmatmul.mubr.bf16.vlgmr.msra.gmra.mrb[0].mxu1 %v10965_v20  ;;  %5145 = vmatpush1.bf16.msra.mxu0 %v9292_v18  ;;  %v9377_v18 = vld [vmem:[#allocation6 + $0x1360] ss:$40 sps:$4 sm:$0xff]  }
 0x18a   :  { %5350 = vmatpush1.bf16.msra.mxu1 %v9295_v19  ;;  %5146 = vmatprep.subr.bf16.mxu0 %v9301_v22  ;;  %v9380_v19 = vld [vmem:[#allocation6 + $0x1368] ss:$40 sps:$4 sm:$0xff]   ;;  %v9385_v22 = vld [vmem:[#allocation6 + $0x13b4] ss:$40 sps:$4 sm:$0xff]  }
 0x18b   :  { %5351 = vmatprep.subr.bf16.mxu1 %v9304_v23  ;;  %5176 = vmatprep.mubr.bf16.mxu0 %v10974_v24  ;;  %v9388_v23 = vld [vmem:[#allocation6 + $0x13bc] ss:$40 sps:$4 sm:$0xff]  }
 0x18c   :  { %5381 = vmatprep.mubr.bf16.mxu1 %v10974_v24 }
 0x18d   :  { %5147 = vmatpush1.bf16.msra.mxu0 %v9299_v13  ;;  %v9383_v13 = vld [vmem:[#allocation6 + $0x13b0] ss:$40 sps:$4 sm:$0xff]  }
 0x18e   :  { %5352 = vmatpush1.bf16.msra.mxu1 %v9302_v25  ;;  %5148 = vmatprep.subr.bf16.mxu0 %v9307_v26  ;;  %v9386_v25 = vld [vmem:[#allocation6 + $0x13b8] ss:$40 sps:$4 sm:$0xff]   ;;  %v9392_v26 = vld [vmem:[#allocation6 + $0x1404] ss:$40 sps:$4 sm:$0xff]  }
 0x18f   :  { %5353 = vmatprep.subr.bf16.mxu1 %v9310_v27  ;;  %v9395_v27 = vld [vmem:[#allocation6 + $0x140c] ss:$40 sps:$4 sm:$0xff]  }
 0x191   :  { %5149 = vmatpush1.bf16.msra.mxu0 %v9305_v28  ;;  %v9390_v28 = vld [vmem:[#allocation6 + $0x1400] ss:$40 sps:$4 sm:$0xff]  }
 0x192   :  { %5354 = vmatpush1.bf16.msra.mxu1 %v9308_v29  ;;  %5150 = vmatprep.subr.bf16.mxu0 %v9313_v31  ;;  %v10982_v29 = vcombine.low %v10970_v21, %v10970_v21  ;;  %v10987_v31 = vld [vmem:[%s11193_s0 + $0x20] sm:$0xff]  ;;  %s10707_s0 = smov [#allocation21]  }
 0x193   :  { %5355 = vmatprep.subr.bf16.mxu1 %v9316_v32  ;;  %v9393_v32 = vld [vmem:[#allocation6 + $0x1408] ss:$40 sps:$4 sm:$0xff]   ;;  %s7797_s28 = sshll.u32 %s10707_s0, 4  ;;  %s7798_s28 = int_to_ptr.vmem [resolvable:$true] %s7797_s28 }
 0x194   :  { %v9397_v21 = vld [vmem:[#allocation6 + $0x1450] ss:$40 sps:$4 sm:$0xff]   ;;  %s10629_s10 = scalar_lea.vmem %s7798_s28, 128  ;;  %p10634_p5 = scmp.lt.s32.totalorder %s7798_s28, %s7798_s28 }
 0x195   :  { %5151 = vmatpush1.bf16.msra.mxu0 %v9311_v33  ;;  %v9399_v33 = vld [vmem:[#allocation6 + $0x1454] ss:$40 sps:$4 sm:$0xff]   ;;  %p10630_p4 = scmp.ne.s32.totalorder %s7798_s28, %s10629_s10  ;;  %p10635_p6 = scmp.lt.s32.totalorder %s10629_s10, %s10629_s10 }
 0x196   :  { %5356 = vmatpush1.bf16.msra.mxu1 %v9314_v34  ;;  %5152 = vmatprep.subr.bf16.mxu0 %v9319_v35  ;;  %v9402_v34 = vld [vmem:[#allocation6 + $0x145c] ss:$40 sps:$4 sm:$0xff]   ;;  %v10991_v35 = vcombine.high %v10987_v31, %v10987_v31 }
 0x197   :  { %5357 = vmatprep.subr.bf16.mxu1 %v9322_v36  ;;  %v9400_v36 = vld [vmem:[#allocation6 + $0x1458] ss:$40 sps:$4 sm:$0xff]   ;;  %p10636_p7 = por %p10635_p6, %p10634_p5 }
 0x199   :  { %5153 = vmatpush1.bf16.msra.mxu0 %v9317_v37  ;;  %v9405_v37 = vld [vmem:[#allocation6 + $0x14a4] ss:$40 sps:$4 sm:$0xff]   ;;  %p10637_p8 = pnand %p10636_p7, %p10630_p4 }
 0x19a   :  { %5358 = vmatpush1.bf16.msra.mxu1 %v9320_v38  ;;  %5154 = vmatprep.subr.bf16.mxu0 %v9325_v39  ;;  %v9408_v38 = vld [vmem:[#allocation6 + $0x14ac] ss:$40 sps:$4 sm:$0xff]   ;;  %v9403_v39 = vld [vmem:[#allocation6 + $0x14a0] ss:$40 sps:$4 sm:$0xff]  }
 0x19b   :  { %5359 = vmatprep.subr.bf16.mxu1 %v9328_v40  ;;  %v9406_v40 = vld [vmem:[#allocation6 + $0x14a8] ss:$40 sps:$4 sm:$0xff]  }
 0x19d   :  { %5155 = vmatpush1.bf16.msra.mxu0 %v9323_v41  ;;  %v9411_v41 = vld [vmem:[#allocation6 + $0x14f4] ss:$40 sps:$4 sm:$0xff]  }
 0x19e   :  { %5360 = vmatpush1.bf16.msra.mxu1 %v9326_v42  ;;  %5156 = vmatprep.subr.bf16.mxu0 %v9331_v43  ;;  %v9414_v42 = vld [vmem:[#allocation6 + $0x14fc] ss:$40 sps:$4 sm:$0xff]   ;;  %v9409_v43 = vld [vmem:[#allocation6 + $0x14f0] ss:$40 sps:$4 sm:$0xff]  }
 0x19f   :  { %5361 = vmatprep.subr.bf16.mxu1 %v9334_v44  ;;  %v9412_v44 = vld [vmem:[#allocation6 + $0x14f8] ss:$40 sps:$4 sm:$0xff]  }
 0x1a1   :  { %5157 = vmatpush1.bf16.msra.mxu0 %v9329_v45  ;;  %v9417_v45 = vld [vmem:[#allocation6 + $0x1544] ss:$40 sps:$4 sm:$0xff]  }
 0x1a2   :  { %5362 = vmatpush1.bf16.msra.mxu1 %v9332_v46  ;;  %5158 = vmatprep.subr.bf16.mxu0 %v9337_v47  ;;  %v9420_v46 = vld [vmem:[#allocation6 + $0x154c] ss:$40 sps:$4 sm:$0xff]   ;;  %v9415_v47 = vld [vmem:[#allocation6 + $0x1540] ss:$40 sps:$4 sm:$0xff]  }
 0x1a3   :  { %5363 = vmatprep.subr.bf16.mxu1 %v9340_v49  ;;  %v9418_v49 = vld [vmem:[#allocation6 + $0x1548] ss:$40 sps:$4 sm:$0xff]  }
 0x1a5   :  { %5159 = vmatpush1.bf16.msra.mxu0 %v9335_v50  ;;  %v9423_v50 = vld [vmem:[#allocation6 + $0x1594] ss:$40 sps:$4 sm:$0xff]  }
 0x1a6   :  { %5364 = vmatpush1.bf16.msra.mxu1 %v9338_v51  ;;  %5160 = vmatprep.subr.bf16.mxu0 %v9343_v52  ;;  %v9426_v51 = vld [vmem:[#allocation6 + $0x159c] ss:$40 sps:$4 sm:$0xff]   ;;  %v9421_v52 = vld [vmem:[#allocation6 + $0x1590] ss:$40 sps:$4 sm:$0xff]  }
 0x1a7   :  { %5365 = vmatprep.subr.bf16.mxu1 %v9346_v53  ;;  %v9424_v53 = vld [vmem:[#allocation6 + $0x1598] ss:$40 sps:$4 sm:$0xff]  }
 0x1a9   :  { %5161 = vmatpush1.bf16.msra.mxu0 %v9341_v54  ;;  %v9429_v54 = vld [vmem:[#allocation6 + $0x15e4] ss:$40 sps:$4 sm:$0xff]  }
 0x1aa   :  { %5366 = vmatpush1.bf16.msra.mxu1 %v9344_v55  ;;  %5162 = vmatprep.subr.bf16.mxu0 %v9349_v56  ;;  %v9432_v55 = vld [vmem:[#allocation6 + $0x15ec] ss:$40 sps:$4 sm:$0xff]   ;;  %v9427_v56 = vld [vmem:[#allocation6 + $0x15e0] ss:$40 sps:$4 sm:$0xff]  }
 0x1ab   :  { %5367 = vmatprep.subr.bf16.mxu1 %v9352_v57  ;;  %v9430_v57 = vld [vmem:[#allocation6 + $0x15e8] ss:$40 sps:$4 sm:$0xff]  }
 0x1ad   :  { %5163 = vmatpush1.bf16.msra.mxu0 %v9347_v58  ;;  %v9435_v58 = vld [vmem:[#allocation6 + $0x1634] ss:$40 sps:$4 sm:$0xff]  }
 0x1ae   :  { %5368 = vmatpush1.bf16.msra.mxu1 %v9350_v59  ;;  %5164 = vmatprep.subr.bf16.mxu0 %v9355_v60  ;;  %v9438_v59 = vld [vmem:[#allocation6 + $0x163c] ss:$40 sps:$4 sm:$0xff]   ;;  %v9433_v60 = vld [vmem:[#allocation6 + $0x1630] ss:$40 sps:$4 sm:$0xff]  }
 0x1af   :  { %5369 = vmatprep.subr.bf16.mxu1 %v9358_v61  ;;  %v9436_v61 = vld [vmem:[#allocation6 + $0x1638] ss:$40 sps:$4 sm:$0xff]  }
 0x1b1   :  { %5165 = vmatpush1.bf16.msra.mxu0 %v9353_v62  ;;  %v9441_v62 = vld [vmem:[#allocation6 + $0x1684] ss:$40 sps:$4 sm:$0xff]  }
 0x1b2   :  { %5370 = vmatpush1.bf16.msra.mxu1 %v9356_v63  ;;  %5166 = vmatprep.subr.bf16.mxu0 %v9361_v0  ;;  %v9444_v63 = vld [vmem:[#allocation6 + $0x168c] ss:$40 sps:$4 sm:$0xff]   ;;  %v9439_v0 = vld [vmem:[#allocation6 + $0x1680] ss:$40 sps:$4 sm:$0xff]  }
 0x1b3   :  { %5371 = vmatprep.subr.bf16.mxu1 %v9364_v1  ;;  %v9442_v1 = vld [vmem:[#allocation6 + $0x1688] ss:$40 sps:$4 sm:$0xff]  }
 0x1b5   :  { %5167 = vmatpush1.bf16.msra.mxu0 %v9359_v2  ;;  %v9447_v2 = vld [vmem:[#allocation6 + $0x16d4] ss:$40 sps:$4 sm:$0xff]  }
 0x1b6   :  { %5372 = vmatpush1.bf16.msra.mxu1 %v9362_v3  ;;  %5168 = vmatprep.subr.bf16.mxu0 %v9367_v4  ;;  %v9450_v3 = vld [vmem:[#allocation6 + $0x16dc] ss:$40 sps:$4 sm:$0xff]   ;;  %v9445_v4 = vld [vmem:[#allocation6 + $0x16d0] ss:$40 sps:$4 sm:$0xff]  }
 0x1b7   :  { %5373 = vmatprep.subr.bf16.mxu1 %v9370_v6  ;;  %v9448_v6 = vld [vmem:[#allocation6 + $0x16d8] ss:$40 sps:$4 sm:$0xff]  }
 0x1b9   :  { %5169 = vmatpush1.bf16.msra.mxu0 %v9365_v7  ;;  %v9453_v7 = vld [vmem:[#allocation6 + $0x1724] ss:$40 sps:$4 sm:$0xff]  }
 0x1ba   :  { %5374 = vmatpush1.bf16.msra.mxu1 %v9368_v8  ;;  %5170 = vmatprep.subr.bf16.mxu0 %v9373_v9  ;;  %v9456_v8 = vld [vmem:[#allocation6 + $0x172c] ss:$40 sps:$4 sm:$0xff]   ;;  %v9451_v9 = vld [vmem:[#allocation6 + $0x1720] ss:$40 sps:$4 sm:$0xff]  }
 0x1bb   :  { %5375 = vmatprep.subr.bf16.mxu1 %v9376_v11  ;;  %v9454_v11 = vld [vmem:[#allocation6 + $0x1728] ss:$40 sps:$4 sm:$0xff]  }
 0x1bd   :  { %5171 = vmatpush1.bf16.msra.mxu0 %v9371_v12  ;;  %v9459_v12 = vld [vmem:[#allocation6 + $0x1774] ss:$40 sps:$4 sm:$0xff]  }
 0x1be   :  { %5376 = vmatpush1.bf16.msra.mxu1 %v9374_v14  ;;  %5172 = vmatprep.subr.bf16.mxu0 %v9379_v16  ;;  %v9462_v14 = vld [vmem:[#allocation6 + $0x177c] ss:$40 sps:$4 sm:$0xff]   ;;  %v9457_v16 = vld [vmem:[#allocation6 + $0x1770] ss:$40 sps:$4 sm:$0xff]  }
 0x1bf   :  { %5377 = vmatprep.subr.bf16.mxu1 %v9382_v17  ;;  %v9460_v17 = vld [vmem:[#allocation6 + $0x1778] ss:$40 sps:$4 sm:$0xff]  }
 0x1c1   :  { %5173 = vmatpush1.bf16.msra.mxu0 %v9377_v18  ;;  %v9465_v18 = vld [vmem:[#allocation6 + $0x17c4] ss:$40 sps:$4 sm:$0xff]  }
 0x1c2   :  { %5378 = vmatpush1.bf16.msra.mxu1 %v9380_v19  ;;  %5174 = vmatprep.subr.bf16.mxu0 %v9385_v22  ;;  %v9468_v19 = vld [vmem:[#allocation6 + $0x17cc] ss:$40 sps:$4 sm:$0xff]   ;;  %v9463_v22 = vld [vmem:[#allocation6 + $0x17c0] ss:$40 sps:$4 sm:$0xff]  }
 0x1c3   :  { %5379 = vmatprep.subr.bf16.mxu1 %v9388_v23  ;;  %v9466_v23 = vld [vmem:[#allocation6 + $0x17c8] ss:$40 sps:$4 sm:$0xff]  }
 0x1c5   :  { %5175 = vmatpush1.bf16.msra.mxu0 %v9383_v13  ;;  %v9471_v13 = vld [vmem:[#allocation6 + $0x1814] ss:$40 sps:$4 sm:$0xff]  }
 0x1c6   :  { %5380 = vmatpush1.bf16.msra.mxu1 %v9386_v25  ;;  %5185 = vmatprep.subr.bf16.mxu0 %v9392_v26  ;;  %v9474_v25 = vld [vmem:[#allocation6 + $0x181c] ss:$40 sps:$4 sm:$0xff]   ;;  %v9469_v26 = vld [vmem:[#allocation6 + $0x1810] ss:$40 sps:$4 sm:$0xff]  }
 0x1c7   :  { %5390 = vmatprep.subr.bf16.mxu1 %v9395_v27  ;;  %v9472_v27 = vld [vmem:[#allocation6 + $0x1818] ss:$40 sps:$4 sm:$0xff]  }
 0x1c8   :  { %5177 = vmatmul.mubr.bf16.vlgmr.msra.gmra.mrb[0].mxu0 %v10982_v29 }
 0x1c9   :  { %5382 = vmatmul.mubr.bf16.vlgmr.msra.gmra.mrb[0].mxu1 %v10982_v29  ;;  %5186 = vmatpush1.bf16.msra.mxu0 %v9390_v28  ;;  %v9477_v28 = vld [vmem:[#allocation6 + $0x1864] ss:$40 sps:$4 sm:$0xff]  }
 0x1ca   :  { %5391 = vmatpush1.bf16.msra.mxu1 %v9393_v32  ;;  %5187 = vmatprep.subr.bf16.mxu0 %v9399_v33  ;;  %v9480_v32 = vld [vmem:[#allocation6 + $0x186c] ss:$40 sps:$4 sm:$0xff]   ;;  %v9475_v33 = vld [vmem:[#allocation6 + $0x1860] ss:$40 sps:$4 sm:$0xff]  }
 0x1cb   :  { %5392 = vmatprep.subr.bf16.mxu1 %v9402_v34  ;;  %5217 = vmatprep.mubr.bf16.mxu0 %v10991_v35  ;;  %v9478_v34 = vld [vmem:[#allocation6 + $0x1868] ss:$40 sps:$4 sm:$0xff]  }
 0x1cc   :  { %5422 = vmatprep.mubr.bf16.mxu1 %v10991_v35 }
 0x1cd   :  { %5188 = vmatpush1.bf16.msra.mxu0 %v9397_v21  ;;  %v9483_v21 = vld [vmem:[#allocation6 + $0x18b4] ss:$40 sps:$4 sm:$0xff]  }
 0x1ce   :  { %5393 = vmatpush1.bf16.msra.mxu1 %v9400_v36  ;;  %5189 = vmatprep.subr.bf16.mxu0 %v9405_v37  ;;  %v9486_v36 = vld [vmem:[#allocation6 + $0x18bc] ss:$40 sps:$4 sm:$0xff]   ;;  %v9481_v37 = vld [vmem:[#allocation6 + $0x18b0] ss:$40 sps:$4 sm:$0xff]  }
 0x1cf   :  { %5394 = vmatprep.subr.bf16.mxu1 %v9408_v38  ;;  %v9484_v38 = vld [vmem:[#allocation6 + $0x18b8] ss:$40 sps:$4 sm:$0xff]  }
 0x1d1   :  { %5190 = vmatpush1.bf16.msra.mxu0 %v9403_v39  ;;  %v9491_v39 = vld [vmem:[#allocation6 + $0x14] ss:$40 sps:$4 sm:$0xff]  }
 0x1d2   :  { %5395 = vmatpush1.bf16.msra.mxu1 %v9406_v40  ;;  %5191 = vmatprep.subr.bf16.mxu0 %v9411_v41  ;;  %v9494_v40 = vld [vmem:[#allocation6 + $0x1c] ss:$40 sps:$4 sm:$0xff]   ;;  %v10999_v41 = vcombine.low %v10987_v31, %v10987_v31 }
 0x1d3   :  { %5396 = vmatprep.subr.bf16.mxu1 %v9414_v42  ;;  %v9489_v42 = vld [vmem:[#allocation6 + $0x10] ss:$40 sps:$4 sm:$0xff]   ;;  %v9503_v31 = vld [vmem:[#allocation6 + $0xb4] ss:$40 sps:$4 sm:$0xff]  }
 0x1d5   :  { %5192 = vmatpush1.bf16.msra.mxu0 %v9409_v43  ;;  %v9492_v43 = vld [vmem:[#allocation6 + $0x18] ss:$40 sps:$4 sm:$0xff]  }
 0x1d6   :  { %5397 = vmatpush1.bf16.msra.mxu1 %v9412_v44  ;;  %5193 = vmatprep.subr.bf16.mxu0 %v9417_v45  ;;  %v9497_v44 = vld [vmem:[#allocation6 + $0x64] ss:$40 sps:$4 sm:$0xff]  }
 0x1d7   :  { %5398 = vmatprep.subr.bf16.mxu1 %v9420_v46  ;;  %v9500_v45 = vld [vmem:[#allocation6 + $0x6c] ss:$40 sps:$4 sm:$0xff]   ;;  %v9495_v46 = vld [vmem:[#allocation6 + $0x60] ss:$40 sps:$4 sm:$0xff]  }
 0x1d9   :  { %5194 = vmatpush1.bf16.msra.mxu0 %v9415_v47  ;;  %v9498_v47 = vld [vmem:[#allocation6 + $0x68] ss:$40 sps:$4 sm:$0xff]  }
 0x1da   :  { %5399 = vmatpush1.bf16.msra.mxu1 %v9418_v49  ;;  %5195 = vmatprep.subr.bf16.mxu0 %v9423_v50  ;;  %v9506_v49 = vld [vmem:[#allocation6 + $0xbc] ss:$40 sps:$4 sm:$0xff]   ;;  %v9501_v50 = vld [vmem:[#allocation6 + $0xb0] ss:$40 sps:$4 sm:$0xff]  }
 0x1db   :  { %5400 = vmatprep.subr.bf16.mxu1 %v9426_v51  ;;  %v9504_v51 = vld [vmem:[#allocation6 + $0xb8] ss:$40 sps:$4 sm:$0xff]  }
 0x1dd   :  { %5196 = vmatpush1.bf16.msra.mxu0 %v9421_v52  ;;  %v9509_v52 = vld [vmem:[#allocation6 + $0x104] ss:$40 sps:$4 sm:$0xff]  }
 0x1de   :  { %5401 = vmatpush1.bf16.msra.mxu1 %v9424_v53  ;;  %5197 = vmatprep.subr.bf16.mxu0 %v9429_v54  ;;  %v9512_v53 = vld [vmem:[#allocation6 + $0x10c] ss:$40 sps:$4 sm:$0xff]   ;;  %v9507_v54 = vld [vmem:[#allocation6 + $0x100] ss:$40 sps:$4 sm:$0xff]  }
 0x1df   :  { %5402 = vmatprep.subr.bf16.mxu1 %v9432_v55  ;;  %v9510_v55 = vld [vmem:[#allocation6 + $0x108] ss:$40 sps:$4 sm:$0xff]  }
 0x1e1   :  { %5198 = vmatpush1.bf16.msra.mxu0 %v9427_v56  ;;  %v9515_v56 = vld [vmem:[#allocation6 + $0x154] ss:$40 sps:$4 sm:$0xff]  }
 0x1e2   :  { %5403 = vmatpush1.bf16.msra.mxu1 %v9430_v57  ;;  %5199 = vmatprep.subr.bf16.mxu0 %v9435_v58  ;;  %v9518_v57 = vld [vmem:[#allocation6 + $0x15c] ss:$40 sps:$4 sm:$0xff]   ;;  %v9513_v58 = vld [vmem:[#allocation6 + $0x150] ss:$40 sps:$4 sm:$0xff]  }
 0x1e3   :  { %5404 = vmatprep.subr.bf16.mxu1 %v9438_v59  ;;  %v9516_v59 = vld [vmem:[#allocation6 + $0x158] ss:$40 sps:$4 sm:$0xff]  }
 0x1e5   :  { %5200 = vmatpush1.bf16.msra.mxu0 %v9433_v60  ;;  %v9521_v60 = vld [vmem:[#allocation6 + $0x1a4] ss:$40 sps:$4 sm:$0xff]  }
 0x1e6   :  { %5405 = vmatpush1.bf16.msra.mxu1 %v9436_v61  ;;  %5201 = vmatprep.subr.bf16.mxu0 %v9441_v62  ;;  %v9524_v61 = vld [vmem:[#allocation6 + $0x1ac] ss:$40 sps:$4 sm:$0xff]   ;;  %v9519_v62 = vld [vmem:[#allocation6 + $0x1a0] ss:$40 sps:$4 sm:$0xff]  }
 0x1e7   :  { %5406 = vmatprep.subr.bf16.mxu1 %v9444_v63  ;;  %v9522_v63 = vld [vmem:[#allocation6 + $0x1a8] ss:$40 sps:$4 sm:$0xff]  }
 0x1e9   :  { %5202 = vmatpush1.bf16.msra.mxu0 %v9439_v0  ;;  %v9527_v0 = vld [vmem:[#allocation6 + $0x1f4] ss:$40 sps:$4 sm:$0xff]  }
 0x1ea   :  { %5407 = vmatpush1.bf16.msra.mxu1 %v9442_v1  ;;  %5203 = vmatprep.subr.bf16.mxu0 %v9447_v2  ;;  %v9530_v1 = vld [vmem:[#allocation6 + $0x1fc] ss:$40 sps:$4 sm:$0xff]   ;;  %v9525_v2 = vld [vmem:[#allocation6 + $0x1f0] ss:$40 sps:$4 sm:$0xff]  }
 0x1eb   :  { %5408 = vmatprep.subr.bf16.mxu1 %v9450_v3  ;;  %v9528_v3 = vld [vmem:[#allocation6 + $0x1f8] ss:$40 sps:$4 sm:$0xff]  }
 0x1ed   :  { %5204 = vmatpush1.bf16.msra.mxu0 %v9445_v4  ;;  %v9533_v4 = vld [vmem:[#allocation6 + $0x244] ss:$40 sps:$4 sm:$0xff]  }
 0x1ee   :  { %5409 = vmatpush1.bf16.msra.mxu1 %v9448_v6  ;;  %5205 = vmatprep.subr.bf16.mxu0 %v9453_v7  ;;  %v9536_v6 = vld [vmem:[#allocation6 + $0x24c] ss:$40 sps:$4 sm:$0xff]   ;;  %v9531_v7 = vld [vmem:[#allocation6 + $0x240] ss:$40 sps:$4 sm:$0xff]  }
 0x1ef   :  { %5410 = vmatprep.subr.bf16.mxu1 %v9456_v8  ;;  %v9534_v8 = vld [vmem:[#allocation6 + $0x248] ss:$40 sps:$4 sm:$0xff]  }
 0x1f1   :  { %5206 = vmatpush1.bf16.msra.mxu0 %v9451_v9  ;;  %v9539_v9 = vld [vmem:[#allocation6 + $0x294] ss:$40 sps:$4 sm:$0xff]  }
 0x1f2   :  { %5411 = vmatpush1.bf16.msra.mxu1 %v9454_v11  ;;  %5207 = vmatprep.subr.bf16.mxu0 %v9459_v12  ;;  %v9542_v11 = vld [vmem:[#allocation6 + $0x29c] ss:$40 sps:$4 sm:$0xff]   ;;  %v9537_v12 = vld [vmem:[#allocation6 + $0x290] ss:$40 sps:$4 sm:$0xff]  }
 0x1f3   :  { %5412 = vmatprep.subr.bf16.mxu1 %v9462_v14  ;;  %v9540_v14 = vld [vmem:[#allocation6 + $0x298] ss:$40 sps:$4 sm:$0xff]  }
 0x1f5   :  { %5208 = vmatpush1.bf16.msra.mxu0 %v9457_v16  ;;  %v9545_v16 = vld [vmem:[#allocation6 + $0x2e4] ss:$40 sps:$4 sm:$0xff]  }
 0x1f6   :  { %5413 = vmatpush1.bf16.msra.mxu1 %v9460_v17  ;;  %5209 = vmatprep.subr.bf16.mxu0 %v9465_v18  ;;  %v9548_v17 = vld [vmem:[#allocation6 + $0x2ec] ss:$40 sps:$4 sm:$0xff]   ;;  %v9543_v18 = vld [vmem:[#allocation6 + $0x2e0] ss:$40 sps:$4 sm:$0xff]  }
 0x1f7   :  { %5414 = vmatprep.subr.bf16.mxu1 %v9468_v19  ;;  %v9546_v19 = vld [vmem:[#allocation6 + $0x2e8] ss:$40 sps:$4 sm:$0xff]  }
 0x1f9   :  { %5210 = vmatpush1.bf16.msra.mxu0 %v9463_v22  ;;  %v9551_v22 = vld [vmem:[#allocation6 + $0x334] ss:$40 sps:$4 sm:$0xff]  }
 0x1fa   :  { %5415 = vmatpush1.bf16.msra.mxu1 %v9466_v23  ;;  %5211 = vmatprep.subr.bf16.mxu0 %v9471_v13  ;;  %v9554_v23 = vld [vmem:[#allocation6 + $0x33c] ss:$40 sps:$4 sm:$0xff]   ;;  %v9549_v13 = vld [vmem:[#allocation6 + $0x330] ss:$40 sps:$4 sm:$0xff]  }
 0x1fb   :  { %5416 = vmatprep.subr.bf16.mxu1 %v9474_v25  ;;  %v9552_v25 = vld [vmem:[#allocation6 + $0x338] ss:$40 sps:$4 sm:$0xff]  }
 0x1fd   :  { %5212 = vmatpush1.bf16.msra.mxu0 %v9469_v26  ;;  %v9557_v26 = vld [vmem:[#allocation6 + $0x384] ss:$40 sps:$4 sm:$0xff]  }
 0x1fe   :  { %5417 = vmatpush1.bf16.msra.mxu1 %v9472_v27  ;;  %5213 = vmatprep.subr.bf16.mxu0 %v9477_v28  ;;  %v9560_v27 = vld [vmem:[#allocation6 + $0x38c] ss:$40 sps:$4 sm:$0xff]   ;;  %v9555_v28 = vld [vmem:[#allocation6 + $0x380] ss:$40 sps:$4 sm:$0xff]  }
 0x1ff   :  { %5418 = vmatprep.subr.bf16.mxu1 %v9480_v32  ;;  %v9558_v32 = vld [vmem:[#allocation6 + $0x388] ss:$40 sps:$4 sm:$0xff]  }
 0x201   :  { %5214 = vmatpush1.bf16.msra.mxu0 %v9475_v33  ;;  %v9563_v33 = vld [vmem:[#allocation6 + $0x3d4] ss:$40 sps:$4 sm:$0xff]  }
 0x202   :  { %5419 = vmatpush1.bf16.msra.mxu1 %v9478_v34  ;;  %5215 = vmatprep.subr.bf16.mxu0 %v9483_v21  ;;  %v9566_v34 = vld [vmem:[#allocation6 + $0x3dc] ss:$40 sps:$4 sm:$0xff]   ;;  %v9561_v21 = vld [vmem:[#allocation6 + $0x3d0] ss:$40 sps:$4 sm:$0xff]  }
 0x203   :  { %5420 = vmatprep.subr.bf16.mxu1 %v9486_v36  ;;  %v9564_v36 = vld [vmem:[#allocation6 + $0x3d8] ss:$40 sps:$4 sm:$0xff]  }
 0x205   :  { %5216 = vmatpush1.bf16.msra.mxu0 %v9481_v37  ;;  %v9569_v37 = vld [vmem:[#allocation6 + $0x424] ss:$40 sps:$4 sm:$0xff]  }
 0x206   :  { %5421 = vmatpush1.bf16.msra.mxu1 %v9484_v38  ;;  %5431 = vmatprep.subr.bf16.mxu0 %v9491_v39  ;;  %v9572_v38 = vld [vmem:[#allocation6 + $0x42c] ss:$40 sps:$4 sm:$0xff]   ;;  %v9567_v39 = vld [vmem:[#allocation6 + $0x420] ss:$40 sps:$4 sm:$0xff]  }
 0x207   :  { %5636 = vmatprep.subr.bf16.mxu1 %v9494_v40  ;;  %v9570_v40 = vld [vmem:[#allocation6 + $0x428] ss:$40 sps:$4 sm:$0xff]  }
 0x208   :  { %5218 = vmatmul.mubr.bf16.vlgmr.msra.gmra.mrb[0].mxu0 %v10999_v41 }
 0x209   :  { %5423 = vmatmul.mubr.bf16.vlgmr.msra.gmra.mrb[0].mxu1 %v10999_v41  ;;  %5432 = vmatpush1.bf16.msra.mxu0 %v9489_v42  ;;  %v9575_v42 = vld [vmem:[#allocation6 + $0x474] ss:$40 sps:$4 sm:$0xff]  }
 0x20a   :  { %5637 = vmatpush1.bf16.msra.mxu1 %v9492_v43  ;;  %5433 = vmatprep.subr.bf16.mxu0 %v9497_v44  ;;  %v9578_v43 = vld [vmem:[#allocation6 + $0x47c] ss:$40 sps:$4 sm:$0xff]   ;;  %v9573_v44 = vld [vmem:[#allocation6 + $0x470] ss:$40 sps:$4 sm:$0xff]  }
 0x20b   :  { %5638 = vmatprep.subr.bf16.mxu1 %v9500_v45  ;;  %5463 = vmatprep.mubr.bf16.mxu0 %v10927_v48  ;;  %v9576_v45 = vld [vmem:[#allocation6 + $0x478] ss:$40 sps:$4 sm:$0xff]  }
 0x20c   :  { %5668 = vmatprep.mubr.bf16.mxu1 %v10927_v48 }
 0x20d   :  { %5434 = vmatpush1.bf16.msra.mxu0 %v9495_v46  ;;  %v9581_v46 = vld [vmem:[#allocation6 + $0x4c4] ss:$40 sps:$4 sm:$0xff]  }
 0x20e   :  { %5639 = vmatpush1.bf16.msra.mxu1 %v9498_v47  ;;  %5435 = vmatprep.subr.bf16.mxu0 %v9503_v31  ;;  %v9584_v47 = vld [vmem:[#allocation6 + $0x4cc] ss:$40 sps:$4 sm:$0xff]   ;;  %v9579_v31 = vld [vmem:[#allocation6 + $0x4c0] ss:$40 sps:$4 sm:$0xff]  }
 0x20f   :  { %5640 = vmatprep.subr.bf16.mxu1 %v9506_v49  ;;  %v9582_v49 = vld [vmem:[#allocation6 + $0x4c8] ss:$40 sps:$4 sm:$0xff]  }
 0x211   :  { %5436 = vmatpush1.bf16.msra.mxu0 %v9501_v50  ;;  %v9587_v50 = vld [vmem:[#allocation6 + $0x514] ss:$40 sps:$4 sm:$0xff]  }
 0x212   :  { %5641 = vmatpush1.bf16.msra.mxu1 %v9504_v51  ;;  %5437 = vmatprep.subr.bf16.mxu0 %v9509_v52  ;;  %v9590_v51 = vld [vmem:[#allocation6 + $0x51c] ss:$40 sps:$4 sm:$0xff]   ;;  %v9585_v52 = vld [vmem:[#allocation6 + $0x510] ss:$40 sps:$4 sm:$0xff]  }
 0x213   :  { %5642 = vmatprep.subr.bf16.mxu1 %v9512_v53  ;;  %v9588_v53 = vld [vmem:[#allocation6 + $0x518] ss:$40 sps:$4 sm:$0xff]  }
 0x215   :  { %5438 = vmatpush1.bf16.msra.mxu0 %v9507_v54  ;;  %v9593_v54 = vld [vmem:[#allocation6 + $0x564] ss:$40 sps:$4 sm:$0xff]  }
 0x216   :  { %5643 = vmatpush1.bf16.msra.mxu1 %v9510_v55  ;;  %5439 = vmatprep.subr.bf16.mxu0 %v9515_v56  ;;  %v9596_v55 = vld [vmem:[#allocation6 + $0x56c] ss:$40 sps:$4 sm:$0xff]   ;;  %v9591_v56 = vld [vmem:[#allocation6 + $0x560] ss:$40 sps:$4 sm:$0xff]  }
 0x217   :  { %5644 = vmatprep.subr.bf16.mxu1 %v9518_v57  ;;  %v9594_v57 = vld [vmem:[#allocation6 + $0x568] ss:$40 sps:$4 sm:$0xff]  }
 0x219   :  { %5440 = vmatpush1.bf16.msra.mxu0 %v9513_v58  ;;  %v9599_v58 = vld [vmem:[#allocation6 + $0x5b4] ss:$40 sps:$4 sm:$0xff]  }
 0x21a   :  { %5645 = vmatpush1.bf16.msra.mxu1 %v9516_v59  ;;  %5441 = vmatprep.subr.bf16.mxu0 %v9521_v60  ;;  %v9602_v59 = vld [vmem:[#allocation6 + $0x5bc] ss:$40 sps:$4 sm:$0xff]   ;;  %v9597_v60 = vld [vmem:[#allocation6 + $0x5b0] ss:$40 sps:$4 sm:$0xff]  }
 0x21b   :  { %5646 = vmatprep.subr.bf16.mxu1 %v9524_v61  ;;  %v9600_v61 = vld [vmem:[#allocation6 + $0x5b8] ss:$40 sps:$4 sm:$0xff]  }
 0x21d   :  { %5442 = vmatpush1.bf16.msra.mxu0 %v9519_v62  ;;  %v9605_v62 = vld [vmem:[#allocation6 + $0x604] ss:$40 sps:$4 sm:$0xff]  }
 0x21e   :  { %5647 = vmatpush1.bf16.msra.mxu1 %v9522_v63  ;;  %5443 = vmatprep.subr.bf16.mxu0 %v9527_v0  ;;  %v9608_v63 = vld [vmem:[#allocation6 + $0x60c] ss:$40 sps:$4 sm:$0xff]   ;;  %v9603_v0 = vld [vmem:[#allocation6 + $0x600] ss:$40 sps:$4 sm:$0xff]  }
 0x21f   :  { %5648 = vmatprep.subr.bf16.mxu1 %v9530_v1  ;;  %v9606_v1 = vld [vmem:[#allocation6 + $0x608] ss:$40 sps:$4 sm:$0xff]  }
 0x221   :  { %5444 = vmatpush1.bf16.msra.mxu0 %v9525_v2  ;;  %v9611_v2 = vld [vmem:[#allocation6 + $0x654] ss:$40 sps:$4 sm:$0xff]  }
 0x222   :  { %5649 = vmatpush1.bf16.msra.mxu1 %v9528_v3  ;;  %5445 = vmatprep.subr.bf16.mxu0 %v9533_v4  ;;  %v9614_v3 = vld [vmem:[#allocation6 + $0x65c] ss:$40 sps:$4 sm:$0xff]   ;;  %v9609_v4 = vld [vmem:[#allocation6 + $0x650] ss:$40 sps:$4 sm:$0xff]  }
 0x223   :  { %5650 = vmatprep.subr.bf16.mxu1 %v9536_v6  ;;  %v9612_v6 = vld [vmem:[#allocation6 + $0x658] ss:$40 sps:$4 sm:$0xff]  }
 0x225   :  { %5446 = vmatpush1.bf16.msra.mxu0 %v9531_v7  ;;  %v9617_v7 = vld [vmem:[#allocation6 + $0x6a4] ss:$40 sps:$4 sm:$0xff]  }
 0x226   :  { %5651 = vmatpush1.bf16.msra.mxu1 %v9534_v8  ;;  %5447 = vmatprep.subr.bf16.mxu0 %v9539_v9  ;;  %v9620_v8 = vld [vmem:[#allocation6 + $0x6ac] ss:$40 sps:$4 sm:$0xff]   ;;  %v9615_v9 = vld [vmem:[#allocation6 + $0x6a0] ss:$40 sps:$4 sm:$0xff]  }
 0x227   :  { %5652 = vmatprep.subr.bf16.mxu1 %v9542_v11  ;;  %v9618_v11 = vld [vmem:[#allocation6 + $0x6a8] ss:$40 sps:$4 sm:$0xff]  }
 0x229   :  { %5448 = vmatpush1.bf16.msra.mxu0 %v9537_v12  ;;  %v9623_v12 = vld [vmem:[#allocation6 + $0x6f4] ss:$40 sps:$4 sm:$0xff]  }
 0x22a   :  { %5653 = vmatpush1.bf16.msra.mxu1 %v9540_v14  ;;  %5449 = vmatprep.subr.bf16.mxu0 %v9545_v16  ;;  %v9626_v14 = vld [vmem:[#allocation6 + $0x6fc] ss:$40 sps:$4 sm:$0xff]   ;;  %v9621_v16 = vld [vmem:[#allocation6 + $0x6f0] ss:$40 sps:$4 sm:$0xff]  }
 0x22b   :  { %5654 = vmatprep.subr.bf16.mxu1 %v9548_v17  ;;  %v9624_v17 = vld [vmem:[#allocation6 + $0x6f8] ss:$40 sps:$4 sm:$0xff]  }
 0x22d   :  { %5450 = vmatpush1.bf16.msra.mxu0 %v9543_v18  ;;  %v9629_v18 = vld [vmem:[#allocation6 + $0x744] ss:$40 sps:$4 sm:$0xff]  }
 0x22e   :  { %5655 = vmatpush1.bf16.msra.mxu1 %v9546_v19  ;;  %5451 = vmatprep.subr.bf16.mxu0 %v9551_v22  ;;  %v9632_v19 = vld [vmem:[#allocation6 + $0x74c] ss:$40 sps:$4 sm:$0xff]   ;;  %v9627_v22 = vld [vmem:[#allocation6 + $0x740] ss:$40 sps:$4 sm:$0xff]  }
 0x22f   :  { %5656 = vmatprep.subr.bf16.mxu1 %v9554_v23  ;;  %v9630_v23 = vld [vmem:[#allocation6 + $0x748] ss:$40 sps:$4 sm:$0xff]  }
 0x231   :  { %5452 = vmatpush1.bf16.msra.mxu0 %v9549_v13  ;;  %v9635_v13 = vld [vmem:[#allocation6 + $0x794] ss:$40 sps:$4 sm:$0xff]  }
 0x232   :  { %5657 = vmatpush1.bf16.msra.mxu1 %v9552_v25  ;;  %5453 = vmatprep.subr.bf16.mxu0 %v9557_v26  ;;  %v9638_v25 = vld [vmem:[#allocation6 + $0x79c] ss:$40 sps:$4 sm:$0xff]   ;;  %v9633_v26 = vld [vmem:[#allocation6 + $0x790] ss:$40 sps:$4 sm:$0xff]  }
 0x233   :  { %5658 = vmatprep.subr.bf16.mxu1 %v9560_v27  ;;  %v9636_v27 = vld [vmem:[#allocation6 + $0x798] ss:$40 sps:$4 sm:$0xff]  }
 0x235   :  { %5454 = vmatpush1.bf16.msra.mxu0 %v9555_v28  ;;  %v9641_v28 = vld [vmem:[#allocation6 + $0x7e4] ss:$40 sps:$4 sm:$0xff]  }
 0x236   :  { %5659 = vmatpush1.bf16.msra.mxu1 %v9558_v32  ;;  %5455 = vmatprep.subr.bf16.mxu0 %v9563_v33  ;;  %v9644_v32 = vld [vmem:[#allocation6 + $0x7ec] ss:$40 sps:$4 sm:$0xff]   ;;  %v9639_v33 = vld [vmem:[#allocation6 + $0x7e0] ss:$40 sps:$4 sm:$0xff]  }
 0x237   :  { %5660 = vmatprep.subr.bf16.mxu1 %v9566_v34  ;;  %v9642_v34 = vld [vmem:[#allocation6 + $0x7e8] ss:$40 sps:$4 sm:$0xff]  }
 0x239   :  { %5456 = vmatpush1.bf16.msra.mxu0 %v9561_v21  ;;  %v9647_v21 = vld [vmem:[#allocation6 + $0x834] ss:$40 sps:$4 sm:$0xff]  }
 0x23a   :  { %5661 = vmatpush1.bf16.msra.mxu1 %v9564_v36  ;;  %5457 = vmatprep.subr.bf16.mxu0 %v9569_v37  ;;  %v9650_v36 = vld [vmem:[#allocation6 + $0x83c] ss:$40 sps:$4 sm:$0xff]   ;;  %v9645_v37 = vld [vmem:[#allocation6 + $0x830] ss:$40 sps:$4 sm:$0xff]  }
 0x23b   :  { %5662 = vmatprep.subr.bf16.mxu1 %v9572_v38  ;;  %v9648_v38 = vld [vmem:[#allocation6 + $0x838] ss:$40 sps:$4 sm:$0xff]  }
 0x23d   :  { %5458 = vmatpush1.bf16.msra.mxu0 %v9567_v39  ;;  %v9653_v39 = vld [vmem:[#allocation6 + $0x884] ss:$40 sps:$4 sm:$0xff]  }
 0x23e   :  { %5663 = vmatpush1.bf16.msra.mxu1 %v9570_v40  ;;  %5459 = vmatprep.subr.bf16.mxu0 %v9575_v42  ;;  %v9656_v40 = vld [vmem:[#allocation6 + $0x88c] ss:$40 sps:$4 sm:$0xff]   ;;  %v9651_v42 = vld [vmem:[#allocation6 + $0x880] ss:$40 sps:$4 sm:$0xff]  }
 0x23f   :  { %5664 = vmatprep.subr.bf16.mxu1 %v9578_v43  ;;  %v9654_v43 = vld [vmem:[#allocation6 + $0x888] ss:$40 sps:$4 sm:$0xff]  }
 0x241   :  { %5460 = vmatpush1.bf16.msra.mxu0 %v9573_v44  ;;  %v9659_v44 = vld [vmem:[#allocation6 + $0x8d4] ss:$40 sps:$4 sm:$0xff]  }
 0x242   :  { %5665 = vmatpush1.bf16.msra.mxu1 %v9576_v45  ;;  %5461 = vmatprep.subr.bf16.mxu0 %v9581_v46  ;;  %v9662_v45 = vld [vmem:[#allocation6 + $0x8dc] ss:$40 sps:$4 sm:$0xff]   ;;  %v9657_v46 = vld [vmem:[#allocation6 + $0x8d0] ss:$40 sps:$4 sm:$0xff]  }
 0x243   :  { %5666 = vmatprep.subr.bf16.mxu1 %v9584_v47  ;;  %v9660_v47 = vld [vmem:[#allocation6 + $0x8d8] ss:$40 sps:$4 sm:$0xff]  }
 0x245   :  { %5462 = vmatpush1.bf16.msra.mxu0 %v9579_v31  ;;  %v9665_v31 = vld [vmem:[#allocation6 + $0x924] ss:$40 sps:$4 sm:$0xff]  }
 0x246   :  { %5667 = vmatpush1.bf16.msra.mxu1 %v9582_v49  ;;  %5472 = vmatprep.subr.bf16.mxu0 %v9587_v50  ;;  %v9668_v49 = vld [vmem:[#allocation6 + $0x92c] ss:$40 sps:$4 sm:$0xff]   ;;  %v9663_v50 = vld [vmem:[#allocation6 + $0x920] ss:$40 sps:$4 sm:$0xff]  }
 0x247   :  { %5677 = vmatprep.subr.bf16.mxu1 %v9590_v51  ;;  %v9666_v51 = vld [vmem:[#allocation6 + $0x928] ss:$40 sps:$4 sm:$0xff]  }
 0x248   :  { %5464 = vmatmul.mubr.bf16.vlgmr.msra.gmra.mrb[4].mxu0 %v10931_v5 }
 0x249   :  { %5669 = vmatmul.mubr.bf16.vlgmr.msra.gmra.mrb[4].mxu1 %v10931_v5  ;;  %5473 = vmatpush1.bf16.msra.mxu0 %v9585_v52  ;;  %v9671_v52 = vld [vmem:[#allocation6 + $0x974] ss:$40 sps:$4 sm:$0xff]  }
 0x24a   :  { %5678 = vmatpush1.bf16.msra.mxu1 %v9588_v53  ;;  %5474 = vmatprep.subr.bf16.mxu0 %v9593_v54  ;;  %v9674_v53 = vld [vmem:[#allocation6 + $0x97c] ss:$40 sps:$4 sm:$0xff]   ;;  %v9669_v54 = vld [vmem:[#allocation6 + $0x970] ss:$40 sps:$4 sm:$0xff]  }
 0x24b   :  { %5679 = vmatprep.subr.bf16.mxu1 %v9596_v55  ;;  %5504 = vmatprep.mubr.bf16.mxu0 %v10942_v30  ;;  %v9672_v55 = vld [vmem:[#allocation6 + $0x978] ss:$40 sps:$4 sm:$0xff]  }
 0x24c   :  { %5709 = vmatprep.mubr.bf16.mxu1 %v10942_v30 }
 0x24d   :  { %5475 = vmatpush1.bf16.msra.mxu0 %v9591_v56  ;;  %v9677_v56 = vld [vmem:[#allocation6 + $0x9c4] ss:$40 sps:$4 sm:$0xff]  }
 0x24e   :  { %5680 = vmatpush1.bf16.msra.mxu1 %v9594_v57  ;;  %5476 = vmatprep.subr.bf16.mxu0 %v9599_v58  ;;  %v9680_v57 = vld [vmem:[#allocation6 + $0x9cc] ss:$40 sps:$4 sm:$0xff]   ;;  %v9675_v58 = vld [vmem:[#allocation6 + $0x9c0] ss:$40 sps:$4 sm:$0xff]  }
 0x24f   :  { %5681 = vmatprep.subr.bf16.mxu1 %v9602_v59  ;;  %v9678_v59 = vld [vmem:[#allocation6 + $0x9c8] ss:$40 sps:$4 sm:$0xff]  }
 0x251   :  { %5477 = vmatpush1.bf16.msra.mxu0 %v9597_v60  ;;  %v9683_v60 = vld [vmem:[#allocation6 + $0xa14] ss:$40 sps:$4 sm:$0xff]  }
 0x252   :  { %5682 = vmatpush1.bf16.msra.mxu1 %v9600_v61  ;;  %5478 = vmatprep.subr.bf16.mxu0 %v9605_v62  ;;  %v9686_v61 = vld [vmem:[#allocation6 + $0xa1c] ss:$40 sps:$4 sm:$0xff]   ;;  %v9681_v62 = vld [vmem:[#allocation6 + $0xa10] ss:$40 sps:$4 sm:$0xff]  }
 0x253   :  { %5683 = vmatprep.subr.bf16.mxu1 %v9608_v63  ;;  %v9684_v63 = vld [vmem:[#allocation6 + $0xa18] ss:$40 sps:$4 sm:$0xff]  }
 0x255   :  { %5479 = vmatpush1.bf16.msra.mxu0 %v9603_v0  ;;  %v9689_v0 = vld [vmem:[#allocation6 + $0xa64] ss:$40 sps:$4 sm:$0xff]  }
 0x256   :  { %5684 = vmatpush1.bf16.msra.mxu1 %v9606_v1  ;;  %5480 = vmatprep.subr.bf16.mxu0 %v9611_v2  ;;  %v9692_v1 = vld [vmem:[#allocation6 + $0xa6c] ss:$40 sps:$4 sm:$0xff]   ;;  %v9687_v2 = vld [vmem:[#allocation6 + $0xa60] ss:$40 sps:$4 sm:$0xff]  }
 0x257   :  { %5685 = vmatprep.subr.bf16.mxu1 %v9614_v3  ;;  %v9690_v3 = vld [vmem:[#allocation6 + $0xa68] ss:$40 sps:$4 sm:$0xff]  }
 0x259   :  { %5481 = vmatpush1.bf16.msra.mxu0 %v9609_v4  ;;  %v9695_v4 = vld [vmem:[#allocation6 + $0xab4] ss:$40 sps:$4 sm:$0xff]  }
 0x25a   :  { %5686 = vmatpush1.bf16.msra.mxu1 %v9612_v6  ;;  %5482 = vmatprep.subr.bf16.mxu0 %v9617_v7  ;;  %v9698_v6 = vld [vmem:[#allocation6 + $0xabc] ss:$40 sps:$4 sm:$0xff]   ;;  %v9693_v7 = vld [vmem:[#allocation6 + $0xab0] ss:$40 sps:$4 sm:$0xff]  }
 0x25b   :  { %5687 = vmatprep.subr.bf16.mxu1 %v9620_v8  ;;  %v9696_v8 = vld [vmem:[#allocation6 + $0xab8] ss:$40 sps:$4 sm:$0xff]  }
 0x25d   :  { %5483 = vmatpush1.bf16.msra.mxu0 %v9615_v9  ;;  %v9701_v9 = vld [vmem:[#allocation6 + $0xb04] ss:$40 sps:$4 sm:$0xff]  }
 0x25e   :  { %5688 = vmatpush1.bf16.msra.mxu1 %v9618_v11  ;;  %5484 = vmatprep.subr.bf16.mxu0 %v9623_v12  ;;  %v9704_v11 = vld [vmem:[#allocation6 + $0xb0c] ss:$40 sps:$4 sm:$0xff]   ;;  %v9699_v12 = vld [vmem:[#allocation6 + $0xb00] ss:$40 sps:$4 sm:$0xff]  }
 0x25f   :  { %5689 = vmatprep.subr.bf16.mxu1 %v9626_v14  ;;  %v9702_v14 = vld [vmem:[#allocation6 + $0xb08] ss:$40 sps:$4 sm:$0xff]  }
 0x261   :  { %5485 = vmatpush1.bf16.msra.mxu0 %v9621_v16  ;;  %v9707_v16 = vld [vmem:[#allocation6 + $0xb54] ss:$40 sps:$4 sm:$0xff]  }
 0x262   :  { %5690 = vmatpush1.bf16.msra.mxu1 %v9624_v17  ;;  %5486 = vmatprep.subr.bf16.mxu0 %v9629_v18  ;;  %v9710_v17 = vld [vmem:[#allocation6 + $0xb5c] ss:$40 sps:$4 sm:$0xff]   ;;  %v9705_v18 = vld [vmem:[#allocation6 + $0xb50] ss:$40 sps:$4 sm:$0xff]  }
 0x263   :  { %5691 = vmatprep.subr.bf16.mxu1 %v9632_v19  ;;  %v9708_v19 = vld [vmem:[#allocation6 + $0xb58] ss:$40 sps:$4 sm:$0xff]  }
 0x265   :  { %5487 = vmatpush1.bf16.msra.mxu0 %v9627_v22  ;;  %v9713_v22 = vld [vmem:[#allocation6 + $0xba4] ss:$40 sps:$4 sm:$0xff]  }
 0x266   :  { %5692 = vmatpush1.bf16.msra.mxu1 %v9630_v23  ;;  %5488 = vmatprep.subr.bf16.mxu0 %v9635_v13  ;;  %v9716_v23 = vld [vmem:[#allocation6 + $0xbac] ss:$40 sps:$4 sm:$0xff]   ;;  %v9711_v13 = vld [vmem:[#allocation6 + $0xba0] ss:$40 sps:$4 sm:$0xff]  }
 0x267   :  { %5693 = vmatprep.subr.bf16.mxu1 %v9638_v25  ;;  %v9714_v25 = vld [vmem:[#allocation6 + $0xba8] ss:$40 sps:$4 sm:$0xff]  }
 0x269   :  { %5489 = vmatpush1.bf16.msra.mxu0 %v9633_v26  ;;  %v9719_v26 = vld [vmem:[#allocation6 + $0xbf4] ss:$40 sps:$4 sm:$0xff]  }
 0x26a   :  { %5694 = vmatpush1.bf16.msra.mxu1 %v9636_v27  ;;  %5490 = vmatprep.subr.bf16.mxu0 %v9641_v28  ;;  %v9722_v27 = vld [vmem:[#allocation6 + $0xbfc] ss:$40 sps:$4 sm:$0xff]   ;;  %v9717_v28 = vld [vmem:[#allocation6 + $0xbf0] ss:$40 sps:$4 sm:$0xff]  }
 0x26b   :  { %5695 = vmatprep.subr.bf16.mxu1 %v9644_v32  ;;  %v9720_v32 = vld [vmem:[#allocation6 + $0xbf8] ss:$40 sps:$4 sm:$0xff]  }
 0x26d   :  { %5491 = vmatpush1.bf16.msra.mxu0 %v9639_v33  ;;  %v9725_v33 = vld [vmem:[#allocation6 + $0xc44] ss:$40 sps:$4 sm:$0xff]  }
 0x26e   :  { %5696 = vmatpush1.bf16.msra.mxu1 %v9642_v34  ;;  %5492 = vmatprep.subr.bf16.mxu0 %v9647_v21  ;;  %v9728_v34 = vld [vmem:[#allocation6 + $0xc4c] ss:$40 sps:$4 sm:$0xff]   ;;  %v9723_v21 = vld [vmem:[#allocation6 + $0xc40] ss:$40 sps:$4 sm:$0xff]  }
 0x26f   :  { %5697 = vmatprep.subr.bf16.mxu1 %v9650_v36  ;;  %v9726_v36 = vld [vmem:[#allocation6 + $0xc48] ss:$40 sps:$4 sm:$0xff]  }
 0x271   :  { %5493 = vmatpush1.bf16.msra.mxu0 %v9645_v37  ;;  %v9731_v37 = vld [vmem:[#allocation6 + $0xc94] ss:$40 sps:$4 sm:$0xff]  }
 0x272   :  { %5698 = vmatpush1.bf16.msra.mxu1 %v9648_v38  ;;  %5494 = vmatprep.subr.bf16.mxu0 %v9653_v39  ;;  %v9734_v38 = vld [vmem:[#allocation6 + $0xc9c] ss:$40 sps:$4 sm:$0xff]   ;;  %v9729_v39 = vld [vmem:[#allocation6 + $0xc90] ss:$40 sps:$4 sm:$0xff]  }
 0x273   :  { %5699 = vmatprep.subr.bf16.mxu1 %v9656_v40  ;;  %v9732_v40 = vld [vmem:[#allocation6 + $0xc98] ss:$40 sps:$4 sm:$0xff]  }
 0x275   :  { %5495 = vmatpush1.bf16.msra.mxu0 %v9651_v42  ;;  %v9737_v42 = vld [vmem:[#allocation6 + $0xce4] ss:$40 sps:$4 sm:$0xff]  }
 0x276   :  { %5700 = vmatpush1.bf16.msra.mxu1 %v9654_v43  ;;  %5496 = vmatprep.subr.bf16.mxu0 %v9659_v44  ;;  %v9740_v43 = vld [vmem:[#allocation6 + $0xcec] ss:$40 sps:$4 sm:$0xff]   ;;  %v9735_v44 = vld [vmem:[#allocation6 + $0xce0] ss:$40 sps:$4 sm:$0xff]  }
 0x277   :  { %5701 = vmatprep.subr.bf16.mxu1 %v9662_v45  ;;  %v9738_v45 = vld [vmem:[#allocation6 + $0xce8] ss:$40 sps:$4 sm:$0xff]  }
 0x279   :  { %5497 = vmatpush1.bf16.msra.mxu0 %v9657_v46  ;;  %v9743_v46 = vld [vmem:[#allocation6 + $0xd34] ss:$40 sps:$4 sm:$0xff]  }
 0x27a   :  { %5702 = vmatpush1.bf16.msra.mxu1 %v9660_v47  ;;  %5498 = vmatprep.subr.bf16.mxu0 %v9665_v31  ;;  %v9746_v47 = vld [vmem:[#allocation6 + $0xd3c] ss:$40 sps:$4 sm:$0xff]   ;;  %v9741_v31 = vld [vmem:[#allocation6 + $0xd30] ss:$40 sps:$4 sm:$0xff]  }
 0x27b   :  { %5703 = vmatprep.subr.bf16.mxu1 %v9668_v49  ;;  %v9744_v49 = vld [vmem:[#allocation6 + $0xd38] ss:$40 sps:$4 sm:$0xff]  }
 0x27d   :  { %5499 = vmatpush1.bf16.msra.mxu0 %v9663_v50  ;;  %v9749_v50 = vld [vmem:[#allocation6 + $0xd84] ss:$40 sps:$4 sm:$0xff]  }
 0x27e   :  { %5704 = vmatpush1.bf16.msra.mxu1 %v9666_v51  ;;  %5500 = vmatprep.subr.bf16.mxu0 %v9671_v52  ;;  %v9752_v51 = vld [vmem:[#allocation6 + $0xd8c] ss:$40 sps:$4 sm:$0xff]   ;;  %v9747_v52 = vld [vmem:[#allocation6 + $0xd80] ss:$40 sps:$4 sm:$0xff]  }
 0x27f   :  { %5705 = vmatprep.subr.bf16.mxu1 %v9674_v53  ;;  %v9750_v53 = vld [vmem:[#allocation6 + $0xd88] ss:$40 sps:$4 sm:$0xff]  }
 0x281   :  { %5501 = vmatpush1.bf16.msra.mxu0 %v9669_v54  ;;  %v9755_v54 = vld [vmem:[#allocation6 + $0xdd4] ss:$40 sps:$4 sm:$0xff]  }
 0x282   :  { %5706 = vmatpush1.bf16.msra.mxu1 %v9672_v55  ;;  %5502 = vmatprep.subr.bf16.mxu0 %v9677_v56  ;;  %v9758_v55 = vld [vmem:[#allocation6 + $0xddc] ss:$40 sps:$4 sm:$0xff]   ;;  %v9753_v56 = vld [vmem:[#allocation6 + $0xdd0] ss:$40 sps:$4 sm:$0xff]  }
 0x283   :  { %5707 = vmatprep.subr.bf16.mxu1 %v9680_v57  ;;  %v9756_v57 = vld [vmem:[#allocation6 + $0xdd8] ss:$40 sps:$4 sm:$0xff]  }
 0x285   :  { %5503 = vmatpush1.bf16.msra.mxu0 %v9675_v58  ;;  %v9761_v58 = vld [vmem:[#allocation6 + $0xe24] ss:$40 sps:$4 sm:$0xff]  }
 0x286   :  { %5708 = vmatpush1.bf16.msra.mxu1 %v9678_v59  ;;  %5513 = vmatprep.subr.bf16.mxu0 %v9683_v60  ;;  %v9764_v59 = vld [vmem:[#allocation6 + $0xe2c] ss:$40 sps:$4 sm:$0xff]   ;;  %v9759_v60 = vld [vmem:[#allocation6 + $0xe20] ss:$40 sps:$4 sm:$0xff]  }
 0x287   :  { %5718 = vmatprep.subr.bf16.mxu1 %v9686_v61  ;;  %v9762_v61 = vld [vmem:[#allocation6 + $0xe28] ss:$40 sps:$4 sm:$0xff]  }
 0x288   :  { %5505 = vmatmul.mubr.bf16.vlgmr.msra.gmra.mrb[4].mxu0 %v10948_v10 }
 0x289   :  { %5710 = vmatmul.mubr.bf16.vlgmr.msra.gmra.mrb[4].mxu1 %v10948_v10  ;;  %5514 = vmatpush1.bf16.msra.mxu0 %v9681_v62  ;;  %v9767_v62 = vld [vmem:[#allocation6 + $0xe74] ss:$40 sps:$4 sm:$0xff]  }
 0x28a   :  { %5719 = vmatpush1.bf16.msra.mxu1 %v9684_v63  ;;  %5515 = vmatprep.subr.bf16.mxu0 %v9689_v0  ;;  %v9770_v63 = vld [vmem:[#allocation6 + $0xe7c] ss:$40 sps:$4 sm:$0xff]   ;;  %v9765_v0 = vld [vmem:[#allocation6 + $0xe70] ss:$40 sps:$4 sm:$0xff]  }
 0x28b   :  { %5720 = vmatprep.subr.bf16.mxu1 %v9692_v1  ;;  %5545 = vmatprep.mubr.bf16.mxu0 %v10957_v15  ;;  %v9768_v1 = vld [vmem:[#allocation6 + $0xe78] ss:$40 sps:$4 sm:$0xff]  }
 0x28c   :  { %5750 = vmatprep.mubr.bf16.mxu1 %v10957_v15 }
 0x28d   :  { %5516 = vmatpush1.bf16.msra.mxu0 %v9687_v2  ;;  %v9773_v2 = vld [vmem:[#allocation6 + $0xec4] ss:$40 sps:$4 sm:$0xff]  }
 0x28e   :  { %5721 = vmatpush1.bf16.msra.mxu1 %v9690_v3  ;;  %5517 = vmatprep.subr.bf16.mxu0 %v9695_v4  ;;  %v9776_v3 = vld [vmem:[#allocation6 + $0xecc] ss:$40 sps:$4 sm:$0xff]   ;;  %v9771_v4 = vld [vmem:[#allocation6 + $0xec0] ss:$40 sps:$4 sm:$0xff]  }
 0x28f   :  { %5722 = vmatprep.subr.bf16.mxu1 %v9698_v6  ;;  %v9774_v6 = vld [vmem:[#allocation6 + $0xec8] ss:$40 sps:$4 sm:$0xff]  }
 0x291   :  { %5518 = vmatpush1.bf16.msra.mxu0 %v9693_v7  ;;  %v9779_v7 = vld [vmem:[#allocation6 + $0xf14] ss:$40 sps:$4 sm:$0xff]  }
 0x292   :  { %5723 = vmatpush1.bf16.msra.mxu1 %v9696_v8  ;;  %5519 = vmatprep.subr.bf16.mxu0 %v9701_v9  ;;  %v9782_v8 = vld [vmem:[#allocation6 + $0xf1c] ss:$40 sps:$4 sm:$0xff]   ;;  %v9777_v9 = vld [vmem:[#allocation6 + $0xf10] ss:$40 sps:$4 sm:$0xff]  }
 0x293   :  { %5724 = vmatprep.subr.bf16.mxu1 %v9704_v11  ;;  %v9780_v11 = vld [vmem:[#allocation6 + $0xf18] ss:$40 sps:$4 sm:$0xff]  }
 0x295   :  { %5520 = vmatpush1.bf16.msra.mxu0 %v9699_v12  ;;  %v9785_v12 = vld [vmem:[#allocation6 + $0xf64] ss:$40 sps:$4 sm:$0xff]  }
 0x296   :  { %5725 = vmatpush1.bf16.msra.mxu1 %v9702_v14  ;;  %5521 = vmatprep.subr.bf16.mxu0 %v9707_v16  ;;  %v9788_v14 = vld [vmem:[#allocation6 + $0xf6c] ss:$40 sps:$4 sm:$0xff]   ;;  %v9783_v16 = vld [vmem:[#allocation6 + $0xf60] ss:$40 sps:$4 sm:$0xff]  }
 0x297   :  { %5726 = vmatprep.subr.bf16.mxu1 %v9710_v17  ;;  %v9786_v17 = vld [vmem:[#allocation6 + $0xf68] ss:$40 sps:$4 sm:$0xff]  }
 0x299   :  { %5522 = vmatpush1.bf16.msra.mxu0 %v9705_v18  ;;  %v9791_v18 = vld [vmem:[#allocation6 + $0xfb4] ss:$40 sps:$4 sm:$0xff]  }
 0x29a   :  { %5727 = vmatpush1.bf16.msra.mxu1 %v9708_v19  ;;  %5523 = vmatprep.subr.bf16.mxu0 %v9713_v22  ;;  %v9794_v19 = vld [vmem:[#allocation6 + $0xfbc] ss:$40 sps:$4 sm:$0xff]   ;;  %v9789_v22 = vld [vmem:[#allocation6 + $0xfb0] ss:$40 sps:$4 sm:$0xff]  }
 0x29b   :  { %5728 = vmatprep.subr.bf16.mxu1 %v9716_v23  ;;  %v9792_v23 = vld [vmem:[#allocation6 + $0xfb8] ss:$40 sps:$4 sm:$0xff]  }
 0x29d   :  { %5524 = vmatpush1.bf16.msra.mxu0 %v9711_v13  ;;  %v9797_v13 = vld [vmem:[#allocation6 + $0x1004] ss:$40 sps:$4 sm:$0xff]  }
 0x29e   :  { %5729 = vmatpush1.bf16.msra.mxu1 %v9714_v25  ;;  %5525 = vmatprep.subr.bf16.mxu0 %v9719_v26  ;;  %v9800_v25 = vld [vmem:[#allocation6 + $0x100c] ss:$40 sps:$4 sm:$0xff]   ;;  %v9795_v26 = vld [vmem:[#allocation6 + $0x1000] ss:$40 sps:$4 sm:$0xff]  }
 0x29f   :  { %5730 = vmatprep.subr.bf16.mxu1 %v9722_v27  ;;  %v9798_v27 = vld [vmem:[#allocation6 + $0x1008] ss:$40 sps:$4 sm:$0xff]  }
 0x2a1   :  { %5526 = vmatpush1.bf16.msra.mxu0 %v9717_v28  ;;  %v9803_v28 = vld [vmem:[#allocation6 + $0x1054] ss:$40 sps:$4 sm:$0xff]  }
 0x2a2   :  { %5731 = vmatpush1.bf16.msra.mxu1 %v9720_v32  ;;  %5527 = vmatprep.subr.bf16.mxu0 %v9725_v33  ;;  %v9806_v32 = vld [vmem:[#allocation6 + $0x105c] ss:$40 sps:$4 sm:$0xff]   ;;  %v9801_v33 = vld [vmem:[#allocation6 + $0x1050] ss:$40 sps:$4 sm:$0xff]  }
 0x2a3   :  { %5732 = vmatprep.subr.bf16.mxu1 %v9728_v34  ;;  %v9804_v34 = vld [vmem:[#allocation6 + $0x1058] ss:$40 sps:$4 sm:$0xff]  }
 0x2a5   :  { %5528 = vmatpush1.bf16.msra.mxu0 %v9723_v21  ;;  %v9809_v21 = vld [vmem:[#allocation6 + $0x10a4] ss:$40 sps:$4 sm:$0xff]  }
 0x2a6   :  { %5733 = vmatpush1.bf16.msra.mxu1 %v9726_v36  ;;  %5529 = vmatprep.subr.bf16.mxu0 %v9731_v37  ;;  %v9812_v36 = vld [vmem:[#allocation6 + $0x10ac] ss:$40 sps:$4 sm:$0xff]   ;;  %v9807_v37 = vld [vmem:[#allocation6 + $0x10a0] ss:$40 sps:$4 sm:$0xff]  }
 0x2a7   :  { %5734 = vmatprep.subr.bf16.mxu1 %v9734_v38  ;;  %v9810_v38 = vld [vmem:[#allocation6 + $0x10a8] ss:$40 sps:$4 sm:$0xff]  }
 0x2a9   :  { %5530 = vmatpush1.bf16.msra.mxu0 %v9729_v39  ;;  %v9815_v39 = vld [vmem:[#allocation6 + $0x10f4] ss:$40 sps:$4 sm:$0xff]  }
 0x2aa   :  { %5735 = vmatpush1.bf16.msra.mxu1 %v9732_v40  ;;  %5531 = vmatprep.subr.bf16.mxu0 %v9737_v42  ;;  %v9818_v40 = vld [vmem:[#allocation6 + $0x10fc] ss:$40 sps:$4 sm:$0xff]  }
 0x2ab   :  { %5736 = vmatprep.subr.bf16.mxu1 %v9740_v43 }
 0x2ad   :  { %5532 = vmatpush1.bf16.msra.mxu0 %v9735_v44 }
 0x2ae   :  { %5737 = vmatpush1.bf16.msra.mxu1 %v9738_v45  ;;  %5533 = vmatprep.subr.bf16.mxu0 %v9743_v46  ;;  %v9813_v46 = vld [vmem:[#allocation6 + $0x10f0] ss:$40 sps:$4 sm:$0xff]  }
 0x2af   :  { %5738 = vmatprep.subr.bf16.mxu1 %v9746_v47 }
 0x2b1   :  { %5534 = vmatpush1.bf16.msra.mxu0 %v9741_v31  ;;  %v9816_v31 = vld [vmem:[#allocation6 + $0x10f8] ss:$40 sps:$4 sm:$0xff]  }
 0x2b2   :  { %5739 = vmatpush1.bf16.msra.mxu1 %v9744_v49  ;;  %5535 = vmatprep.subr.bf16.mxu0 %v9749_v50 }
 0x2b3   :  { %5740 = vmatprep.subr.bf16.mxu1 %v9752_v51  ;;  %v9821_v51 = vld [vmem:[#allocation6 + $0x1144] ss:$40 sps:$4 sm:$0xff]  }
 0x2b5   :  { %5536 = vmatpush1.bf16.msra.mxu0 %v9747_v52  ;;  %v9824_v52 = vld [vmem:[#allocation6 + $0x114c] ss:$40 sps:$4 sm:$0xff]  }
 0x2b6   :  { %5741 = vmatpush1.bf16.msra.mxu1 %v9750_v53  ;;  %5537 = vmatprep.subr.bf16.mxu0 %v9755_v54  ;;  %v9819_v54 = vld [vmem:[#allocation6 + $0x1140] ss:$40 sps:$4 sm:$0xff]  }
 0x2b7   :  { %5742 = vmatprep.subr.bf16.mxu1 %v9758_v55  ;;  %v9822_v55 = vld [vmem:[#allocation6 + $0x1148] ss:$40 sps:$4 sm:$0xff]  }
 0x2b9   :  { %5538 = vmatpush1.bf16.msra.mxu0 %v9753_v56  ;;  %v9827_v56 = vld [vmem:[#allocation6 + $0x1194] ss:$40 sps:$4 sm:$0xff]  }
 0x2ba   :  { %5743 = vmatpush1.bf16.msra.mxu1 %v9756_v57  ;;  %5539 = vmatprep.subr.bf16.mxu0 %v9761_v58  ;;  %v9830_v57 = vld [vmem:[#allocation6 + $0x119c] ss:$40 sps:$4 sm:$0xff]   ;;  %v9825_v58 = vld [vmem:[#allocation6 + $0x1190] ss:$40 sps:$4 sm:$0xff]  }
 0x2bb   :  { %5744 = vmatprep.subr.bf16.mxu1 %v9764_v59 }
 0x2bd   :  { %5540 = vmatpush1.bf16.msra.mxu0 %v9759_v60  ;;  %v9828_v60 = vld [vmem:[#allocation6 + $0x1198] ss:$40 sps:$4 sm:$0xff]  }
 0x2be   :  { %5745 = vmatpush1.bf16.msra.mxu1 %v9762_v61  ;;  %5541 = vmatprep.subr.bf16.mxu0 %v9767_v62  ;;  %v9833_v61 = vld [vmem:[#allocation6 + $0x11e4] ss:$40 sps:$4 sm:$0xff]  }
 0x2bf   :  { %5746 = vmatprep.subr.bf16.mxu1 %v9770_v63  ;;  %v9836_v62 = vld [vmem:[#allocation6 + $0x11ec] ss:$40 sps:$4 sm:$0xff]   ;;  %v9831_v63 = vld [vmem:[#allocation6 + $0x11e0] ss:$40 sps:$4 sm:$0xff]  }
 0x2c1   :  { %5542 = vmatpush1.bf16.msra.mxu0 %v9765_v0 }
 0x2c2   :  { %5747 = vmatpush1.bf16.msra.mxu1 %v9768_v1  ;;  %5543 = vmatprep.subr.bf16.mxu0 %v9773_v2  ;;  %v9834_v1 = vld [vmem:[#allocation6 + $0x11e8] ss:$40 sps:$4 sm:$0xff]   ;;  %v9839_v2 = vld [vmem:[#allocation6 + $0x1234] ss:$40 sps:$4 sm:$0xff]  }
 0x2c3   :  { %5748 = vmatprep.subr.bf16.mxu1 %v9776_v3  ;;  %v9842_v3 = vld [vmem:[#allocation6 + $0x123c] ss:$40 sps:$4 sm:$0xff]  }
 0x2c5   :  { %5544 = vmatpush1.bf16.msra.mxu0 %v9771_v4  ;;  %v9837_v4 = vld [vmem:[#allocation6 + $0x1230] ss:$40 sps:$4 sm:$0xff]  }
 0x2c6   :  { %5749 = vmatpush1.bf16.msra.mxu1 %v9774_v6  ;;  %5554 = vmatprep.subr.bf16.mxu0 %v9779_v7  ;;  %v9840_v7 = vld [vmem:[#allocation6 + $0x1238] ss:$40 sps:$4 sm:$0xff]  }
 0x2c7   :  { %5759 = vmatprep.subr.bf16.mxu1 %v9782_v8  ;;  %v9845_v8 = vld [vmem:[#allocation6 + $0x1284] ss:$40 sps:$4 sm:$0xff]  }
 0x2c8   :  { %5546 = vmatmul.mubr.bf16.vlgmr.msra.gmra.mrb[4].mxu0 %v10965_v20 }
 0x2c9   :  { %5751 = vmatmul.mubr.bf16.vlgmr.msra.gmra.mrb[4].mxu1 %v10965_v20  ;;  %5555 = vmatpush1.bf16.msra.mxu0 %v9777_v9  ;;  %v9848_v9 = vld [vmem:[#allocation6 + $0x128c] ss:$40 sps:$4 sm:$0xff]  }
 0x2ca   :  { %5760 = vmatpush1.bf16.msra.mxu1 %v9780_v11  ;;  %5556 = vmatprep.subr.bf16.mxu0 %v9785_v12  ;;  %v9843_v12 = vld [vmem:[#allocation6 + $0x1280] ss:$40 sps:$4 sm:$0xff]  }
 0x2cb   :  { %5761 = vmatprep.subr.bf16.mxu1 %v9788_v14  ;;  %5586 = vmatprep.mubr.bf16.mxu0 %v10974_v24  ;;  %v9846_v14 = vld [vmem:[#allocation6 + $0x1288] ss:$40 sps:$4 sm:$0xff]  }
 0x2cc   :  { %5791 = vmatprep.mubr.bf16.mxu1 %v10974_v24 }
 0x2cd   :  { %5557 = vmatpush1.bf16.msra.mxu0 %v9783_v16  ;;  %v9851_v16 = vld [vmem:[#allocation6 + $0x12d4] ss:$40 sps:$4 sm:$0xff]  }
 0x2ce   :  { %5762 = vmatpush1.bf16.msra.mxu1 %v9786_v17  ;;  %5558 = vmatprep.subr.bf16.mxu0 %v9791_v18  ;;  %v9854_v17 = vld [vmem:[#allocation6 + $0x12dc] ss:$40 sps:$4 sm:$0xff]   ;;  %v9849_v18 = vld [vmem:[#allocation6 + $0x12d0] ss:$40 sps:$4 sm:$0xff]  }
 0x2cf   :  { %5763 = vmatprep.subr.bf16.mxu1 %v9794_v19 }
 0x2d1   :  { %5559 = vmatpush1.bf16.msra.mxu0 %v9789_v22  ;;  %v9852_v22 = vld [vmem:[#allocation6 + $0x12d8] ss:$40 sps:$4 sm:$0xff]  }
 0x2d2   :  { %5764 = vmatpush1.bf16.msra.mxu1 %v9792_v23  ;;  %5560 = vmatprep.subr.bf16.mxu0 %v9797_v13  ;;  %v9857_v23 = vld [vmem:[#allocation6 + $0x1324] ss:$40 sps:$4 sm:$0xff]  }
 0x2d3   :  { %5765 = vmatprep.subr.bf16.mxu1 %v9800_v25  ;;  %v9860_v13 = vld [vmem:[#allocation6 + $0x132c] ss:$40 sps:$4 sm:$0xff]  }
 0x2d5   :  { %5561 = vmatpush1.bf16.msra.mxu0 %v9795_v26  ;;  %v9855_v26 = vld [vmem:[#allocation6 + $0x1320] ss:$40 sps:$4 sm:$0xff]  }
 0x2d6   :  { %5766 = vmatpush1.bf16.msra.mxu1 %v9798_v27  ;;  %5562 = vmatprep.subr.bf16.mxu0 %v9803_v28  ;;  %v9858_v27 = vld [vmem:[#allocation6 + $0x1328] ss:$40 sps:$4 sm:$0xff]   ;;  %v9863_v28 = vld [vmem:[#allocation6 + $0x1374] ss:$40 sps:$4 sm:$0xff]  }
 0x2d7   :  { %5767 = vmatprep.subr.bf16.mxu1 %v9806_v32  ;;  %v9866_v32 = vld [vmem:[#allocation6 + $0x137c] ss:$40 sps:$4 sm:$0xff]  }
 0x2d9   :  { %5563 = vmatpush1.bf16.msra.mxu0 %v9801_v33 }
 0x2da   :  { %5768 = vmatpush1.bf16.msra.mxu1 %v9804_v34  ;;  %5564 = vmatprep.subr.bf16.mxu0 %v9809_v21  ;;  %v9861_v34 = vld [vmem:[#allocation6 + $0x1370] ss:$40 sps:$4 sm:$0xff]  }
 0x2db   :  { %5769 = vmatprep.subr.bf16.mxu1 %v9812_v36  ;;  %v11017_v42 = vpop.f32.mrb[0].mxu0  ;;  %v9864_v21 = vld [vmem:[#allocation6 + $0x1378] ss:$40 sps:$4 sm:$0xff]   ;;  %v9869_v36 = vld [vmem:[#allocation6 + $0x13c4] ss:$40 sps:$4 sm:$0xff]  }
 0x2dc   :  { %v11019_v43 = vpop.f32.mrb[0].mxu1  ;;  %v11021_v44 = vpop.f32.mrb[1].mxu0 }
 0x2dd   :  { %v11023_v45 = vpop.f32.mrb[1].mxu1  ;;  %v5223_v47 = vpop.f32.mrb[2].mxu0  ;;  %5565 = vmatpush1.bf16.msra.mxu0 %v9807_v37  ;;  %v6056_v59 = vrot.slane %v11021_v44, 4  ;;  %v9872_v37 = vld [vmem:[#allocation6 + $0x13cc] ss:$40 sps:$4 sm:$0xff]  }
 0x2de   :  { %5770 = vmatpush1.bf16.msra.mxu1 %v9810_v38  ;;  %v5428_v49 = vpop.f32.mrb[2].mxu1  ;;  %v5224_v50 = vpop.f32.mrb[3].mxu0  ;;  %5566 = vmatprep.subr.bf16.mxu0 %v9815_v39  ;;  %v9867_v39 = vld [vmem:[#allocation6 + $0x13c0] ss:$40 sps:$4 sm:$0xff]   ;;  %v9878_v47 = vld [vmem:[#allocation6 + $0x141c] ss:$40 sps:$4 sm:$0xff]  }
 0x2df   :  { %5771 = vmatprep.subr.bf16.mxu1 %v9818_v40  ;;  %v5429_v53 = vpop.f32.mrb[3].mxu1  ;;  %v6057_v0 = vadd.f32 %v6056_v59, %v11021_v44  ;;  %v9870_v40 = vld [vmem:[#allocation6 + $0x13c8] ss:$40 sps:$4 sm:$0xff]   ;;  %v9876_v49 = vld [vmem:[#allocation6 + $0x1418] ss:$40 sps:$4 sm:$0xff]   ;;  %v6050_v50 = vrot.slane %v11017_v42, 4 }
 0x2e0   :  { %v9884_v53 = vld [vmem:[#allocation6 + $0x146c] ss:$40 sps:$4 sm:$0xff]   ;;  %v9890_v59 = vld [vmem:[#allocation6 + $0x14bc] ss:$40 sps:$4 sm:$0xff]  }
 0x2e1   :  { %5567 = vmatpush1.bf16.msra.mxu0 %v9813_v46  ;;  %v6058_v6 = vrot.slane %v6057_v0, 2  ;;  %v9875_v46 = vld [vmem:[#allocation6 + $0x1414] ss:$40 sps:$4 sm:$0xff]  }
 0x2e2   :  { %5772 = vmatpush1.bf16.msra.mxu1 %v9816_v31  ;;  %5568 = vmatprep.subr.bf16.mxu0 %v9821_v51  ;;  %v9873_v31 = vld [vmem:[#allocation6 + $0x1410] ss:$40 sps:$4 sm:$0xff]  }
 0x2e3   :  { %5773 = vmatprep.subr.bf16.mxu1 %v9824_v52  ;;  %v6059_v11 = vadd.f32 %v6058_v6, %v6057_v0  ;;  %v6068_v52 = vrot.slane %v11023_v45, 4  ;;  %v9893_v0 = vld [vmem:[#allocation6 + $0x1504] ss:$40 sps:$4 sm:$0xff]   ;;  %v9891_v6 = vld [vmem:[#allocation6 + $0x1500] ss:$40 sps:$4 sm:$0xff]  }
 0x2e5   :  { %5569 = vmatpush1.bf16.msra.mxu0 %v9819_v54  ;;  %v6060_v19 = vrot.slane %v6059_v11, 1  ;;  %v9879_v54 = vld [vmem:[#allocation6 + $0x1460] ss:$40 sps:$4 sm:$0xff]  }
 0x2e6   :  { %5774 = vmatpush1.bf16.msra.mxu1 %v9822_v55  ;;  %5570 = vmatprep.subr.bf16.mxu0 %v9827_v56  ;;  %v9882_v55 = vld [vmem:[#allocation6 + $0x1468] ss:$40 sps:$4 sm:$0xff]   ;;  %v9887_v56 = vld [vmem:[#allocation6 + $0x14b4] ss:$40 sps:$4 sm:$0xff]  }
 0x2e7   :  { %5775 = vmatprep.subr.bf16.mxu1 %v9830_v57  ;;  %v6061_v25 = vadd.f32 %v6060_v19, %v6059_v11  ;;  %v6051_v57 = vadd.f32 %v6050_v50, %v11017_v42  ;;  %v9908_v19 = vld [vmem:[#allocation6 + $0x15ac] ss:$40 sps:$4 sm:$0xff]  }
 0x2e8   :  { %v9923_v50 = vld [vmem:[#allocation6 + $0x1694] ss:$40 sps:$4 sm:$0xff]  }
 0x2e9   :  { %5571 = vmatpush1.bf16.msra.mxu0 %v9825_v58  ;;  %v6112_v33 = vmul.f32 0.125, %v6061_v25  ;;  %v9903_v25 = vld [vmem:[#allocation6 + $0x15a0] ss:$40 sps:$4 sm:$0xff]  }
 0x2ea   :  { %5776 = vmatpush1.bf16.msra.mxu1 %v9828_v60  ;;  %5572 = vmatprep.subr.bf16.mxu0 %v9833_v61  ;;  %v6069_v60 = vadd.f32 %v6068_v52, %v11023_v45  ;;  %v6052_v61 = vrot.slane %v6051_v57, 2 }
 0x2eb   :  { %5777 = vmatprep.subr.bf16.mxu1 %v9836_v62  ;;  %v11028_v38 = vsub.f32 %v11021_v44, %v6112_v33  ;;  %v9881_v44 = vld [vmem:[#allocation6 + $0x1464] ss:$40 sps:$4 sm:$0xff]   ;;  %v9885_v62 = vld [vmem:[#allocation6 + $0x14b0] ss:$40 sps:$4 sm:$0xff]  }
 0x2ed   :  { %5573 = vmatpush1.bf16.msra.mxu0 %v9831_v63  ;;  %v6132_v51 = vmul.f32 %v11028_v38, %v11028_v38  ;;  %v9888_v63 = vld [vmem:[#allocation6 + $0x14b8] ss:$40 sps:$4 sm:$0xff]  }
 0x2ee   :  { %5778 = vmatpush1.bf16.msra.mxu1 %v9834_v1  ;;  %5574 = vmatprep.subr.bf16.mxu0 %v9839_v2  ;;  %v9896_v1 = vld [vmem:[#allocation6 + $0x150c] ss:$40 sps:$4 sm:$0xff]  }
 0x2ef   :  { %5779 = vmatprep.subr.bf16.mxu1 %v9842_v3  ;;  %v6147_v58 = vrot.slane %v6132_v51, 4  ;;  %v6070_v3 = vrot.slane %v6069_v60, 2 }
 0x2f1   :  { %5575 = vmatpush1.bf16.msra.mxu0 %v9837_v4  ;;  %v6148_v2 = vadd.f32 %v6147_v58, %v6132_v51  ;;  %v6053_v4 = vadd.f32 %v6052_v61, %v6051_v57  ;;  %v9926_v51 = vld [vmem:[#allocation6 + $0x169c] ss:$40 sps:$4 sm:$0xff]   ;;  %v9932_v57 = vld [vmem:[#allocation6 + $0x16ec] ss:$40 sps:$4 sm:$0xff]   ;;  %v9927_v61 = vld [vmem:[#allocation6 + $0x16e0] ss:$40 sps:$4 sm:$0xff]  }
 0x2f2   :  { %5780 = vmatpush1.bf16.msra.mxu1 %v9840_v7  ;;  %5576 = vmatprep.subr.bf16.mxu0 %v9845_v8  ;;  %v9894_v7 = vld [vmem:[#allocation6 + $0x1508] ss:$40 sps:$4 sm:$0xff]   ;;  %v9899_v8 = vld [vmem:[#allocation6 + $0x1554] ss:$40 sps:$4 sm:$0xff]  }
 0x2f3   :  { %5781 = vmatprep.subr.bf16.mxu1 %v9848_v9  ;;  %v9902_v9 = vld [vmem:[#allocation6 + $0x155c] ss:$40 sps:$4 sm:$0xff]   ;;  %v6149_v11 = vrot.slane %v6148_v2, 2 }
 0x2f5   :  { %5577 = vmatpush1.bf16.msra.mxu0 %v9843_v12  ;;  %v6071_v12 = vadd.f32 %v6070_v3, %v6069_v60 }
 0x2f6   :  { %5782 = vmatpush1.bf16.msra.mxu1 %v9846_v14  ;;  %5578 = vmatprep.subr.bf16.mxu0 %v9851_v16  ;;  %v6054_v14 = vrot.slane %v6053_v4, 1  ;;  %v9897_v16 = vld [vmem:[#allocation6 + $0x1550] ss:$40 sps:$4 sm:$0xff]  }
 0x2f7   :  { %5783 = vmatprep.subr.bf16.mxu1 %v9854_v17  ;;  %v9900_v17 = vld [vmem:[#allocation6 + $0x1558] ss:$40 sps:$4 sm:$0xff]  }
 0x2f9   :  { %5579 = vmatpush1.bf16.msra.mxu0 %v9849_v18  ;;  %v9905_v18 = vld [vmem:[#allocation6 + $0x15a4] ss:$40 sps:$4 sm:$0xff]  }
 0x2fa   :  { %5784 = vmatpush1.bf16.msra.mxu1 %v9852_v22  ;;  %5580 = vmatprep.subr.bf16.mxu0 %v9857_v23  ;;  %v6150_v22 = vadd.f32 %v6149_v11, %v6148_v2  ;;  %v6072_v23 = vrot.slane %v6071_v12, 1  ;;  %v6243_v2 = vlaneseq }
 0x2fb   :  { %5785 = vmatprep.subr.bf16.mxu1 %v9860_v13  ;;  %v6055_v13 = vadd.f32 %v6054_v14, %v6053_v4 }
 0x2fc   :  { %v6073_v33 = vadd.f32 %v6072_v23, %v6071_v12  ;;  %v11052_v12 = vshrl.u32 %v6243_v2, 7  ;;  %v9972_v2 = vld [vmem:[#allocation11 + $0x40] sm:$0xff]  }
 0x2fd   :  { %5581 = vmatpush1.bf16.msra.mxu0 %v9855_v26  ;;  %v9906_v26 = vld [vmem:[#allocation6 + $0x15a8] ss:$40 sps:$4 sm:$0xff]  }
 0x2fe   :  { %5786 = vmatpush1.bf16.msra.mxu1 %v9858_v27  ;;  %5582 = vmatprep.subr.bf16.mxu0 %v9863_v28  ;;  %v9911_v27 = vld [vmem:[#allocation6 + $0x15f4] ss:$40 sps:$4 sm:$0xff]  }
 0x2ff   :  { %5787 = vmatprep.subr.bf16.mxu1 %v9866_v32  ;;  %v9914_v28 = vld [vmem:[#allocation6 + $0x15fc] ss:$40 sps:$4 sm:$0xff]   ;;  %v6151_v32 = vrot.slane %v6150_v22, 1 }
 0x301   :  { %5583 = vmatpush1.bf16.msra.mxu0 %v9861_v34  ;;  %v6111_v34 = vmul.f32 0.125, %v6055_v13  ;;  %v11055_v13 = vsub.s32 1, %v11052_v12 }
 0x302   :  { %5788 = vmatpush1.bf16.msra.mxu1 %v9864_v21  ;;  %5584 = vmatprep.subr.bf16.mxu0 %v9869_v36  ;;  %v9909_v21 = vld [vmem:[#allocation6 + $0x15f0] ss:$40 sps:$4 sm:$0xff]  }
 0x303   :  { %5789 = vmatprep.subr.bf16.mxu1 %v9872_v37  ;;  %v9912_v36 = vld [vmem:[#allocation6 + $0x15f8] ss:$40 sps:$4 sm:$0xff]   ;;  %v9917_v37 = vld [vmem:[#allocation6 + $0x1644] ss:$40 sps:$4 sm:$0xff]  }
 0x305   :  { %5585 = vmatpush1.bf16.msra.mxu0 %v9867_v39  ;;  %v9920_v39 = vld [vmem:[#allocation6 + $0x164c] ss:$40 sps:$4 sm:$0xff]  }
 0x306   :  { %5790 = vmatpush1.bf16.msra.mxu1 %v9870_v40  ;;  %5595 = vmatprep.subr.bf16.mxu0 %v9875_v46  ;;  %v6152_v40 = vadd.f32 %v6151_v32, %v6150_v22  ;;  %v6114_v46 = vmul.f32 0.125, %v6073_v33  ;;  %v9950_v22 = vld [vmem:[#allocation6 + $0x17dc] ss:$40 sps:$4 sm:$0xff]   ;;  %v9945_v32 = vld [vmem:[#allocation6 + $0x17d0] ss:$40 sps:$4 sm:$0xff]  }
 0x307   :  { %5800 = vmatprep.subr.bf16.mxu1 %v9878_v47  ;;  %v11041_v47 = vsub.f32 %v11017_v42, %v6111_v34  ;;  %v9921_v42 = vld [vmem:[#allocation6 + $0x1690] ss:$40 sps:$4 sm:$0xff]   ;;  %v9953_v34 = vld [vmem:[#allocation6 + $0x1824] ss:$40 sps:$4 sm:$0xff]  }
 0x308   :  { %5587 = vmatmul.mubr.bf16.vlgmr.msra.gmra.mrb[4].mxu0 %v10982_v29  ;;  %v6202_v52 = vmul.f32 0.125, %v6152_v40  ;;  %v9948_v33 = vld [vmem:[#allocation6 + $0x17d8] ss:$40 sps:$4 sm:$0xff]  }
 0x309   :  { %5792 = vmatmul.mubr.bf16.vlgmr.msra.gmra.mrb[4].mxu1 %v10982_v29  ;;  %5596 = vmatpush1.bf16.msra.mxu0 %v9873_v31  ;;  %v9915_v31 = vld [vmem:[#allocation6 + $0x1640] ss:$40 sps:$4 sm:$0xff]  }
 0x30a   :  { %5801 = vmatpush1.bf16.msra.mxu1 %v9876_v49  ;;  %5597 = vmatprep.subr.bf16.mxu0 %v9881_v44  ;;  %v9918_v49 = vld [vmem:[#allocation6 + $0x1648] ss:$40 sps:$4 sm:$0xff]   ;;  %v11044_v44 = vsub.f32 %v11023_v45, %v6114_v46  ;;  %v6212_v58 = vadd.f32 1e-05, %v6202_v52  ;;  %v9962_v52 = vld [vmem:[#allocation6 + $0x187c] ss:$40 sps:$4 sm:$0xff]  }
 0x30b   :  { %5802 = vmatprep.subr.bf16.mxu1 %v9884_v53  ;;  %5627 = vmatprep.mubr.bf16.mxu0 %v10991_v35  ;;  %v6131_v53 = vmul.f32 %v11041_v47, %v11041_v47 }
 0x30c   :  { %5832 = vmatprep.mubr.bf16.mxu1 %v10991_v35  ;;  %10353 = vrsqrt.f32 %v6212_v58  ;;  %v9965_v58 = vld [vmem:[#allocation6 + $0x18c4] ss:$40 sps:$4 sm:$0xff]  }
 0x30d   :  { %5598 = vmatpush1.bf16.msra.mxu0 %v9879_v54  ;;  %v6062_v54 = vrot.slane %v11019_v43, 4  ;;  %v6141_v60 = vrot.slane %v6131_v53, 4 }
 0x30e   :  { %5803 = vmatpush1.bf16.msra.mxu1 %v9882_v55  ;;  %5599 = vmatprep.subr.bf16.mxu0 %v9887_v56  ;;  %v9924_v55 = vld [vmem:[#allocation6 + $0x1698] ss:$40 sps:$4 sm:$0xff]   ;;  %v9929_v56 = vld [vmem:[#allocation6 + $0x16e4] ss:$40 sps:$4 sm:$0xff]  }
 0x30f   :  { %5804 = vmatprep.subr.bf16.mxu1 %v9890_v59  ;;  %v6134_v59 = vmul.f32 %v11044_v44, %v11044_v44  ;;  %v6063_v45 = vadd.f32 %v6062_v54, %v11019_v43  ;;  %v6142_v3 = vadd.f32 %v6141_v60, %v6131_v53 }
 0x311   :  { %5600 = vmatpush1.bf16.msra.mxu0 %v9885_v62  ;;  %v9930_v62 = vld [vmem:[#allocation6 + $0x16e8] ss:$40 sps:$4 sm:$0xff]   ;;  %v6064_v4 = vrot.slane %v6063_v45, 2  ;;  %v6143_v14 = vrot.slane %v6142_v3, 2 }
 0x312   :  { %5805 = vmatpush1.bf16.msra.mxu1 %v9888_v63  ;;  %5601 = vmatprep.subr.bf16.mxu0 %v9893_v0  ;;  %v9935_v63 = vld [vmem:[#allocation6 + $0x1734] ss:$40 sps:$4 sm:$0xff]  }
 0x313   :  { %5806 = vmatprep.subr.bf16.mxu1 %v9896_v1  ;;  %v9938_v0 = vld [vmem:[#allocation6 + $0x173c] ss:$40 sps:$4 sm:$0xff]   ;;  %v6159_v1 = vrot.slane %v6134_v59, 4 }
 0x315   :  { %5602 = vmatpush1.bf16.msra.mxu0 %v9891_v6  ;;  %v9933_v6 = vld [vmem:[#allocation6 + $0x1730] ss:$40 sps:$4 sm:$0xff]   ;;  %v6160_v11 = vadd.f32 %v6159_v1, %v6134_v59  ;;  %v9968_v59 = vld [vmem:[#allocation6 + $0x18cc] ss:$40 sps:$4 sm:$0xff]  }
 0x316   :  { %5807 = vmatpush1.bf16.msra.mxu1 %v9894_v7  ;;  %5603 = vmatprep.subr.bf16.mxu0 %v9899_v8  ;;  %v9936_v7 = vld [vmem:[#allocation6 + $0x1738] ss:$40 sps:$4 sm:$0xff]   ;;  %v9941_v8 = vld [vmem:[#allocation6 + $0x1784] ss:$40 sps:$4 sm:$0xff]  }
 0x317   :  { %5808 = vmatprep.subr.bf16.mxu1 %v9902_v9  ;;  %v9944_v9 = vld [vmem:[#allocation6 + $0x178c] ss:$40 sps:$4 sm:$0xff]   ;;  %v6161_v23 = vrot.slane %v6160_v11, 2 }
 0x318   :  { %v9971_v1 = vld [vmem:[#allocation6 + $0x24] ss:$40 sps:$4 sm:$0xff]  }
 0x319   :  { %5604 = vmatpush1.bf16.msra.mxu0 %v9897_v16  ;;  %v6065_v16 = vadd.f32 %v6064_v4, %v6063_v45 }
 0x31a   :  { %5809 = vmatpush1.bf16.msra.mxu1 %v9900_v17  ;;  %5605 = vmatprep.subr.bf16.mxu0 %v9905_v18  ;;  %v9939_v17 = vld [vmem:[#allocation6 + $0x1780] ss:$40 sps:$4 sm:$0xff]  }
 0x31b   :  { %5810 = vmatprep.subr.bf16.mxu1 %v9908_v19  ;;  %v9942_v18 = vld [vmem:[#allocation6 + $0x1788] ss:$40 sps:$4 sm:$0xff]   ;;  %v9947_v19 = vld [vmem:[#allocation6 + $0x17d4] ss:$40 sps:$4 sm:$0xff]  }
 0x31d   :  { %5606 = vmatpush1.bf16.msra.mxu0 %v9903_v25  ;;  %v10354_v25 = vpop.eup %10353 }
 0x31e   :  { %5811 = vmatpush1.bf16.msra.mxu1 %v9906_v26  ;;  %5607 = vmatprep.subr.bf16.mxu0 %v9911_v27  ;;  %v11057_v26 = vld [vmem:[#allocation8] sm:$0xff]  ;;  %v6144_v27 = vadd.f32 %v6143_v14, %v6142_v3 }
 0x31f   :  { %5812 = vmatprep.subr.bf16.mxu1 %v9914_v28  ;;  %v6066_v28 = vrot.slane %v6065_v16, 1  ;;  %v9977_v14 = vld [vmem:[#allocation11 + $0x48] sm:$0xff]  }
 0x320   :  { %v6145_v40 = vrot.slane %v6144_v27, 1 }
 0x321   :  { %5608 = vmatpush1.bf16.msra.mxu0 %v9909_v21  ;;  %v9956_v21 = vld [vmem:[#allocation6 + $0x182c] ss:$40 sps:$4 sm:$0xff]   ;;  %v6067_v46 = vadd.f32 %v6066_v28, %v6065_v16  ;;  %v9983_v28 = vld [vmem:[#allocation11 + $0x10] sm:$0xff]  }
 0x322   :  { %5813 = vmatpush1.bf16.msra.mxu1 %v9912_v36  ;;  %5609 = vmatprep.subr.bf16.mxu0 %v9917_v37  ;;  %v6162_v36 = vadd.f32 %v6161_v23, %v6160_v11  ;;  %v6232_v37 = vmul.f32 %v10354_v25, %v11028_v38  ;;  %v9982_v23 = vld [vmem:[#allocation11 + $0x50] sm:$0xff]  }
 0x323   :  { %5814 = vmatprep.subr.bf16.mxu1 %v9920_v39  ;;  %v6250_v39 = vrot.slane %v11057_v26, %v11055_v13 }
 0x324   :  { %v6163_v53 = vrot.slane %v6162_v36, 1 }
 0x325   :  { %5610 = vmatpush1.bf16.msra.mxu0 %v9915_v31  ;;  %v9951_v31 = vld [vmem:[#allocation6 + $0x1820] ss:$40 sps:$4 sm:$0xff]   ;;  %v6294_v54 = vmul.f32 %v6250_v39, %v6232_v37  ;;  %v11075_v37 = vsub.s32 0, %v11052_v12  ;;  %v9992_v39 = vld [vmem:[#allocation11 + $0x60] sm:$0xff]  }
 0x326   :  { %5815 = vmatpush1.bf16.msra.mxu1 %v9918_v49  ;;  %5611 = vmatprep.subr.bf16.mxu0 %v9923_v50  ;;  %v9954_v49 = vld [vmem:[#allocation6 + $0x1828] ss:$40 sps:$4 sm:$0xff]   ;;  %v6164_v60 = vadd.f32 %v6163_v53, %v6162_v36 }
 0x327   :  { %5816 = vmatprep.subr.bf16.mxu1 %v9926_v51  ;;  %v11062_v50 = vld [vmem:[#allocation9] sm:$0xff]  ;;  %v9959_v51 = vld [vmem:[#allocation6 + $0x1874] ss:$40 sps:$4 sm:$0xff]  }
 0x328   :  { %v6312_v38 = vrot.slane %v11062_v50, %v11055_v13  ;;  %v6204_v3 = vmul.f32 0.125, %v6164_v60  ;;  %v9988_v36 = vld [vmem:[#allocation11 + $0x18] sm:$0xff]  }
 0x329   :  { %5612 = vmatpush1.bf16.msra.mxu0 %v9921_v42  ;;  %v6146_v42 = vadd.f32 %v6145_v40, %v6144_v27  ;;  %v9979_v27 = vld [vmem:[#allocation6 + $0xc0] ss:$40 sps:$4 sm:$0xff]  }
 0x32a   :  { %5817 = vmatpush1.bf16.msra.mxu1 %v9924_v55  ;;  %5613 = vmatprep.subr.bf16.mxu0 %v9929_v56  ;;  %v6113_v55 = vmul.f32 0.125, %v6067_v46  ;;  %v9957_v56 = vld [vmem:[#allocation6 + $0x1870] ss:$40 sps:$4 sm:$0xff]   ;;  %v6356_v45 = vadd.f32 %v6312_v38, %v6294_v54  ;;  %v6214_v11 = vadd.f32 1e-05, %v6204_v3  ;;  %v6257_v46 = vsub.s32 3, %v11052_v12 }
 0x32b   :  { %5818 = vmatprep.subr.bf16.mxu1 %v9932_v57  ;;  %v9960_v57 = vld [vmem:[#allocation6 + $0x1878] ss:$40 sps:$4 sm:$0xff]   ;;  %v6246_v54 = vrot.slane %v11057_v26, %v11075_v37  ;;  %v9996_v38 = vld [vmem:[#allocation6 + $0x1b4] ss:$40 sps:$4 sm:$0xff]  }
 0x32c   :  { %v6366_v4 = vmax.f32 %v6356_v45, 0.0  ;;  %v10002_v45 = vld [vmem:[#allocation11 + $0x70] sm:$0xff]   ;;  %v10006_v3 = vld [vmem:[#allocation6 + $0x254] ss:$40 sps:$4 sm:$0xff]  }
 0x32d   :  { %5614 = vmatpush1.bf16.msra.mxu0 %v9927_v61  ;;  %v6201_v61 = vmul.f32 0.125, %v6146_v42  ;;  %v9997_v42 = vld [vmem:[#allocation11 + $0x68] sm:$0xff]  }
 0x32e   :  { %5819 = vmatpush1.bf16.msra.mxu1 %v9930_v62  ;;  %5615 = vmatprep.subr.bf16.mxu0 %v9935_v63  ;;  %v11067_v62 = vsub.f32 %v11019_v43, %v6113_v55  ;;  %v9963_v63 = vld [vmem:[#allocation6 + $0x18c0] ss:$40 sps:$4 sm:$0xff]   ;;  %v9976_v43 = vld [vmem:[#allocation6 + $0x74] ss:$40 sps:$4 sm:$0xff]   ;;  %v6376_v16 = vpack.c.bf16 %v6366_v4, %v6366_v4  ;;  %v10007_v4 = vld [vmem:[#allocation11 + $0x78] sm:$0xff]  }
 0x32f   :  { %5820 = vmatprep.subr.bf16.mxu1 %v9938_v0  ;;  %v9966_v0 = vld [vmem:[#allocation6 + $0x18c8] ss:$40 sps:$4 sm:$0xff]  }
 0x331   :  { %5616 = vmatpush1.bf16.msra.mxu0 %v9933_v6  ;;  %v6211_v6 = vadd.f32 1e-05, %v6201_v61  ;;  %v6308_v61 = vrot.slane %v11062_v50, %v11075_v37 }
 0x332   :  { %5821 = vmatpush1.bf16.msra.mxu1 %v9936_v7  ;;  %5617 = vmatprep.subr.bf16.mxu0 %v9941_v8  ;;  %v6133_v7 = vmul.f32 %v11067_v62, %v11067_v62  ;;  %v9969_v8 = vld [vmem:[#allocation6 + $0x20] ss:$40 sps:$4 sm:$0xff]  }
 0x333   :  { %5822 = vmatprep.subr.bf16.mxu1 %v9944_v9  ;;  %v9973_v9 = vld [vmem:[#allocation11] sm:$0xff]   ;;  %10355 = vrsqrt.f32 %v6211_v6 }
 0x334   :  { %10357 = vrsqrt.f32 %v6214_v11  ;;  %v10011_v11 = vld [vmem:[#allocation6 + $0x2a4] ss:$40 sps:$4 sm:$0xff]  }
 0x335   :  { %5618 = vmatpush1.bf16.msra.mxu0 %v9939_v17  ;;  %v6153_v17 = vrot.slane %v6133_v7, 4 }
 0x336   :  { %5823 = vmatpush1.bf16.msra.mxu1 %v9942_v18  ;;  %5619 = vmatprep.subr.bf16.mxu0 %v9947_v19  ;;  %v9974_v18 = vld [vmem:[#allocation6 + $0x70] ss:$40 sps:$4 sm:$0xff]   ;;  %v9978_v19 = vld [vmem:[#allocation11 + $0x8] sm:$0xff]  }
 0x337   :  { %5824 = vmatprep.subr.bf16.mxu1 %v9950_v22  ;;  %v9981_v22 = vld [vmem:[#allocation6 + $0xc4] ss:$40 sps:$4 sm:$0xff]   ;;  %v6154_v25 = vadd.f32 %v6153_v17, %v6133_v7 }
 0x339   :  { %5620 = vmatpush1.bf16.msra.mxu0 %v9945_v32  ;;  %v9986_v32 = vld [vmem:[#allocation6 + $0x114] ss:$40 sps:$4 sm:$0xff]  }
 0x33a   :  { %5825 = vmatpush1.bf16.msra.mxu1 %v9948_v33  ;;  %5621 = vmatprep.subr.bf16.mxu0 %v9953_v34  ;;  %v9987_v33 = vld [vmem:[#allocation11 + $0x58] sm:$0xff]   ;;  %v6155_v34 = vrot.slane %v6154_v25, 2 }
 0x33b   :  { %5826 = vmatprep.subr.bf16.mxu1 %v9956_v21  ;;  %v9984_v21 = vld [vmem:[#allocation6 + $0x110] ss:$40 sps:$4 sm:$0xff]  }
 0x33d   :  { %5622 = vmatpush1.bf16.msra.mxu0 %v9951_v31  ;;  %v10356_v40 = vpop.eup %10355 }
 0x33e   :  { %5827 = vmatpush1.bf16.msra.mxu1 %v9954_v49  ;;  %5623 = vmatprep.subr.bf16.mxu0 %v9959_v51  ;;  %v10358_v31 = vpop.eup %10357  ;;  %v6156_v49 = vadd.f32 %v6155_v34, %v6154_v25  ;;  %v9989_v51 = vld [vmem:[#allocation6 + $0x160] ss:$40 sps:$4 sm:$0xff]   ;;  %v6231_v53 = vmul.f32 %v10356_v40, %v11041_v47  ;;  %v10001_v47 = vld [vmem:[#allocation6 + $0x204] ss:$40 sps:$4 sm:$0xff]   ;;  %v10016_v25 = vld [vmem:[#allocation6 + $0x2f4] ss:$40 sps:$4 sm:$0xff]  }
 0x33f   :  { %5828 = vmatprep.subr.bf16.mxu1 %v9962_v52  ;;  %v9993_v52 = vld [vmem:[#allocation11 + $0x20] sm:$0xff]   ;;  %v6234_v55 = vmul.f32 %v10358_v31, %v11044_v44  ;;  %v9999_v44 = vld [vmem:[#allocation6 + $0x200] ss:$40 sps:$4 sm:$0xff]   ;;  %v10021_v34 = vld [vmem:[#allocation6 + $0x344] ss:$40 sps:$4 sm:$0xff]  }
 0x340   :  { %v6293_v60 = vmul.f32 %v6246_v54, %v6231_v53  ;;  %v10027_v40 = vld [vmem:[#allocation11 + $0xd8] sm:$0xff]   ;;  %v10029_v54 = vld [vmem:[#allocation6 + $0x3e0] ss:$40 sps:$4 sm:$0xff]  }
 0x341   :  { %5624 = vmatpush1.bf16.msra.mxu0 %v9957_v56  ;;  %v6258_v56 = vrot.slane %v11057_v26, %v6257_v46  ;;  %v10028_v31 = vld [vmem:[#allocation11 + $0x98] sm:$0xff]  }
 0x342   :  { %5829 = vmatpush1.bf16.msra.mxu1 %v9960_v57  ;;  %5625 = vmatprep.subr.bf16.mxu0 %v9965_v58  ;;  %v6157_v57 = vrot.slane %v6156_v49, 1  ;;  %v9994_v58 = vld [vmem:[#allocation6 + $0x1b0] ss:$40 sps:$4 sm:$0xff]   ;;  %v6355_v6 = vadd.f32 %v6308_v61, %v6293_v60 }
 0x343   :  { %5830 = vmatprep.subr.bf16.mxu1 %v9968_v59  ;;  %v9998_v59 = vld [vmem:[#allocation11 + $0x28] sm:$0xff]  }
 0x345   :  { %5626 = vmatpush1.bf16.msra.mxu0 %v9963_v63  ;;  %v6296_v63 = vmul.f32 %v6258_v56, %v6234_v55  ;;  %v10036_v56 = vld [vmem:[#allocation6 + $0x434] ss:$40 sps:$4 sm:$0xff]  }
 0x346   :  { %5831 = vmatpush1.bf16.msra.mxu1 %v9966_v0  ;;  %5841 = vmatprep.subr.bf16.mxu0 %v9971_v1  ;;  %v6320_v0 = vrot.slane %v11062_v50, %v6257_v46  ;;  %v6158_v1 = vadd.f32 %v6157_v57, %v6156_v49  ;;  %v10024_v46 = vld [vmem:[#allocation6 + $0x390] ss:$40 sps:$4 sm:$0xff]   ;;  %v6253_v49 = vsub.s32 2, %v11052_v12  ;;  %v10037_v57 = vld [vmem:[#allocation11 + $0xe8] sm:$0xff]  }
 0x347   :  { %8767 = vmatprep.subr.bf16.mxu1 %v9972_v2  ;;  %v10003_v2 = vld [vmem:[#allocation11 + $0x30] sm:$0xff]  }
 0x348   :  { %5628 = vmatmul.mubr.bf16.vlgmr.msra.gmra.mrb[4].mxu0 %v10999_v41  ;;  %v6358_v7 = vadd.f32 %v6320_v0, %v6296_v63  ;;  %v6254_v55 = vrot.slane %v11057_v26, %v6253_v49  ;;  %v6316_v61 = vrot.slane %v11062_v50, %v6253_v49  ;;  %v10043_v63 = vld [vmem:[#allocation11 + $0xb0] sm:$0xff]   ;;  %v10046_v26 = vld [vmem:[#allocation6 + $0x4d4] ss:$40 sps:$4 sm:$0xff]   ;;  %v10047_v0 = vld [vmem:[#allocation11 + $0xf8] sm:$0xff]  }
 0x349   :  { %5833 = vmatmul.mubr.bf16.vlgmr.msra.gmra.mrb[4].mxu1 %v10999_v41  ;;  %5842 = vmatpush1.bf16.msra.mxu0 %v9969_v8  ;;  %v6203_v8 = vmul.f32 0.125, %v6158_v1  ;;  %v10049_v50 = vld [vmem:[#allocation6 + $0x520] ss:$40 sps:$4 sm:$0xff]  }
 0x34a   :  { %8768 = vmatpush3.bf16.msra.mxu1 %v9973_v9  ;;  %7057 = vmatprep.mubr.bf16.mxu1 %v6376_v16  ;;  %v10004_v9 = vld [vmem:[#allocation6 + $0x250] ss:$40 sps:$4 sm:$0xff]   ;;  %v6368_v17 = vmax.f32 %v6358_v7, 0.0  ;;  %v10054_v7 = vld [vmem:[#allocation6 + $0x574] ss:$40 sps:$4 sm:$0xff]  }
 0x34b   :  { %5843 = vmatprep.subr.bf16.mxu0 %v9976_v43  ;;  %8769 = vmatprep.subr.bf16.mxu1 %v9977_v14  ;;  %v10008_v43 = vld [vmem:[#allocation11 + $0x38] sm:$0xff]   ;;  %v6365_v14 = vmax.f32 %v6355_v6, 0.0  ;;  %v10012_v16 = vld [vmem:[#allocation11 + $0xc0] sm:$0xff]   ;;  %v10186_v49 = vld [vmem:[#allocation11 + $0x148] sm:$0xff]  }
 0x34c   :  { %5873 = vmatprep.mubr.bf16.mxu0 %v10927_v48  ;;  %v9991_v48 = vld [vmem:[#allocation6 + $0x164] ss:$40 sps:$4 sm:$0xff]  }
 0x34d   :  { %5844 = vmatpush1.bf16.msra.mxu0 %v9974_v18  ;;  %v6213_v18 = vadd.f32 1e-05, %v6203_v8  ;;  %v10052_v8 = vld [vmem:[#allocation6 + $0x570] ss:$40 sps:$4 sm:$0xff]  }
 0x34e   :  { %8770 = vmatpush3.bf16.msra.mxu1 %v9978_v19  ;;  %5845 = vmatprep.subr.bf16.mxu0 %v9981_v22  ;;  %v10009_v19 = vld [vmem:[#allocation6 + $0x2a0] ss:$40 sps:$4 sm:$0xff]   ;;  %v10013_v22 = vld [vmem:[#allocation11 + $0x80] sm:$0xff]  }
 0x34f   :  { %8771 = vmatprep.subr.bf16.mxu1 %v9982_v23  ;;  %v6375_v23 = vpack.c.bf16 %v6365_v14, %v6365_v14  ;;  %10359 = vrsqrt.f32 %v6213_v18  ;;  %v10058_v14 = vld [vmem:[#allocation6 + $0x610] ss:$40 sps:$4 sm:$0xff]   ;;  %v10066_v18 = vld [vmem:[#allocation6 + $0x6b4] ss:$40 sps:$4 sm:$0xff]  }
 0x351   :  { %5846 = vmatpush1.bf16.msra.mxu0 %v9979_v27  ;;  %v10017_v27 = vld [vmem:[#allocation11 + $0xc8] sm:$0xff]  }
 0x352   :  { %8772 = vmatpush3.bf16.msra.mxu1 %v9983_v28  ;;  %5847 = vmatprep.subr.bf16.mxu0 %v9986_v32  ;;  %v6378_v28 = vpack.c.bf16 %v6368_v17, %v6368_v17  ;;  %v10014_v32 = vld [vmem:[#allocation6 + $0x2f0] ss:$40 sps:$4 sm:$0xff]   ;;  %v10061_v17 = vld [vmem:[#allocation6 + $0x660] ss:$40 sps:$4 sm:$0xff]  }
 0x353   :  { %8773 = vmatprep.subr.bf16.mxu1 %v9987_v33  ;;  %v10018_v33 = vld [vmem:[#allocation11 + $0x88] sm:$0xff]  }
 0x355   :  { %5848 = vmatpush1.bf16.msra.mxu0 %v9984_v21  ;;  %v10022_v21 = vld [vmem:[#allocation11 + $0xd0] sm:$0xff]  }
 0x356   :  { %8774 = vmatpush3.bf16.msra.mxu1 %v9988_v36  ;;  %5849 = vmatprep.subr.bf16.mxu0 %v9991_v48  ;;  %v10019_v36 = vld [vmem:[#allocation6 + $0x340] ss:$40 sps:$4 sm:$0xff]  }
 0x357   :  { %8775 = vmatprep.subr.bf16.mxu1 %v9992_v39  ;;  %v10023_v48 = vld [vmem:[#allocation11 + $0x90] sm:$0xff]   ;;  %v10026_v39 = vld [vmem:[#allocation6 + $0x394] ss:$40 sps:$4 sm:$0xff]  }
 0x359   :  { %5850 = vmatpush1.bf16.msra.mxu0 %v9989_v51  ;;  %v10031_v51 = vld [vmem:[#allocation6 + $0x3e4] ss:$40 sps:$4 sm:$0xff]   ;;  %v10360_v53 = vpop.eup %10359 }
 0x35a   :  { %8776 = vmatpush3.bf16.msra.mxu1 %v9993_v52  ;;  %5851 = vmatprep.subr.bf16.mxu0 %v9996_v38  ;;  %v10032_v52 = vld [vmem:[#allocation11 + $0xe0] sm:$0xff]  }
 0x35b   :  { %8777 = vmatprep.subr.bf16.mxu1 %v9997_v42  ;;  %v10033_v38 = vld [vmem:[#allocation11 + $0xa0] sm:$0xff]   ;;  %v6233_v42 = vmul.f32 %v10360_v53, %v11067_v62  ;;  %v10039_v62 = vld [vmem:[#allocation6 + $0x480] ss:$40 sps:$4 sm:$0xff]   ;;  %v10093_v53 = vld [vmem:[#allocation6 + $0x984] ss:$40 sps:$4 sm:$0xff]  }
 0x35d   :  { %5852 = vmatpush1.bf16.msra.mxu0 %v9994_v58  ;;  %v10034_v58 = vld [vmem:[#allocation6 + $0x430] ss:$40 sps:$4 sm:$0xff]   ;;  %v6295_v60 = vmul.f32 %v6254_v55, %v6233_v42  ;;  %v10192_v42 = vld [vmem:[#allocation11 + $0x110] sm:$0xff]   ;;  %v10096_v55 = vld [vmem:[#allocation6 + $0x9d4] ss:$40 sps:$4 sm:$0xff]  }
 0x35e   :  { %8778 = vmatpush3.bf16.msra.mxu1 %v9998_v59  ;;  %5853 = vmatprep.subr.bf16.mxu0 %v10001_v47  ;;  %v10038_v59 = vld [vmem:[#allocation11 + $0xa8] sm:$0xff]   ;;  %v10041_v47 = vld [vmem:[#allocation6 + $0x484] ss:$40 sps:$4 sm:$0xff]  }
 0x35f   :  { %8779 = vmatprep.subr.bf16.mxu1 %v10002_v45  ;;  %v10042_v45 = vld [vmem:[#allocation11 + $0xf0] sm:$0xff]   ;;  %v6357_v1 = vadd.f32 %v6316_v61, %v6295_v60  ;;  %v10201_v60 = vld [vmem:[#allocation11 + $0x160] sm:$0xff]  }
 0x360   :  { %v10102_v61 = vld [vmem:[#allocation6 + $0xa74] ss:$40 sps:$4 sm:$0xff]  }
 0x361   :  { %5854 = vmatpush1.bf16.msra.mxu0 %v9999_v44  ;;  %v10044_v44 = vld [vmem:[#allocation6 + $0x4d0] ss:$40 sps:$4 sm:$0xff]  }
 0x362   :  { %8780 = vmatpush3.bf16.msra.mxu1 %v10003_v2  ;;  %5855 = vmatprep.subr.bf16.mxu0 %v10006_v3  ;;  %v10048_v2 = vld [vmem:[#allocation11 + $0xb8] sm:$0xff]  }
 0x363   :  { %8781 = vmatprep.subr.bf16.mxu1 %v10007_v4  ;;  %v10051_v3 = vld [vmem:[#allocation6 + $0x524] ss:$40 sps:$4 sm:$0xff]   ;;  %v6367_v4 = vmax.f32 %v6357_v1, 0.0 }
 0x364   :  { %v10211_v1 = vld [vmem:[#allocation11 + $0x170] sm:$0xff]  }
 0x365   :  { %5856 = vmatpush1.bf16.msra.mxu0 %v10004_v9  ;;  %v6377_v6 = vpack.c.bf16 %v6367_v4, %v6367_v4  ;;  %v10057_v9 = vld [vmem:[#allocation6 + $0x5c4] ss:$40 sps:$4 sm:$0xff]  }
 0x366   :  { %8782 = vmatpush3.bf16.msra.mxu1 %v10008_v43  ;;  %5857 = vmatprep.subr.bf16.mxu0 %v10011_v11  ;;  %v10055_v43 = vld [vmem:[#allocation6 + $0x5c0] ss:$40 sps:$4 sm:$0xff]   ;;  %v10060_v11 = vld [vmem:[#allocation6 + $0x614] ss:$40 sps:$4 sm:$0xff]   ;;  %v10216_v4 = vld [vmem:[#allocation11 + $0x178] sm:$0xff]  }
 0x367   :  { %8789 = vmatprep.subr.bf16.mxu1 %v10012_v16  ;;  %v10063_v16 = vld [vmem:[#allocation6 + $0x664] ss:$40 sps:$4 sm:$0xff]  }
 0x369   :  { %7058 = vmatmul.mubr.bf16.vlgmr.msra.gmra.mrb[8].mxu1 %v6375_v23  ;;  %5858 = vmatpush1.bf16.msra.mxu0 %v10009_v19  ;;  %v10069_v19 = vld [vmem:[#allocation6 + $0x704] ss:$40 sps:$4 sm:$0xff]   ;;  %v10070_v23 = vld [vmem:[#allocation6 + $0x750] ss:$40 sps:$4 sm:$0xff]  }
 0x36a   :  { %8790 = vmatpush3.bf16.msra.mxu1 %v10013_v22  ;;  %7097 = vmatprep.mubr.bf16.mxu1 %v6378_v28  ;;  %v10072_v22 = vld [vmem:[#allocation6 + $0x754] ss:$40 sps:$4 sm:$0xff]  }
 0x36b   :  { %5859 = vmatprep.subr.bf16.mxu0 %v10016_v25  ;;  %8791 = vmatprep.subr.bf16.mxu1 %v10017_v27  ;;  %v10075_v25 = vld [vmem:[#allocation6 + $0x7a4] ss:$40 sps:$4 sm:$0xff]   ;;  %v10073_v27 = vld [vmem:[#allocation6 + $0x7a0] ss:$40 sps:$4 sm:$0xff]   ;;  %v10078_v28 = vld [vmem:[#allocation6 + $0x7f4] ss:$40 sps:$4 sm:$0xff]  }
 0x36d   :  { %5860 = vmatpush1.bf16.msra.mxu0 %v10014_v32  ;;  %v10076_v32 = vld [vmem:[#allocation6 + $0x7f0] ss:$40 sps:$4 sm:$0xff]  }
 0x36e   :  { %8792 = vmatpush3.bf16.msra.mxu1 %v10018_v33  ;;  %5861 = vmatprep.subr.bf16.mxu0 %v10021_v34  ;;  %v10081_v33 = vld [vmem:[#allocation6 + $0x844] ss:$40 sps:$4 sm:$0xff]   ;;  %v10079_v34 = vld [vmem:[#allocation6 + $0x840] ss:$40 sps:$4 sm:$0xff]  }
 0x36f   :  { %8793 = vmatprep.subr.bf16.mxu1 %v10022_v21  ;;  %v10084_v21 = vld [vmem:[#allocation6 + $0x894] ss:$40 sps:$4 sm:$0xff]  }
 0x371   :  { %5862 = vmatpush1.bf16.msra.mxu0 %v10019_v36  ;;  %v10082_v36 = vld [vmem:[#allocation6 + $0x890] ss:$40 sps:$4 sm:$0xff]  }
 0x372   :  { %8794 = vmatpush3.bf16.msra.mxu1 %v10023_v48  ;;  %5863 = vmatprep.subr.bf16.mxu0 %v10026_v39  ;;  %v10087_v48 = vld [vmem:[#allocation6 + $0x8e4] ss:$40 sps:$4 sm:$0xff]   ;;  %v10181_v39 = vld [vmem:[#allocation11 + $0x140] sm:$0xff]  }
 0x373   :  { %8795 = vmatprep.subr.bf16.mxu1 %v10027_v40  ;;  %v10085_v40 = vld [vmem:[#allocation6 + $0x8e0] ss:$40 sps:$4 sm:$0xff]  }
 0x375   :  { %5864 = vmatpush1.bf16.msra.mxu0 %v10024_v46  ;;  %v10182_v46 = vld [vmem:[#allocation11 + $0x100] sm:$0xff]  }
 0x376   :  { %8796 = vmatpush3.bf16.msra.mxu1 %v10028_v31  ;;  %5865 = vmatprep.subr.bf16.mxu0 %v10031_v51  ;;  %v10090_v31 = vld [vmem:[#allocation6 + $0x934] ss:$40 sps:$4 sm:$0xff]   ;;  %v10088_v51 = vld [vmem:[#allocation6 + $0x930] ss:$40 sps:$4 sm:$0xff]  }
 0x377   :  { %8797 = vmatprep.subr.bf16.mxu1 %v10032_v52  ;;  %v10187_v52 = vld [vmem:[#allocation11 + $0x108] sm:$0xff]  }
 0x379   :  { %5866 = vmatpush1.bf16.msra.mxu0 %v10029_v54  ;;  %v10191_v54 = vld [vmem:[#allocation11 + $0x150] sm:$0xff]  }
 0x37a   :  { %8798 = vmatpush3.bf16.msra.mxu1 %v10033_v38  ;;  %5867 = vmatprep.subr.bf16.mxu0 %v10036_v56  ;;  %v10091_v38 = vld [vmem:[#allocation6 + $0x980] ss:$40 sps:$4 sm:$0xff]   ;;  %v10196_v56 = vld [vmem:[#allocation11 + $0x158] sm:$0xff]  }
 0x37b   :  { %8799 = vmatprep.subr.bf16.mxu1 %v10037_v57  ;;  %v10094_v57 = vld [vmem:[#allocation6 + $0x9d0] ss:$40 sps:$4 sm:$0xff]  }
 0x37d   :  { %5868 = vmatpush1.bf16.msra.mxu0 %v10034_v58  ;;  %v10197_v58 = vld [vmem:[#allocation11 + $0x118] sm:$0xff]  }
 0x37e   :  { %8800 = vmatpush3.bf16.msra.mxu1 %v10038_v59  ;;  %5869 = vmatprep.subr.bf16.mxu0 %v10041_v47  ;;  %v10099_v59 = vld [vmem:[#allocation6 + $0xa24] ss:$40 sps:$4 sm:$0xff]   ;;  %v10097_v47 = vld [vmem:[#allocation6 + $0xa20] ss:$40 sps:$4 sm:$0xff]  }
 0x37f   :  { %8801 = vmatprep.subr.bf16.mxu1 %v10042_v45  ;;  %v10202_v45 = vld [vmem:[#allocation11 + $0x120] sm:$0xff]  }
 0x381   :  { %5870 = vmatpush1.bf16.msra.mxu0 %v10039_v62  ;;  %v10206_v62 = vld [vmem:[#allocation11 + $0x168] sm:$0xff]  }
 0x382   :  { %8802 = vmatpush3.bf16.msra.mxu1 %v10043_v63  ;;  %5871 = vmatprep.subr.bf16.mxu0 %v10046_v26  ;;  %v10100_v63 = vld [vmem:[#allocation6 + $0xa70] ss:$40 sps:$4 sm:$0xff]   ;;  %v10207_v26 = vld [vmem:[#allocation11 + $0x128] sm:$0xff]  }
 0x383   :  { %8803 = vmatprep.subr.bf16.mxu1 %v10047_v0  ;;  %v10105_v0 = vld [vmem:[#allocation6 + $0xac4] ss:$40 sps:$4 sm:$0xff]  }
 0x385   :  { %5872 = vmatpush1.bf16.msra.mxu0 %v10044_v44  ;;  %v10103_v44 = vld [vmem:[#allocation6 + $0xac0] ss:$40 sps:$4 sm:$0xff]  }
 0x386   :  { %8804 = vmatpush3.bf16.msra.mxu1 %v10048_v2  ;;  %5882 = vmatprep.subr.bf16.mxu0 %v10051_v3  ;;  %v10212_v2 = vld [vmem:[#allocation11 + $0x130] sm:$0xff]   ;;  %v10108_v3 = vld [vmem:[#allocation6 + $0xb14] ss:$40 sps:$4 sm:$0xff]  }
 0x387   :  { %8811 = vmatprep.subr.bf16.mxu1 %v10181_v39  ;;  %v10147_v39 = vld [vmem:[#allocation6 + $0xf24] ss:$40 sps:$4 sm:$0xff]  }
 0x388   :  { %5874 = vmatmul.mubr.bf16.vlgmr.msra.gmra.mrb[8].mxu0 %v10931_v5  ;;  %v10064_v5 = vld [vmem:[#allocation6 + $0x6b0] ss:$40 sps:$4 sm:$0xff]  }
 0x389   :  { %7098 = vmatmul.mubr.bf16.vlgmr.msra.gmra.mrb[12].mxu1 %v6377_v6  ;;  %5883 = vmatpush1.bf16.msra.mxu0 %v10049_v50  ;;  %v10217_v50 = vld [vmem:[#allocation11 + $0x138] sm:$0xff]   ;;  %v10221_v6 = vld [vmem:[#allocation11 + $0x1c0] sm:$0xff]  }
 0x38a   :  { %5914 = vmatprep.mubr.bf16.mxu0 %v10942_v30  ;;  %5884 = vmatprep.subr.bf16.mxu0 %v10054_v7  ;;  %v10067_v30 = vld [vmem:[#allocation6 + $0x700] ss:$40 sps:$4 sm:$0xff]  }
 0x38b   :  { %8812 = vmatpush3.bf16.msra.mxu1 %v10182_v46  ;;  %v10109_v7 = vld [vmem:[#allocation6 + $0xb60] ss:$40 sps:$4 sm:$0xff]   ;;  %v10150_v46 = vld [vmem:[#allocation6 + $0xf74] ss:$40 sps:$4 sm:$0xff]  }
 0x38c   :  { %8813 = vmatprep.subr.bf16.mxu1 %v10186_v49  ;;  %v10153_v49 = vld [vmem:[#allocation6 + $0xfc4] ss:$40 sps:$4 sm:$0xff]  }
 0x38d   :  { %5885 = vmatpush1.bf16.msra.mxu0 %v10052_v8  ;;  %v10114_v8 = vld [vmem:[#allocation6 + $0xbb4] ss:$40 sps:$4 sm:$0xff]  }
 0x38e   :  { %5886 = vmatprep.subr.bf16.mxu0 %v10057_v9  ;;  %v10112_v9 = vld [vmem:[#allocation6 + $0xbb0] ss:$40 sps:$4 sm:$0xff]  }
 0x38f   :  { %8814 = vmatpush3.bf16.msra.mxu1 %v10187_v52  ;;  %v10156_v52 = vld [vmem:[#allocation6 + $0x1014] ss:$40 sps:$4 sm:$0xff]  }
 0x390   :  { %8815 = vmatprep.subr.bf16.mxu1 %v10191_v54  ;;  %v10159_v54 = vld [vmem:[#allocation6 + $0x1064] ss:$40 sps:$4 sm:$0xff]  }
 0x391   :  { %5887 = vmatpush1.bf16.msra.mxu0 %v10055_v43  ;;  %v10117_v43 = vld [vmem:[#allocation6 + $0xc04] ss:$40 sps:$4 sm:$0xff]  }
 0x392   :  { %5888 = vmatprep.subr.bf16.mxu0 %v10060_v11  ;;  %v10115_v11 = vld [vmem:[#allocation6 + $0xc00] ss:$40 sps:$4 sm:$0xff]  }
 0x393   :  { %8816 = vmatpush3.bf16.msra.mxu1 %v10192_v42  ;;  %v10162_v42 = vld [vmem:[#allocation6 + $0x10b4] ss:$40 sps:$4 sm:$0xff]  }
 0x394   :  { %8817 = vmatprep.subr.bf16.mxu1 %v10196_v56 }
 0x395   :  { %5889 = vmatpush1.bf16.msra.mxu0 %v10058_v14  ;;  %v10120_v14 = vld [vmem:[#allocation6 + $0xc54] ss:$40 sps:$4 sm:$0xff]  }
 0x396   :  { %5890 = vmatprep.subr.bf16.mxu0 %v10063_v16  ;;  %v10118_v16 = vld [vmem:[#allocation6 + $0xc50] ss:$40 sps:$4 sm:$0xff]  }
 0x397   :  { %8818 = vmatpush3.bf16.msra.mxu1 %v10197_v58 }
 0x398   :  { %8819 = vmatprep.subr.bf16.mxu1 %v10201_v60 }
 0x399   :  { %5891 = vmatpush1.bf16.msra.mxu0 %v10061_v17  ;;  %v10123_v17 = vld [vmem:[#allocation6 + $0xca4] ss:$40 sps:$4 sm:$0xff]  }
 0x39a   :  { %5892 = vmatprep.subr.bf16.mxu0 %v10066_v18  ;;  %v10121_v18 = vld [vmem:[#allocation6 + $0xca0] ss:$40 sps:$4 sm:$0xff]  }
 0x39b   :  { %8820 = vmatpush3.bf16.msra.mxu1 %v10202_v45 }
 0x39c   :  { %8821 = vmatprep.subr.bf16.mxu1 %v10206_v62  ;;  %v10163_v62 = vld [vmem:[#allocation6 + $0x1100] ss:$40 sps:$4 sm:$0xff]  }
 0x39d   :  { %5893 = vmatpush1.bf16.msra.mxu0 %v10064_v5  ;;  %v10126_v5 = vld [vmem:[#allocation6 + $0xcf4] ss:$40 sps:$4 sm:$0xff]  }
 0x39e   :  { %5894 = vmatprep.subr.bf16.mxu0 %v10069_v19  ;;  %v10124_v19 = vld [vmem:[#allocation6 + $0xcf0] ss:$40 sps:$4 sm:$0xff]  }
 0x39f   :  { %8822 = vmatpush3.bf16.msra.mxu1 %v10207_v26 }
 0x3a0   :  { %8823 = vmatprep.subr.bf16.mxu1 %v10211_v1 }
 0x3a1   :  { %5895 = vmatpush1.bf16.msra.mxu0 %v10067_v30  ;;  %v10129_v30 = vld [vmem:[#allocation6 + $0xd44] ss:$40 sps:$4 sm:$0xff]  }
 0x3a2   :  { %5896 = vmatprep.subr.bf16.mxu0 %v10072_v22  ;;  %v10127_v22 = vld [vmem:[#allocation6 + $0xd40] ss:$40 sps:$4 sm:$0xff]  }
 0x3a3   :  { %8824 = vmatpush3.bf16.msra.mxu1 %v10212_v2 }
 0x3a4   :  { %8825 = vmatprep.subr.bf16.mxu1 %v10216_v4 }
 0x3a5   :  { %5897 = vmatpush1.bf16.msra.mxu0 %v10070_v23  ;;  %v10132_v23 = vld [vmem:[#allocation6 + $0xd94] ss:$40 sps:$4 sm:$0xff]  }
 0x3a6   :  { %5898 = vmatprep.subr.bf16.mxu0 %v10075_v25  ;;  %v10130_v25 = vld [vmem:[#allocation6 + $0xd90] ss:$40 sps:$4 sm:$0xff]  }
 0x3a7   :  { %8826 = vmatpush3.bf16.msra.mxu1 %v10217_v50 }
 0x3a8   :  { %8833 = vmatprep.subr.bf16.mxu1 %v10221_v6 }
 0x3a9   :  { %5899 = vmatpush1.bf16.msra.mxu0 %v10073_v27  ;;  %v10135_v27 = vld [vmem:[#allocation6 + $0xde4] ss:$40 sps:$4 sm:$0xff]  }
 0x3aa   :  { %5900 = vmatprep.subr.bf16.mxu0 %v10078_v28  ;;  %v10133_v28 = vld [vmem:[#allocation6 + $0xde0] ss:$40 sps:$4 sm:$0xff]  }
 0x3ad   :  { %5901 = vmatpush1.bf16.msra.mxu0 %v10076_v32  ;;  %v10138_v32 = vld [vmem:[#allocation6 + $0xe34] ss:$40 sps:$4 sm:$0xff]  }
 0x3ae   :  { %5902 = vmatprep.subr.bf16.mxu0 %v10081_v33  ;;  %v10136_v33 = vld [vmem:[#allocation6 + $0xe30] ss:$40 sps:$4 sm:$0xff]  }
 0x3b1   :  { %5903 = vmatpush1.bf16.msra.mxu0 %v10079_v34  ;;  %v10141_v34 = vld [vmem:[#allocation6 + $0xe84] ss:$40 sps:$4 sm:$0xff]  }
 0x3b2   :  { %5904 = vmatprep.subr.bf16.mxu0 %v10084_v21  ;;  %v10139_v21 = vld [vmem:[#allocation6 + $0xe80] ss:$40 sps:$4 sm:$0xff]  }
 0x3b5   :  { %5905 = vmatpush1.bf16.msra.mxu0 %v10082_v36  ;;  %v10144_v36 = vld [vmem:[#allocation6 + $0xed4] ss:$40 sps:$4 sm:$0xff]  }
 0x3b6   :  { %5906 = vmatprep.subr.bf16.mxu0 %v10087_v48  ;;  %v10142_v48 = vld [vmem:[#allocation6 + $0xed0] ss:$40 sps:$4 sm:$0xff]  }
 0x3b9   :  { %5907 = vmatpush1.bf16.msra.mxu0 %v10085_v40  ;;  %v10145_v40 = vld [vmem:[#allocation6 + $0xf20] ss:$40 sps:$4 sm:$0xff]  }
 0x3ba   :  { %5908 = vmatprep.subr.bf16.mxu0 %v10090_v31  ;;  %v10148_v31 = vld [vmem:[#allocation6 + $0xf70] ss:$40 sps:$4 sm:$0xff]  }
 0x3bd   :  { %5909 = vmatpush1.bf16.msra.mxu0 %v10088_v51  ;;  %v10151_v51 = vld [vmem:[#allocation6 + $0xfc0] ss:$40 sps:$4 sm:$0xff]  }
 0x3be   :  { %5910 = vmatprep.subr.bf16.mxu0 %v10093_v53  ;;  %v10154_v53 = vld [vmem:[#allocation6 + $0x1010] ss:$40 sps:$4 sm:$0xff]  }
 0x3c1   :  { %5911 = vmatpush1.bf16.msra.mxu0 %v10091_v38  ;;  %v10157_v38 = vld [vmem:[#allocation6 + $0x1060] ss:$40 sps:$4 sm:$0xff]  }
 0x3c2   :  { %5912 = vmatprep.subr.bf16.mxu0 %v10096_v55  ;;  %v10165_v55 = vld [vmem:[#allocation6 + $0x1104] ss:$40 sps:$4 sm:$0xff]  }
 0x3c5   :  { %5913 = vmatpush1.bf16.msra.mxu0 %v10094_v57 }
 0x3c6   :  { %5923 = vmatprep.subr.bf16.mxu0 %v10099_v59 }
 0x3c8   :  { %5915 = vmatmul.mubr.bf16.vlgmr.msra.gmra.mrb[8].mxu0 %v10948_v10  ;;  %v10106_v10 = vld [vmem:[#allocation6 + $0xb10] ss:$40 sps:$4 sm:$0xff]  }
 0x3c9   :  { %5924 = vmatpush1.bf16.msra.mxu0 %v10097_v47  ;;  %5955 = vmatprep.mubr.bf16.mxu0 %v10957_v15  ;;  %v10111_v15 = vld [vmem:[#allocation6 + $0xb64] ss:$40 sps:$4 sm:$0xff]  }
 0x3ca   :  { %5925 = vmatprep.subr.bf16.mxu0 %v10102_v61 }
 0x3cd   :  { %5926 = vmatpush1.bf16.msra.mxu0 %v10100_v63 }
 0x3ce   :  { %5927 = vmatprep.subr.bf16.mxu0 %v10105_v0 }
 0x3d1   :  { %5928 = vmatpush1.bf16.msra.mxu0 %v10103_v44  ;;  %v10168_v44 = vld [vmem:[#allocation6 + $0x1154] ss:$40 sps:$4 sm:$0xff]  }
 0x3d2   :  { %5929 = vmatprep.subr.bf16.mxu0 %v10108_v3 }
 0x3d5   :  { %5930 = vmatpush1.bf16.msra.mxu0 %v10106_v10 }
 0x3d6   :  { %5931 = vmatprep.subr.bf16.mxu0 %v10111_v15 }
 0x3d9   :  { %5932 = vmatpush1.bf16.msra.mxu0 %v10109_v7  ;;  %v10166_v7 = vld [vmem:[#allocation6 + $0x1150] ss:$40 sps:$4 sm:$0xff]  }
 0x3da   :  { %5933 = vmatprep.subr.bf16.mxu0 %v10114_v8 }
 0x3dd   :  { %5934 = vmatpush1.bf16.msra.mxu0 %v10112_v9 }
 0x3de   :  { %5935 = vmatprep.subr.bf16.mxu0 %v10117_v43  ;;  %v10171_v43 = vld [vmem:[#allocation6 + $0x11a4] ss:$40 sps:$4 sm:$0xff]  }
 0x3e1   :  { %5936 = vmatpush1.bf16.msra.mxu0 %v10115_v11 }
 0x3e2   :  { %5937 = vmatprep.subr.bf16.mxu0 %v10120_v14 }
 0x3e5   :  { %5938 = vmatpush1.bf16.msra.mxu0 %v10118_v16 }
 0x3e6   :  { %5939 = vmatprep.subr.bf16.mxu0 %v10123_v17 }
 0x3e9   :  { %5940 = vmatpush1.bf16.msra.mxu0 %v10121_v18 }
 0x3ea   :  { %5941 = vmatprep.subr.bf16.mxu0 %v10126_v5 }
 0x3ed   :  { %5942 = vmatpush1.bf16.msra.mxu0 %v10124_v19  ;;  %v10169_v19 = vld [vmem:[#allocation6 + $0x11a0] ss:$40 sps:$4 sm:$0xff]  }
 0x3ee   :  { %5943 = vmatprep.subr.bf16.mxu0 %v10129_v30 }
 0x3f1   :  { %5944 = vmatpush1.bf16.msra.mxu0 %v10127_v22  ;;  %v10174_v22 = vld [vmem:[#allocation6 + $0x11f4] ss:$40 sps:$4 sm:$0xff]  }
 0x3f2   :  { %5945 = vmatprep.subr.bf16.mxu0 %v10132_v23 }
 0x3f5   :  { %5946 = vmatpush1.bf16.msra.mxu0 %v10130_v25 }
 0x3f6   :  { %5947 = vmatprep.subr.bf16.mxu0 %v10135_v27 }
 0x3f9   :  { %5948 = vmatpush1.bf16.msra.mxu0 %v10133_v28 }
 0x3fa   :  { %5949 = vmatprep.subr.bf16.mxu0 %v10138_v32 }
 0x3fd   :  { %5950 = vmatpush1.bf16.msra.mxu0 %v10136_v33 }
 0x3fe   :  { %5951 = vmatprep.subr.bf16.mxu0 %v10141_v34  ;;  %v10172_v34 = vld [vmem:[#allocation6 + $0x11f0] ss:$40 sps:$4 sm:$0xff]  }
 0x401   :  { %5952 = vmatpush1.bf16.msra.mxu0 %v10139_v21 }
 0x402   :  { %5953 = vmatprep.subr.bf16.mxu0 %v10144_v36  ;;  %v10177_v36 = vld [vmem:[#allocation6 + $0x1244] ss:$40 sps:$4 sm:$0xff]  }
 0x405   :  { %5954 = vmatpush1.bf16.msra.mxu0 %v10142_v48 }
 0x406   :  { %5964 = vmatprep.subr.bf16.mxu0 %v10147_v39 }
 0x408   :  { %5956 = vmatmul.mubr.bf16.vlgmr.msra.gmra.mrb[8].mxu0 %v10965_v20  ;;  %v10160_v20 = vld [vmem:[#allocation6 + $0x10b0] ss:$40 sps:$4 sm:$0xff]  }
 0x409   :  { %5965 = vmatpush1.bf16.msra.mxu0 %v10145_v40  ;;  %5996 = vmatprep.mubr.bf16.mxu0 %v10974_v24 }
 0x40a   :  { %5966 = vmatprep.subr.bf16.mxu0 %v10150_v46 }
 0x40d   :  { %5967 = vmatpush1.bf16.msra.mxu0 %v10148_v31 }
 0x40e   :  { %5968 = vmatprep.subr.bf16.mxu0 %v10153_v49 }
 0x411   :  { %5969 = vmatpush1.bf16.msra.mxu0 %v10151_v51  ;;  %v10175_v51 = vld [vmem:[#allocation6 + $0x1240] ss:$40 sps:$4 sm:$0xff]  }
 0x412   :  { %5970 = vmatprep.subr.bf16.mxu0 %v10156_v52 }
 0x415   :  { %5971 = vmatpush1.bf16.msra.mxu0 %v10154_v53  ;;  %v10180_v53 = vld [vmem:[#allocation6 + $0x1294] ss:$40 sps:$4 sm:$0xff]  }
 0x416   :  { %5972 = vmatprep.subr.bf16.mxu0 %v10159_v54 }
 0x419   :  { %5973 = vmatpush1.bf16.msra.mxu0 %v10157_v38 }
 0x41a   :  { %5974 = vmatprep.subr.bf16.mxu0 %v10162_v42 }
 0x41b   :  { %v5629_v56 = vpop.f32.mrb[4].mxu0 }
 0x41c   :  { %v5834_v24 = vpop.f32.mrb[4].mxu1  ;;  %v6074_v57 = vrot.slane %v5629_v56, 4  ;;  %v5631_v59 = vpop.f32.mrb[5].mxu0 }
 0x41d   :  { %v6086_v58 = vrot.slane %v5834_v24, 4  ;;  %v5836_v60 = vpop.f32.mrb[5].mxu1  ;;  %v6080_v47 = vrot.slane %v5631_v59, 4  ;;  %v5633_v61 = vpop.f32.mrb[6].mxu0  ;;  %5975 = vmatpush1.bf16.msra.mxu0 %v10160_v20 }
 0x41e   :  { %v6092_v45 = vrot.slane %v5836_v60, 4  ;;  %v5838_v63 = vpop.f32.mrb[6].mxu1  ;;  %v6075_v26 = vadd.f32 %v6074_v57, %v5629_v56  ;;  %v5634_v1 = vpop.f32.mrb[7].mxu0  ;;  %5976 = vmatprep.subr.bf16.mxu0 %v10165_v55  ;;  %v10178_v57 = vld [vmem:[#allocation6 + $0x1290] ss:$40 sps:$4 sm:$0xff]  }
 0x41f   :  { %v6087_v0 = vadd.f32 %v6086_v58, %v5834_v24  ;;  %v5839_v2 = vpop.f32.mrb[7].mxu1  ;;  %v6081_v3 = vadd.f32 %v6080_v47, %v5631_v59 }
 0x420   :  { %v6093_v4 = vadd.f32 %v6092_v45, %v5836_v60  ;;  %v6076_v10 = vrot.slane %v6075_v26, 2 }
 0x421   :  { %v6088_v50 = vrot.slane %v6087_v0, 2  ;;  %v6082_v15 = vrot.slane %v6081_v3, 2  ;;  %5977 = vmatpush1.bf16.msra.mxu0 %v10163_v62 }
 0x422   :  { %v6094_v6 = vrot.slane %v6093_v4, 2  ;;  %v6077_v8 = vadd.f32 %v6076_v10, %v6075_v26  ;;  %5978 = vmatprep.subr.bf16.mxu0 %v10168_v44 }
 0x423   :  { %v6089_v9 = vadd.f32 %v6088_v50, %v6087_v0  ;;  %v6083_v11 = vadd.f32 %v6082_v15, %v6081_v3  ;;  %v10190_v0 = vld [vmem:[#allocation6 + $0x1334] ss:$40 sps:$4 sm:$0xff]   ;;  %v10188_v50 = vld [vmem:[#allocation6 + $0x1330] ss:$40 sps:$4 sm:$0xff]  }
 0x424   :  { %v6095_v14 = vadd.f32 %v6094_v6, %v6093_v4  ;;  %v6078_v16 = vrot.slane %v6077_v8, 1  ;;  %v10195_v6 = vld [vmem:[#allocation6 + $0x1384] ss:$40 sps:$4 sm:$0xff]  }
 0x425   :  { %v6090_v17 = vrot.slane %v6089_v9, 1  ;;  %v6084_v18 = vrot.slane %v6083_v11, 1  ;;  %5979 = vmatpush1.bf16.msra.mxu0 %v10166_v7 }
 0x426   :  { %v6096_v5 = vrot.slane %v6095_v14, 1  ;;  %v6079_v30 = vadd.f32 %v6078_v16, %v6077_v8  ;;  %5980 = vmatprep.subr.bf16.mxu0 %v10171_v43  ;;  %v10193_v16 = vld [vmem:[#allocation6 + $0x1380] ss:$40 sps:$4 sm:$0xff]  }
 0x427   :  { %v6091_v23 = vadd.f32 %v6090_v17, %v6089_v9  ;;  %v6085_v25 = vadd.f32 %v6084_v18, %v6083_v11 }
 0x428   :  { %v6097_v27 = vadd.f32 %v6096_v5, %v6095_v14  ;;  %v6115_v28 = vmul.f32 0.125, %v6079_v30 }
 0x429   :  { %v6116_v32 = vmul.f32 0.125, %v6085_v25  ;;  %5981 = vmatpush1.bf16.msra.mxu0 %v10169_v19  ;;  %v6117_v48 = vmul.f32 0.125, %v6091_v23  ;;  %v10198_v25 = vld [vmem:[#allocation6 + $0x13d0] ss:$40 sps:$4 sm:$0xff]  }
 0x42a   :  { %v6118_v33 = vmul.f32 0.125, %v6097_v27  ;;  %v11096_v21 = vsub.f32 %v5629_v56, %v6115_v28  ;;  %5982 = vmatprep.subr.bf16.mxu0 %v10174_v22  ;;  %v10200_v22 = vld [vmem:[#allocation6 + $0x13d4] ss:$40 sps:$4 sm:$0xff]   ;;  %v10205_v27 = vld [vmem:[#allocation6 + $0x1424] ss:$40 sps:$4 sm:$0xff]   ;;  %v6261_v28 = vsub.s32 4, %v11052_v12 }
 0x42b   :  { %v11098_v39 = vsub.f32 %v5631_v59, %v6116_v32  ;;  %v11108_v54 = vsub.f32 %v5834_v24, %v6117_v48  ;;  %v10185_v59 = vld [vmem:[#allocation6 + $0x12e4] ss:$40 sps:$4 sm:$0xff]   ;;  %v10183_v24 = vld [vmem:[#allocation6 + $0x12e0] ss:$40 sps:$4 sm:$0xff]   ;;  %v6273_v48 = vsub.s32 7, %v11052_v12 }
 0x42c   :  { %v11100_v40 = vsub.f32 %v5836_v60, %v6118_v33  ;;  %v6135_v46 = vmul.f32 %v11096_v21, %v11096_v21  ;;  %v10203_v33 = vld [vmem:[#allocation6 + $0x1420] ss:$40 sps:$4 sm:$0xff]  }
 0x42d   :  { %v6136_v31 = vmul.f32 %v11098_v39, %v11098_v39  ;;  %5983 = vmatpush1.bf16.msra.mxu0 %v10172_v34  ;;  %v6137_v60 = vmul.f32 %v11108_v54, %v11108_v54  ;;  %v6265_v34 = vsub.s32 5, %v11052_v12 }
 0x42e   :  { %v6138_v49 = vmul.f32 %v11100_v40, %v11100_v40  ;;  %v6165_v52 = vrot.slane %v6135_v46, 4  ;;  %5984 = vmatprep.subr.bf16.mxu0 %v10177_v36  ;;  %v10210_v36 = vld [vmem:[#allocation6 + $0x1474] ss:$40 sps:$4 sm:$0xff]  }
 0x42f   :  { %v6171_v38 = vrot.slane %v6136_v31, 4  ;;  %v6177_v1 = vrot.slane %v6137_v60, 4 }
 0x430   :  { %v6183_v42 = vrot.slane %v6138_v49, 4  ;;  %v6166_v20 = vadd.f32 %v6165_v52, %v6135_v46  ;;  %v11117_v46 = vld [vmem:[#allocation8] sm:$0xff] }
 0x431   :  { %v6172_v55 = vadd.f32 %v6171_v38, %v6136_v31  ;;  %5985 = vmatpush1.bf16.msra.mxu0 %v10175_v51  ;;  %v6178_v7 = vadd.f32 %v6177_v1, %v6137_v60  ;;  %v6262_v31 = vrot.slane %v11117_v46, %v6261_v28  ;;  %v6266_v38 = vrot.slane %v11117_v46, %v6265_v34 }
 0x432   :  { %v6184_v56 = vadd.f32 %v6183_v42, %v6138_v49  ;;  %v6167_v58 = vrot.slane %v6166_v20, 2  ;;  %5986 = vmatprep.subr.bf16.mxu0 %v10180_v53  ;;  %v10208_v53 = vld [vmem:[#allocation6 + $0x1470] ss:$40 sps:$4 sm:$0xff]  }
 0x433   :  { %v6173_v47 = vrot.slane %v6172_v55, 2  ;;  %v6179_v23 = vrot.slane %v6178_v7, 2  ;;  %v11123_v42 = vld [vmem:[#allocation9] sm:$0xff] }
 0x434   :  { %v6185_v45 = vrot.slane %v6184_v56, 2  ;;  %v6168_v61 = vadd.f32 %v6167_v58, %v6166_v20  ;;  %v6324_v20 = vrot.slane %v11123_v42, %v6261_v28  ;;  %v6328_v60 = vrot.slane %v11123_v42, %v6265_v34  ;;  %v10240_v28 = vld [vmem:[#allocation6 + $0x1654] ss:$40 sps:$4 sm:$0xff]  }
 0x435   :  { %v6174_v62 = vadd.f32 %v6173_v47, %v6172_v55  ;;  %5987 = vmatpush1.bf16.msra.mxu0 %v10178_v57  ;;  %v6180_v32 = vadd.f32 %v6179_v23, %v6178_v7  ;;  %v6274_v57 = vrot.slane %v11117_v46, %v6273_v48  ;;  %v6269_v34 = vsub.s32 6, %v11052_v12  ;;  %v10247_v12 = vld [vmem:[#allocation11 + $0x1a8] sm:$0xff]  }
 0x436   :  { %v6186_v63 = vadd.f32 %v6185_v45, %v6184_v56  ;;  %v6169_v26 = vrot.slane %v6168_v61, 1  ;;  %5988 = vmatprep.subr.bf16.mxu0 %v10185_v59  ;;  %v10215_v56 = vld [vmem:[#allocation6 + $0x14c4] ss:$40 sps:$4 sm:$0xff]   ;;  %v6336_v45 = vrot.slane %v11123_v42, %v6273_v48 }
 0x437   :  { %v6175_v44 = vrot.slane %v6174_v62, 1  ;;  %v6181_v49 = vrot.slane %v6180_v32, 1 }
 0x438   :  { %v6187_v2 = vrot.slane %v6186_v63, 1  ;;  %v6170_v3 = vadd.f32 %v6169_v26, %v6168_v61  ;;  %v10213_v61 = vld [vmem:[#allocation6 + $0x14c0] ss:$40 sps:$4 sm:$0xff]  }
 0x439   :  { %v6176_v4 = vadd.f32 %v6175_v44, %v6174_v62  ;;  %5989 = vmatpush1.bf16.msra.mxu0 %v10183_v24 }
 0x43a   :  { %v6188_v10 = vadd.f32 %v6187_v2, %v6186_v63  ;;  %v6205_v15 = vmul.f32 0.125, %v6170_v3  ;;  %5990 = vmatprep.subr.bf16.mxu0 %v10190_v0  ;;  %v10220_v63 = vld [vmem:[#allocation6 + $0x1514] ss:$40 sps:$4 sm:$0xff]   ;;  %v10218_v2 = vld [vmem:[#allocation6 + $0x1510] ss:$40 sps:$4 sm:$0xff]  }
 0x43b   :  { %v6206_v8 = vmul.f32 0.125, %v6176_v4  ;;  %v10225_v4 = vld [vmem:[#allocation6 + $0x1564] ss:$40 sps:$4 sm:$0xff]  }
 0x43c   :  { %v6208_v9 = vmul.f32 0.125, %v6188_v10  ;;  %v8783_v43 = vpop.f32.mrb[8].mxu1  ;;  %v6215_v11 = vadd.f32 1e-05, %v6205_v15 }
 0x43d   :  { %v8784_v14 = vpop.f32.mrb[9].mxu1  ;;  %v6216_v17 = vadd.f32 1e-05, %v6206_v8  ;;  %5991 = vmatpush1.bf16.msra.mxu0 %v10188_v50  ;;  %v10222_v50 = vld [vmem:[#allocation11 + $0x180] sm:$0xff]   ;;  %v10223_v8 = vld [vmem:[#allocation6 + $0x1560] ss:$40 sps:$4 sm:$0xff]  }
 0x43e   :  { %v6218_v18 = vadd.f32 1e-05, %v6208_v9  ;;  %v11112_v5 = vadd.f32 %v8784_v14, %v8783_v43  ;;  %v8786_v19 = vpop.f32.mrb[10].mxu1  ;;  %10361 = vrsqrt.f32 %v6215_v11  ;;  %5992 = vmatprep.subr.bf16.mxu0 %v10195_v6  ;;  %v10226_v6 = vld [vmem:[#allocation11 + $0x1c8] sm:$0xff]   ;;  %v10231_v11 = vld [vmem:[#allocation11 + $0x1d0] sm:$0xff]  }
 0x43f   :  { %v8787_v30 = vpop.f32.mrb[11].mxu1  ;;  %10363 = vrsqrt.f32 %v6216_v17  ;;  %v10230_v9 = vld [vmem:[#allocation6 + $0x15b4] ss:$40 sps:$4 sm:$0xff]   ;;  %v10228_v14 = vld [vmem:[#allocation6 + $0x15b0] ss:$40 sps:$4 sm:$0xff]  }
 0x440   :  { %10365 = vrsqrt.f32 %v6218_v18  ;;  %v10227_v43 = vld [vmem:[#allocation11 + $0x188] sm:$0xff]   ;;  %v10232_v18 = vld [vmem:[#allocation11 + $0x190] sm:$0xff]   ;;  %v10236_v30 = vld [vmem:[#allocation11 + $0x1d8] sm:$0xff]  }
 0x441   :  { %5993 = vmatpush1.bf16.msra.mxu0 %v10193_v16  ;;  %v10235_v16 = vld [vmem:[#allocation6 + $0x1604] ss:$40 sps:$4 sm:$0xff]  }
 0x442   :  { %5994 = vmatprep.subr.bf16.mxu0 %v10200_v22 }
 0x445   :  { %5995 = vmatpush1.bf16.msra.mxu0 %v10198_v25  ;;  %v10233_v25 = vld [vmem:[#allocation6 + $0x1600] ss:$40 sps:$4 sm:$0xff]  }
 0x446   :  { %6005 = vmatprep.subr.bf16.mxu0 %v10205_v27 }
 0x448   :  { %v10362_v51 = vpop.eup %10361  ;;  %5997 = vmatmul.mubr.bf16.vlgmr.msra.gmra.mrb[8].mxu0 %v10982_v29  ;;  %v6182_v29 = vadd.f32 %v6181_v49, %v6180_v32  ;;  %v10245_v49 = vld [vmem:[#allocation6 + $0x16a4] ss:$40 sps:$4 sm:$0xff]  }
 0x449   :  { %v6235_v52 = vmul.f32 %v10362_v51, %v11096_v21  ;;  %6006 = vmatpush1.bf16.msra.mxu0 %v10203_v33  ;;  %6037 = vmatprep.mubr.bf16.mxu0 %v10991_v35  ;;  %v10364_v55 = vpop.eup %10363  ;;  %v10237_v33 = vld [vmem:[#allocation11 + $0x198] sm:$0xff]   ;;  %v10242_v51 = vld [vmem:[#allocation11 + $0x1a0] sm:$0xff]  }
 0x44a   :  { %6007 = vmatprep.subr.bf16.mxu0 %v10210_v36  ;;  %v10366_v58 = vpop.eup %10365  ;;  %v6236_v21 = vmul.f32 %v10364_v55, %v11098_v39  ;;  %v6207_v26 = vmul.f32 0.125, %v6182_v29  ;;  %v10241_v36 = vld [vmem:[#allocation11 + $0x1e0] sm:$0xff]  }
 0x44b   :  { %v6297_v59 = vmul.f32 %v6262_v31, %v6235_v52  ;;  %v6238_v47 = vmul.f32 %v10366_v58, %v11100_v40  ;;  %v10238_v31 = vld [vmem:[#allocation6 + $0x1650] ss:$40 sps:$4 sm:$0xff]  }
 0x44c   :  { %v6298_v62 = vmul.f32 %v6266_v38, %v6236_v21  ;;  %v6217_v40 = vadd.f32 1e-05, %v6207_v26  ;;  %v10243_v38 = vld [vmem:[#allocation6 + $0x16a0] ss:$40 sps:$4 sm:$0xff]   ;;  %v10248_v58 = vld [vmem:[#allocation6 + $0x16f0] ss:$40 sps:$4 sm:$0xff]  }
 0x44d   :  { %6008 = vmatpush1.bf16.msra.mxu0 %v10208_v53  ;;  %v6359_v35 = vadd.f32 %v6324_v20, %v6297_v59  ;;  %v6300_v24 = vmul.f32 %v6274_v57, %v6238_v47  ;;  %v6270_v53 = vrot.slane %v11117_v46, %v6269_v34  ;;  %v10250_v20 = vld [vmem:[#allocation6 + $0x16f4] ss:$40 sps:$4 sm:$0xff]   ;;  %v6332_v57 = vrot.slane %v11123_v42, %v6269_v34  ;;  %v10255_v59 = vld [vmem:[#allocation6 + $0x1744] ss:$40 sps:$4 sm:$0xff]   ;;  %v10253_v21 = vld [vmem:[#allocation6 + $0x1740] ss:$40 sps:$4 sm:$0xff]  }
 0x44e   :  { %6009 = vmatprep.subr.bf16.mxu0 %v10215_v56  ;;  %v6360_v0 = vadd.f32 %v6328_v60, %v6298_v62  ;;  %10367 = vrsqrt.f32 %v6217_v40  ;;  %v10251_v56 = vld [vmem:[#allocation11 + $0x1f0] sm:$0xff]   ;;  %v10256_v46 = vld [vmem:[#allocation11 + $0x1f8] sm:$0xff]   ;;  %v10260_v60 = vld [vmem:[#allocation6 + $0x1794] ss:$40 sps:$4 sm:$0xff]  }
 0x44f   :  { %v6369_v1 = vmax.f32 %v6359_v35, 0.0  ;;  %v6362_v44 = vadd.f32 %v6336_v45, %v6300_v24  ;;  %v10257_v47 = vld [vmem:[#allocation11 + $0x1b8] sm:$0xff]   ;;  %v10261_v35 = vld [vmem:[#allocation6 + $0x17e0] ss:$40 sps:$4 sm:$0xff]  }
 0x450   :  { %v6370_v39 = vmax.f32 %v6360_v0, 0.0  ;;  %v10263_v42 = vld [vmem:[#allocation6 + $0x17e4] ss:$40 sps:$4 sm:$0xff]   ;;  %v10264_v24 = vld [vmem:[#allocation6 + $0x1830] ss:$40 sps:$4 sm:$0xff]  }
 0x451   :  { %6010 = vmatpush1.bf16.msra.mxu0 %v10213_v61  ;;  %v6372_v3 = vmax.f32 %v6362_v44, 0.0  ;;  %v6379_v15 = vpack.c.bf16 %v6369_v1, %v6369_v1  ;;  %v10258_v61 = vld [vmem:[#allocation6 + $0x1790] ss:$40 sps:$4 sm:$0xff]   ;;  %v10269_v26 = vld [vmem:[#allocation6 + $0x1884] ss:$40 sps:$4 sm:$0xff]  }
 0x452   :  { %6011 = vmatprep.subr.bf16.mxu0 %v10220_v63  ;;  %v6380_v10 = vpack.c.bf16 %v6370_v39, %v6370_v39  ;;  %v10266_v63 = vld [vmem:[#allocation6 + $0x1834] ss:$40 sps:$4 sm:$0xff]   ;;  %v10267_v0 = vld [vmem:[#allocation6 + $0x1880] ss:$40 sps:$4 sm:$0xff]   ;;  %v10270_v44 = vld [vmem:[#allocation6 + $0x18d0] ss:$40 sps:$4 sm:$0xff]  }
 0x453   :  { %v6382_v7 = vpack.c.bf16 %v6372_v3, %v6372_v3  ;;  %v10272_v1 = vld [vmem:[#allocation6 + $0x18d4] ss:$40 sps:$4 sm:$0xff]   ;;  %v10277_v40 = vld [vmem:[#allocation11 + $0x250] sm:$0xff]  }
 0x454   :  { %7137 = vmatprep.mubr.bf16.mxu1 %v6380_v10  ;;  %v10274_v39 = vld [vmem:[#allocation11 + $0x200] sm:$0xff]   ;;  %v10275_v3 = vld [vmem:[#allocation11 + $0x248] sm:$0xff]   ;;  %v10278_v10 = vld [vmem:[#allocation11 + $0x210] sm:$0xff]  }
 0x455   :  { %6012 = vmatpush1.bf16.msra.mxu0 %v10218_v2  ;;  %7138 = vmatmul.mubr.bf16.vlgmr.msra.gmra.mrb[16].mxu1 %v6379_v15  ;;  %v10273_v2 = vld [vmem:[#allocation11 + $0x240] sm:$0xff]   ;;  %v10280_v15 = vld [vmem:[#allocation11 + $0x218] sm:$0xff]  }
 0x456   :  { %6013 = vmatprep.subr.bf16.mxu0 %v10225_v4  ;;  %8834 = vmatpush3.bf16.msra.mxu1 %v10222_v50  ;;  %v10276_v4 = vld [vmem:[#allocation11 + $0x208] sm:$0xff]   ;;  %v10279_v50 = vld [vmem:[#allocation11 + $0x258] sm:$0xff]  }
 0x457   :  { %7177 = vmatprep.mubr.bf16.mxu1 %v6382_v7  ;;  %8835 = vmatprep.subr.bf16.mxu1 %v10226_v6  ;;  %v10281_v6 = vld [vmem:[#allocation11 + $0x260] sm:$0xff]  }
 0x458   :  { %v10368_v48 = vpop.eup %10367  ;;  %v10282_v7 = vld [vmem:[#allocation11 + $0x220] sm:$0xff]  }
 0x459   :  { %6014 = vmatpush1.bf16.msra.mxu0 %v10223_v8  ;;  %v6237_v52 = vmul.f32 %v10368_v48, %v11108_v54  ;;  %v10252_v54 = vld [vmem:[#allocation11 + $0x1b0] sm:$0xff]   ;;  %v10284_v8 = vld [vmem:[#allocation11 + $0x228] sm:$0xff]  }
 0x45a   :  { %6015 = vmatprep.subr.bf16.mxu0 %v10230_v9  ;;  %8836 = vmatpush3.bf16.msra.mxu1 %v10227_v43  ;;  %v10285_v9 = vld [vmem:[#allocation11 + $0x270] sm:$0xff]  }
 0x45b   :  { %8837 = vmatprep.subr.bf16.mxu1 %v10231_v11  ;;  %v6299_v55 = vmul.f32 %v6270_v53, %v6237_v52  ;;  %v10286_v43 = vld [vmem:[#allocation11 + $0x230] sm:$0xff]   ;;  %v10287_v11 = vld [vmem:[#allocation11 + $0x278] sm:$0xff]  }
 0x45c   :  { %v8805_v17 = vpop.f32.mrb[12].mxu1 }
 0x45d   :  { %v8806_v19 = vpop.f32.mrb[13].mxu1  ;;  %6016 = vmatpush1.bf16.msra.mxu0 %v10228_v14  ;;  %v6361_v29 = vadd.f32 %v6332_v57, %v6299_v55  ;;  %v10288_v14 = vld [vmem:[#allocation11 + $0x238] sm:$0xff]  }
 0x45e   :  { %v8807_v22 = vadd.f32 %v8806_v19, %v8805_v17  ;;  %v8808_v23 = vpop.f32.mrb[14].mxu1  ;;  %6017 = vmatprep.subr.bf16.mxu0 %v10235_v16  ;;  %8838 = vmatpush3.bf16.msra.mxu1 %v10232_v18  ;;  %v10291_v16 = vld [vmem:[#allocation12 + $0x4] ss:$8 sps:$4 sm:$0xff]  }
 0x45f   :  { %v8809_v27 = vpop.f32.mrb[15].mxu1  ;;  %8839 = vmatprep.subr.bf16.mxu1 %v10236_v30  ;;  %v6371_v45 = vmax.f32 %v6361_v29, 0.0 }
 0x460   :  { %v11133_v32 = vadd.f32 %v8807_v22, %v11112_v5  ;;  %v10246_v5 = vld [vmem:[#allocation11 + $0x1e8] sm:$0xff]  }
 0x461   :  { %6018 = vmatpush1.bf16.msra.mxu0 %v10233_v25  ;;  %v6381_v62 = vpack.c.bf16 %v6371_v45, %v6371_v45 }
 0x462   :  { %6019 = vmatprep.subr.bf16.mxu0 %v10240_v28  ;;  %8840 = vmatpush3.bf16.msra.mxu1 %v10237_v33  ;;  %v10706_v28 = vmov 0.0   ;;  %v7270_v33 = vld [vmem:[#allocation3 + $0x8] sm:$0xff] }
 0x463   :  { %8841 = vmatprep.subr.bf16.mxu1 %v10241_v36  ;;  %7268 = vst [vmem:[#allocation2 + $0x8] sm:$0xff] %v10706_v28 }
 0x464   :  { %7273 = vst.msk [vmem:[#allocation2 + $0x8] sm:$0xff] %vm7272_vm0, %v7270_v33  ;;  %v10289_v33 = vld [vmem:[#allocation12] ss:$8 sps:$4 sm:$0xff]  }
 0x465   :  { %6020 = vmatpush1.bf16.msra.mxu0 %v10238_v31 }
 0x466   :  { %6021 = vmatprep.subr.bf16.mxu0 %v10245_v49  ;;  %8842 = vmatpush3.bf16.msra.mxu1 %v10242_v51  ;;  %v11143_v49 = vld [vmem:[#allocation3] sm:$0xff] }
 0x467   :  { %8843 = vmatprep.subr.bf16.mxu1 %v10246_v5 }
 0x469   :  { %6022 = vmatpush1.bf16.msra.mxu0 %v10243_v38 }
 0x46a   :  { %6023 = vmatprep.subr.bf16.mxu0 %v10250_v20  ;;  %8844 = vmatpush3.bf16.msra.mxu1 %v10247_v12 }
 0x46b   :  { %8845 = vmatprep.subr.bf16.mxu1 %v10251_v56 }
 0x46d   :  { %6024 = vmatpush1.bf16.msra.mxu0 %v10248_v58 }
 0x46e   :  { %6025 = vmatprep.subr.bf16.mxu0 %v10255_v59  ;;  %8846 = vmatpush3.bf16.msra.mxu1 %v10252_v54 }
 0x46f   :  { %8847 = vmatprep.subr.bf16.mxu1 %v10256_v46 }
 0x471   :  { %6026 = vmatpush1.bf16.msra.mxu0 %v10253_v21 }
 0x472   :  { %6027 = vmatprep.subr.bf16.mxu0 %v10260_v60  ;;  %8848 = vmatpush3.bf16.msra.mxu1 %v10257_v47 }
 0x473   :  { %8855 = vmatprep.subr.bf16.mxu1 %v10273_v2 }
 0x475   :  { %6028 = vmatpush1.bf16.msra.mxu0 %v10258_v61  ;;  %7178 = vmatmul.mubr.bf16.vlgmr.msra.gmra.mrb[20].mxu1 %v6381_v62 }
 0x476   :  { %6029 = vmatprep.subr.bf16.mxu0 %v10263_v42  ;;  %8856 = vmatpush3.bf16.msra.mxu1 %v10274_v39 }
 0x477   :  { %8857 = vmatprep.subr.bf16.mxu1 %v10275_v3 }
 0x479   :  { %6030 = vmatpush1.bf16.msra.mxu0 %v10261_v35 }
 0x47a   :  { %6031 = vmatprep.subr.bf16.mxu0 %v10266_v63  ;;  %8858 = vmatpush3.bf16.msra.mxu1 %v10276_v4 }
 0x47b   :  { %8859 = vmatprep.subr.bf16.mxu1 %v10277_v40 }
 0x47d   :  { %6032 = vmatpush1.bf16.msra.mxu0 %v10264_v24 }
 0x47e   :  { %6033 = vmatprep.subr.bf16.mxu0 %v10269_v26  ;;  %8860 = vmatpush3.bf16.msra.mxu1 %v10278_v10 }
 0x47f   :  { %8861 = vmatprep.subr.bf16.mxu1 %v10279_v50 }
 0x481   :  { %6034 = vmatpush1.bf16.msra.mxu0 %v10267_v0 }
 0x482   :  { %6035 = vmatprep.subr.bf16.mxu0 %v10272_v1  ;;  %8862 = vmatpush3.bf16.msra.mxu1 %v10280_v15 }
 0x483   :  { %8863 = vmatprep.subr.bf16.mxu1 %v10281_v6  ;;  %v6047_v6 = vld [vmem:[#allocation8 + $0x8] sm:$0x3] }
 0x485   :  { %6036 = vmatpush1.bf16.msra.mxu0 %v10270_v44 }
 0x486   :  { %8864 = vmatpush3.bf16.msra.mxu1 %v10282_v7  ;;  %v6049_v7 = vld [vmem:[#allocation9 + $0x8] sm:$0x3] }
 0x488   :  { %6038 = vmatmul.mubr.bf16.vlgmr.msra.gmra.mrb[8].mxu0 %v10999_v41  ;;  %v10283_v41 = vld [vmem:[#allocation11 + $0x268] sm:$0xff]  }
 0x489   :  { %8865 = vmatprep.subr.bf16.mxu1 %v10283_v41  ;;  %v6278_v41 = vrot.slane %v6047_v6, %v11075_v37 }
 0x48a   :  { %8866 = vmatpush3.bf16.msra.mxu1 %v10284_v8 }
 0x48b   :  { %8867 = vmatprep.subr.bf16.mxu1 %v10285_v9  ;;  %v6282_v9 = vrot.slane %v6047_v6, %v11055_v13  ;;  %v10345_v6 = vld [vmem:[#allocation17 + $0x60] sm:$0xff]  }
 0x48e   :  { %8868 = vmatpush3.bf16.msra.mxu1 %v10286_v43 }
 0x48f   :  { %8869 = vmatprep.subr.bf16.mxu1 %v10287_v11 }
 0x492   :  { %8870 = vmatpush3.bf16.msra.mxu1 %v10288_v14  ;;  %v6340_v14 = vrot.slane %v6049_v7, %v11075_v37 }
 0x493   :  { %7470 = vmatprep.subr.bf16.mxu1 %v10291_v16 }
 0x528   :  { %v8827_v17 = vpop.f32.mrb[16].mxu1 }
 0x529   :  { %v8828_v18 = vpop.f32.mrb[17].mxu1 }
 0x52a   :  { %v8829_v19 = vadd.f32 %v8828_v18, %v8827_v17  ;;  %v8830_v30 = vpop.f32.mrb[18].mxu1  ;;  %v6344_v17 = vrot.slane %v6049_v7, %v11055_v13  ;;  %v10347_v7 = vld [vmem:[#allocation17 + $0x68] sm:$0xff]  }
 0x52b   :  { %v8831_v22 = vpop.f32.mrb[19].mxu1 }
 0x52c   :  { %v7140_v23 = vadd.f32 %v8829_v19, %v11133_v32 }
 0x548   :  { %v8849_v25 = vpop.f32.mrb[20].mxu1 }
 0x549   :  { %v8850_v27 = vpop.f32.mrb[21].mxu1 }
 0x54a   :  { %v8851_v34 = vadd.f32 %v8850_v27, %v8849_v25  ;;  %v8852_v36 = vpop.f32.mrb[22].mxu1  ;;  %v7275_v25 = vld [vmem:[#allocation2 + $0x8] sm:$0xff] }
 0x54b   :  { %v8853_v48 = vpop.f32.mrb[23].mxu1 }
 0x54c   :  { %v11141_v31 = vadd.f32 %v8851_v34, %v7140_v23  ;;  %v7277_v34 = vpack.c.bf16 %v7275_v25, %v7275_v25  ;;  %v10294_v48 = vld [vmem:[#allocation12 + $0x14] ss:$8 sps:$4 sm:$0xff]  }
 0x55b   :  { %v6039_v51 = vpop.f32.mrb[8].mxu0 }
 0x55c   :  { %v6098_v52 = vrot.slane %v6039_v51, 4  ;;  %v6041_v53 = vpop.f32.mrb[9].mxu0 }
 0x55d   :  { %v6104_v5 = vrot.slane %v6041_v53, 4  ;;  %v6043_v38 = vpop.f32.mrb[10].mxu0 }
 0x55e   :  { %v6099_v32 = vadd.f32 %v6098_v52, %v6039_v51  ;;  %v6044_v20 = vpop.f32.mrb[11].mxu0  ;;  %v10297_v52 = vld [vmem:[#allocation12 + $0x24] ss:$8 sps:$4 sm:$0xff]   ;;  %v10298_v38 = vld [vmem:[#allocation12 + $0x30] ss:$8 sps:$4 sm:$0xff]  }
 0x55f   :  { %v6105_v12 = vadd.f32 %v6104_v5, %v6041_v53  ;;  %v10300_v5 = vld [vmem:[#allocation12 + $0x34] ss:$8 sps:$4 sm:$0xff]   ;;  %v10301_v20 = vld [vmem:[#allocation12 + $0x40] ss:$8 sps:$4 sm:$0xff]  }
 0x560   :  { %v6100_v55 = vrot.slane %v6099_v32, 2 }
 0x561   :  { %v6106_v56 = vrot.slane %v6105_v12, 2 }
 0x562   :  { %v6101_v57 = vadd.f32 %v6100_v55, %v6099_v32  ;;  %v10303_v32 = vld [vmem:[#allocation12 + $0x44] ss:$8 sps:$4 sm:$0xff]   ;;  %v10304_v55 = vld [vmem:[#allocation12 + $0x50] ss:$8 sps:$4 sm:$0xff]  }
 0x563   :  { %v6107_v58 = vadd.f32 %v6106_v56, %v6105_v12  ;;  %v10306_v12 = vld [vmem:[#allocation12 + $0x54] ss:$8 sps:$4 sm:$0xff]   ;;  %v10309_v56 = vld [vmem:[#allocation12 + $0x64] ss:$8 sps:$4 sm:$0xff]  }
 0x564   :  { %v6102_v59 = vrot.slane %v6101_v57, 1 }
 0x565   :  { %v6108_v54 = vrot.slane %v6107_v58, 1 }
 0x566   :  { %v6103_v46 = vadd.f32 %v6102_v59, %v6101_v57  ;;  %v10307_v57 = vld [vmem:[#allocation12 + $0x60] ss:$8 sps:$4 sm:$0xff]   ;;  %v10310_v59 = vld [vmem:[#allocation12 + $0x70] ss:$8 sps:$4 sm:$0xff]  }
 0x567   :  { %v6109_v29 = vadd.f32 %v6108_v54, %v6107_v58  ;;  %v10312_v58 = vld [vmem:[#allocation12 + $0x74] ss:$8 sps:$4 sm:$0xff]   ;;  %v10315_v54 = vld [vmem:[#allocation12 + $0x84] ss:$8 sps:$4 sm:$0xff]  }
 0x568   :  { %v6119_v21 = vmul.f32 0.125, %v6103_v46  ;;  %v10313_v46 = vld [vmem:[#allocation12 + $0x80] ss:$8 sps:$4 sm:$0xff]  }
 0x569   :  { %v6120_v60 = vmul.f32 0.125, %v6109_v29  ;;  %v10318_v29 = vld [vmem:[#allocation12 + $0x94] ss:$8 sps:$4 sm:$0xff]  }
 0x56a   :  { %v6129_v47 = vsub.f32 %v6039_v51, %v6119_v21  ;;  %v10292_v51 = vld [vmem:[#allocation12 + $0x10] ss:$8 sps:$4 sm:$0xff]  }
 0x56b   :  { %v6130_v45 = vsub.f32 %v6041_v53, %v6120_v60  ;;  %v10295_v53 = vld [vmem:[#allocation12 + $0x20] ss:$8 sps:$4 sm:$0xff]   ;;  %v10316_v21 = vld [vmem:[#allocation12 + $0x90] ss:$8 sps:$4 sm:$0xff]   ;;  %v10321_v60 = vld [vmem:[#allocation12 + $0xa4] ss:$8 sps:$4 sm:$0xff]  }
 0x56c   :  { %v6139_v61 = vmul.f32 %v6129_v47, %v6129_v47 }
 0x56d   :  { %v6140_v42 = vmul.f32 %v6130_v45, %v6130_v45 }
 0x56e   :  { %v6189_v62 = vrot.slane %v6139_v61, 4 }
 0x56f   :  { %v6195_v35 = vrot.slane %v6140_v42, 4 }
 0x570   :  { %v6190_v63 = vadd.f32 %v6189_v62, %v6139_v61  ;;  %v10322_v61 = vld [vmem:[#allocation12 + $0xb0] ss:$8 sps:$4 sm:$0xff]   ;;  %v10325_v62 = vld [vmem:[#allocation12 + $0xc0] ss:$8 sps:$4 sm:$0xff]  }
 0x571   :  { %v6196_v24 = vadd.f32 %v6195_v35, %v6140_v42  ;;  %v10327_v42 = vld [vmem:[#allocation12 + $0xc4] ss:$8 sps:$4 sm:$0xff]   ;;  %v10330_v35 = vld [vmem:[#allocation12 + $0xd4] ss:$8 sps:$4 sm:$0xff]  }
 0x572   :  { %v6191_v26 = vrot.slane %v6190_v63, 2 }
 0x573   :  { %v6197_v0 = vrot.slane %v6196_v24, 2 }
 0x574   :  { %v6192_v1 = vadd.f32 %v6191_v26, %v6190_v63  ;;  %v10328_v63 = vld [vmem:[#allocation12 + $0xd0] ss:$8 sps:$4 sm:$0xff]   ;;  %v10331_v26 = vld [vmem:[#allocation12 + $0xe0] ss:$8 sps:$4 sm:$0xff]  }
 0x575   :  { %v6198_v44 = vadd.f32 %v6197_v0, %v6196_v24  ;;  %v10333_v24 = vld [vmem:[#allocation12 + $0xe4] ss:$8 sps:$4 sm:$0xff]   ;;  %v10336_v0 = vld [vmem:[#allocation12 + $0xf4] ss:$8 sps:$4 sm:$0xff]  }
 0x576   :  { %v6193_v2 = vrot.slane %v6192_v1, 1 }
 0x577   :  { %v6199_v39 = vrot.slane %v6198_v44, 1 }
 0x578   :  { %v6194_v3 = vadd.f32 %v6193_v2, %v6192_v1  ;;  %v10334_v1 = vld [vmem:[#allocation12 + $0xf0] ss:$8 sps:$4 sm:$0xff]   ;;  %v10337_v2 = vld [vmem:[#allocation17 + $0x40] sm:$0xff]  }
 0x579   :  { %v6200_v4 = vadd.f32 %v6199_v39, %v6198_v44  ;;  %v7276_v44 = vpack.c.bf16 %v11143_v49, %v11143_v49  ;;  %v10338_v39 = vld [vmem:[#allocation17] sm:$0xff]  }
 0x57a   :  { %v6209_v40 = vmul.f32 0.125, %v6194_v3  ;;  %v10339_v3 = vld [vmem:[#allocation17 + $0x48] sm:$0xff]   ;;  %v10346_v49 = vld [vmem:[#allocation17 + $0x20] sm:$0xff]  }
 0x57b   :  { %v6210_v10 = vmul.f32 0.125, %v6200_v4  ;;  %v10340_v4 = vld [vmem:[#allocation17 + $0x8] sm:$0xff]  }
 0x57c   :  { %v6219_v50 = vadd.f32 1e-05, %v6209_v40  ;;  %v10341_v40 = vld [vmem:[#allocation17 + $0x50] sm:$0xff]  }
 0x57d   :  { %v6220_v15 = vadd.f32 1e-05, %v6210_v10  ;;  %v10342_v10 = vld [vmem:[#allocation17 + $0x10] sm:$0xff]  }
 0x57e   :  { %10369 = vrsqrt.f32 %v6219_v50  ;;  %v10343_v50 = vld [vmem:[#allocation17 + $0x58] sm:$0xff]  }
 0x57f   :  { %10371 = vrsqrt.f32 %v6220_v15  ;;  %v10344_v15 = vld [vmem:[#allocation17 + $0x18] sm:$0xff]  }
 0x588   :  { %v10370_v8 = vpop.eup %10369 }
 0x589   :  { %v10372_v43 = vpop.eup %10371  ;;  %v6239_v11 = vmul.f32 %v10370_v8, %v6129_v47  ;;  %v10319_v47 = vld [vmem:[#allocation12 + $0xa0] ss:$8 sps:$4 sm:$0xff]   ;;  %v10349_v8 = vld [vmem:[#allocation17 + $0x70] sm:$0xff]  }
 0x58a   :  { %v6240_v16 = vmul.f32 %v10372_v43, %v6130_v45  ;;  %v10324_v45 = vld [vmem:[#allocation12 + $0xb4] ss:$8 sps:$4 sm:$0xff]  }
 0x58b   :  { %v6301_v18 = vmul.f32 %v6278_v41, %v6239_v11  ;;  %v10348_v41 = vld [vmem:[#allocation17 + $0x28] sm:$0xff]   ;;  %v10351_v43 = vld [vmem:[#allocation17 + $0x78] sm:$0xff]  }
 0x58c   :  { %v6302_v19 = vmul.f32 %v6282_v9, %v6240_v16  ;;  %v10350_v9 = vld [vmem:[#allocation17 + $0x30] sm:$0xff]   ;;  %v10352_v11 = vld [vmem:[#allocation17 + $0x38] sm:$0xff]  }
 0x58d   :  { %v6363_v30 = vadd.f32 %v6340_v14, %v6301_v18 }
 0x58e   :  { %v6364_v22 = vadd.f32 %v6344_v17, %v6302_v19 }
 0x58f   :  { %v6373_v23 = vmax.f32 %v6363_v30, 0.0 }
 0x590   :  { %v6374_v27 = vmax.f32 %v6364_v22, 0.0 }
 0x591   :  { %v6383_v36 = vpack.c.bf16 %v6373_v23, %v6373_v23 }
 0x592   :  { %v6384_v28 = vpack.c.bf16 %v6374_v27, %v6374_v27 }
 0x594   :  { %7217 = vmatprep.mubr.bf16.mxu1 %v6384_v28 }
 0x595   :  { %7218 = vmatmul.mubr.bf16.vlgmr.msra.gmra.mrb[24].mxu1 %v6383_v36 }
 0x596   :  { %7471 = vmatpush1.bf16.msra.mxu1 %v10289_v33  ;;  %7502 = vmatprep.mubr.bf16.mxu1 %v7277_v34 }
 0x597   :  { %7472 = vmatprep.subr.bf16.mxu1 %v10294_v48 }
 0x59a   :  { %7473 = vmatpush1.bf16.msra.mxu1 %v10292_v51 }
 0x59b   :  { %7474 = vmatprep.subr.bf16.mxu1 %v10297_v52 }
 0x59e   :  { %7475 = vmatpush1.bf16.msra.mxu1 %v10295_v53 }
 0x59f   :  { %7476 = vmatprep.subr.bf16.mxu1 %v10300_v5 }
 0x5a2   :  { %7477 = vmatpush1.bf16.msra.mxu1 %v10298_v38 }
 0x5a3   :  { %7478 = vmatprep.subr.bf16.mxu1 %v10303_v32 }
 0x5a6   :  { %7479 = vmatpush1.bf16.msra.mxu1 %v10301_v20 }
 0x5a7   :  { %7480 = vmatprep.subr.bf16.mxu1 %v10306_v12 }
 0x5aa   :  { %7481 = vmatpush1.bf16.msra.mxu1 %v10304_v55 }
 0x5ab   :  { %7482 = vmatprep.subr.bf16.mxu1 %v10309_v56 }
 0x5ae   :  { %7483 = vmatpush1.bf16.msra.mxu1 %v10307_v57  ;;  %v11154_v57 = vld [vmem:[#allocation20] ss:$0 sm:$0xff] }
 0x5af   :  { %7484 = vmatprep.subr.bf16.mxu1 %v10312_v58 }
 0x5b2   :  { %7485 = vmatpush1.bf16.msra.mxu1 %v10310_v59 }
 0x5b3   :  { %7486 = vmatprep.subr.bf16.mxu1 %v10315_v54 }
 0x5b6   :  { %7487 = vmatpush1.bf16.msra.mxu1 %v10313_v46 }
 0x5b7   :  { %7488 = vmatprep.subr.bf16.mxu1 %v10318_v29 }
 0x5ba   :  { %7489 = vmatpush1.bf16.msra.mxu1 %v10316_v21 }
 0x5bb   :  { %7490 = vmatprep.subr.bf16.mxu1 %v10321_v60 }
 0x5be   :  { %7491 = vmatpush1.bf16.msra.mxu1 %v10319_v47 }
 0x5bf   :  { %7492 = vmatprep.subr.bf16.mxu1 %v10324_v45 }
 0x5c2   :  { %7493 = vmatpush1.bf16.msra.mxu1 %v10322_v61 }
 0x5c3   :  { %7494 = vmatprep.subr.bf16.mxu1 %v10327_v42 }
 0x5c6   :  { %7495 = vmatpush1.bf16.msra.mxu1 %v10325_v62 }
 0x5c7   :  { %7496 = vmatprep.subr.bf16.mxu1 %v10330_v35 }
 0x5ca   :  { %7497 = vmatpush1.bf16.msra.mxu1 %v10328_v63 }
 0x5cb   :  { %7498 = vmatprep.subr.bf16.mxu1 %v10333_v24 }
 0x5ce   :  { %7499 = vmatpush1.bf16.msra.mxu1 %v10331_v26 }
 0x5cf   :  { %7500 = vmatprep.subr.bf16.mxu1 %v10336_v0 }
 0x5d2   :  { %7501 = vmatpush1.bf16.msra.mxu1 %v10334_v1 }
 0x5d3   :  { %8877 = vmatprep.subr.bf16.mxu1 %v10337_v2 }
 0x5d5   :  { %7503 = vmatmul.mubr.bf16.vlgmr.msra.gmra.mrb[28].mxu1 %v7276_v44 }
 0x5d6   :  { %8878 = vmatpush3.bf16.msra.mxu1 %v10338_v39 }
 0x5d7   :  { %8879 = vmatprep.subr.bf16.mxu1 %v10339_v3 }
 0x5da   :  { %8880 = vmatpush3.bf16.msra.mxu1 %v10340_v4 }
 0x5db   :  { %8881 = vmatprep.subr.bf16.mxu1 %v10341_v40 }
 0x5de   :  { %8882 = vmatpush3.bf16.msra.mxu1 %v10342_v10 }
 0x5df   :  { %8883 = vmatprep.subr.bf16.mxu1 %v10343_v50 }
 0x5e2   :  { %8884 = vmatpush3.bf16.msra.mxu1 %v10344_v15 }
 0x5e3   :  { %8885 = vmatprep.subr.bf16.mxu1 %v10345_v6 }
 0x5e6   :  { %8886 = vmatpush3.bf16.msra.mxu1 %v10346_v49 }
 0x5e7   :  { %8887 = vmatprep.subr.bf16.mxu1 %v10347_v7 }
 0x5ea   :  { %8888 = vmatpush3.bf16.msra.mxu1 %v10348_v41 }
 0x5eb   :  { %8889 = vmatprep.subr.bf16.mxu1 %v10349_v8 }
 0x5ee   :  { %8890 = vmatpush3.bf16.msra.mxu1 %v10350_v9 }
 0x5ef   :  { %8891 = vmatprep.subr.bf16.mxu1 %v10351_v43 }
 0x5f2   :  { %8892 = vmatpush3.bf16.msra.mxu1 %v10352_v11 }
 0x668   :  { %v8871_v14 = vpop.f32.mrb[24].mxu1 }
 0x669   :  { %v8872_v16 = vpop.f32.mrb[25].mxu1 }
 0x66a   :  { %v8873_v17 = vadd.f32 %v8872_v16, %v8871_v14  ;;  %v8874_v18 = vpop.f32.mrb[26].mxu1 }
 0x66b   :  { %v8875_v19 = vpop.f32.mrb[27].mxu1 }
 0x66c   :  { %v7220_v30 = vadd.f32 %v8873_v17, %v11141_v31  ;;  %v11152_v31 = vld [vmem:[#allocation18] ss:$0 sm:$0xff] }
 0x66e   :  { %v7227_v22 = vrot.slane %v7220_v30, 4 }
 0x670   :  { %v7228_v23 = vadd.f32 %v7227_v22, %v7220_v30  ;;  %v7511_v22 = vld [vmem:[#allocation14] sm:$0x3] }
 0x672   :  { %v7229_v25 = vrot.slane %v7228_v23, 2 }
 0x674   :  { %v7230_v27 = vadd.f32 %v7229_v25, %v7228_v23  ;;  %v7512_v23 = vld [vmem:[#allocation15] sm:$0x3]  ;;  %v7555_v25 = vrot.slane %v7511_v22, %v11075_v37 }
 0x676   :  { %v7231_v28 = vrot.slane %v7230_v27, 1 }
 0x678   :  { %v7232_v33 = vadd.f32 %v7231_v28, %v7230_v27  ;;  %v7559_v28 = vrot.slane %v7511_v22, %v11055_v13 }
 0x67a   :  { %v7233_v34 = vmul.f32 0.125, %v7232_v33 }
 0x67c   :  { %v7234_v36 = vsub.f32 %v7220_v30, %v7233_v34 }
 0x67e   :  { %v7235_v48 = vmul.f32 %v7234_v36, %v7234_v36 }
 0x680   :  { %v7236_v51 = vrot.slane %v7235_v48, 4 }
 0x682   :  { %v7237_v52 = vadd.f32 %v7236_v51, %v7235_v48  ;;  %v7572_v51 = vrot.slane %v7512_v23, %v11055_v13 }
 0x684   :  { %v7238_v53 = vrot.slane %v7237_v52, 2 }
 0x686   :  { %v7239_v5 = vadd.f32 %v7238_v53, %v7237_v52 }
 0x688   :  { %v7240_v38 = vrot.slane %v7239_v5, 1 }
 0x68a   :  { %v7241_v32 = vadd.f32 %v7240_v38, %v7239_v5 }
 0x68c   :  { %v7242_v20 = vmul.f32 0.125, %v7241_v32 }
 0x68e   :  { %v7243_v12 = vadd.f32 1e-05, %v7242_v20 }
 0x690   :  { %10373 = vrsqrt.f32 %v7243_v12 }
 0x69a   :  { %v10374_v55 = vpop.eup %10373 }
 0x69b   :  { %v7245_v56 = vmul.f32 %v10374_v55, %v7234_v36  ;;  %v7568_v36 = vrot.slane %v7512_v23, %v11075_v37 }
 0x69d   :  { %v7252_v58 = vmul.f32 %v11152_v31, %v7245_v56 }
 0x69f   :  { %v11158_v59 = vadd.f32 %v11154_v57, %v7252_v58 }
 0x6a1   :  { %v7260_v54 = vmul.f32 %v11158_v59, %v11158_v59 }
 0x6a3   :  { %7261 = vadd.xlane.f32.xlu0 %v7260_v54 }
 0x6a8   :  { %v7504_v46 = vpop.f32.mrb[28].mxu1 }
 0x6a9   :  { %v7513_v29 = vrot.slane %v7504_v46, 4  ;;  %v7506_v21 = vpop.f32.mrb[29].mxu1 }
 0x6aa   :  { %v7519_v60 = vrot.slane %v7506_v21, 4  ;;  %v7508_v47 = vpop.f32.mrb[30].mxu1 }
 0x6ab   :  { %v7514_v45 = vadd.f32 %v7513_v29, %v7504_v46  ;;  %v7509_v61 = vpop.f32.mrb[31].mxu1 }
 0x6ac   :  { %v7520_v42 = vadd.f32 %v7519_v60, %v7506_v21 }
 0x6ad   :  { %v7515_v62 = vrot.slane %v7514_v45, 2 }
 0x6ae   :  { %v7521_v35 = vrot.slane %v7520_v42, 2 }
 0x6af   :  { %v7516_v63 = vadd.f32 %v7515_v62, %v7514_v45 }
 0x6b0   :  { %v7522_v24 = vadd.f32 %v7521_v35, %v7520_v42 }
 0x6b1   :  { %v7517_v26 = vrot.slane %v7516_v63, 1 }
 0x6b2   :  { %v7523_v0 = vrot.slane %v7522_v24, 1 }
 0x6b3   :  { %v7518_v1 = vadd.f32 %v7517_v26, %v7516_v63 }
 0x6b4   :  { %v7524_v44 = vadd.f32 %v7523_v0, %v7522_v24 }
 0x6b5   :  { %v7525_v2 = vmul.f32 0.125, %v7518_v1 }
 0x6b6   :  { %v7526_v39 = vmul.f32 0.125, %v7524_v44 }
 0x6b7   :  { %v7527_v3 = vsub.f32 %v7504_v46, %v7525_v2 }
 0x6b8   :  { %v7528_v4 = vsub.f32 %v7506_v21, %v7526_v39 }
 0x6b9   :  { %v7529_v40 = vmul.f32 %v7527_v3, %v7527_v3 }
 0x6ba   :  { %v7530_v10 = vmul.f32 %v7528_v4, %v7528_v4 }
 0x6bb   :  { %v7531_v50 = vrot.slane %v7529_v40, 4 }
 0x6bc   :  { %v7537_v15 = vrot.slane %v7530_v10, 4 }
 0x6bd   :  { %v7532_v6 = vadd.f32 %v7531_v50, %v7529_v40 }
 0x6be   :  { %v7538_v49 = vadd.f32 %v7537_v15, %v7530_v10 }
 0x6bf   :  { %v7533_v7 = vrot.slane %v7532_v6, 2 }
 0x6c0   :  { %v7539_v41 = vrot.slane %v7538_v49, 2 }
 0x6c1   :  { %v7534_v8 = vadd.f32 %v7533_v7, %v7532_v6 }
 0x6c2   :  { %v7540_v9 = vadd.f32 %v7539_v41, %v7538_v49 }
 0x6c3   :  { %v7535_v43 = vrot.slane %v7534_v8, 1 }
 0x6c4   :  { %v7541_v11 = vrot.slane %v7540_v9, 1 }
 0x6c5   :  { %v7536_v14 = vadd.f32 %v7535_v43, %v7534_v8 }
 0x6c6   :  { %v7542_v16 = vadd.f32 %v7541_v11, %v7540_v9 }
 0x6c7   :  { %v7543_v17 = vmul.f32 0.125, %v7536_v14 }
 0x6c8   :  { %v7544_v18 = vmul.f32 0.125, %v7542_v16 }
 0x6c9   :  { %v7545_v19 = vadd.f32 1e-05, %v7543_v17 }
 0x6ca   :  { %v7546_v30 = vadd.f32 1e-05, %v7544_v18 }
 0x6cb   :  { %10375 = vrsqrt.f32 %v7545_v19 }
 0x6cc   :  { %10377 = vrsqrt.f32 %v7546_v30 }
 0x6d5   :  { %v10376_v27 = vpop.eup %10375 }
 0x6d6   :  { %v10378_v33 = vpop.eup %10377  ;;  %v7549_v34 = vmul.f32 %v10376_v27, %v7527_v3 }
 0x6d7   :  { %v7550_v48 = vmul.f32 %v10378_v33, %v7528_v4 }
 0x6d8   :  { %v7562_v52 = vmul.f32 %v7555_v25, %v7549_v34 }
 0x6d9   :  { %v7563_v53 = vmul.f32 %v7559_v28, %v7550_v48 }
 0x6da   :  { %v7575_v5 = vadd.f32 %v7568_v36, %v7562_v52 }
 0x6db   :  { %v7576_v38 = vadd.f32 %v7572_v51, %v7563_v53 }
 0x6dc   :  { %v7577_v32 = vmax.f32 %v7575_v5, 0.0 }
 0x6dd   :  { %v7578_v20 = vmax.f32 %v7576_v38, 0.0 }
 0x6de   :  { %v7579_v55 = vpack.c.bf16 %v7577_v32, %v7577_v32 }
 0x6df   :  { %v7580_v12 = vpack.c.bf16 %v7578_v20, %v7578_v20 }
 0x6e1   :  { %7741 = vmatprep.mubr.bf16.mxu1 %v7580_v12 }
 0x6e2   :  { %7742 = vmatmul.mubr.bf16.vlgmr.msra.gmra.mrb[32].mxu1 %v7579_v55 }
 0x730   :  { %v7262_v56 = vpop.xlane.xlu0 %7261 }
 0x731   :  { %v7263_v58 = vmax.f32 %v7262_v56, 1e-24 }
 0x733   :  { %10379 = vrsqrt.f32 %v7263_v58 }
 0x73d   :  { %v10380_v54 = vpop.eup %10379 }
 0x73e   :  { %v7265_v46 = vmul.f32 %v10380_v54, %v11158_v59 }
 0x740   :  { %7266 = vst [vmem:[#allocation21] sm:$0xff] %v7265_v46 }
 0x7b5   :  { %v8893_v37 = vpop.f32.mrb[32].mxu1 }
 0x7b6   :  { %v8894_v29 = vpop.f32.mrb[33].mxu1 }
 0x7b7   :  { %v8895_v13 = vadd.f32 %v8894_v29, %v8893_v37  ;;  %v8896_v21 = vpop.f32.mrb[34].mxu1 }
 0x7b8   :  { %v8897_v60 = vpop.f32.mrb[35].mxu1 }
 0x7b9   :  { %v7751_v47 = vrot.slane %v8895_v13, 4 }
 0x7bb   :  { %v7752_v45 = vadd.f32 %v8895_v13, %v7751_v47 }
 0x7bd   :  { %v7753_v61 = vrot.slane %v7752_v45, 2 }
 0x7bf   :  { %v7754_v42 = vadd.f32 %v7753_v61, %v7752_v45 }
 0x7c1   :  { %v7755_v62 = vrot.slane %v7754_v42, 1 }
 0x7c3   :  { %v7756_v35 = vadd.f32 %v7755_v62, %v7754_v42 }
 0x7c5   :  { %v7757_v63 = vmul.f32 0.125, %v7756_v35 }
 0x7c7   :  { %v7758_v24 = vsub.f32 %v8895_v13, %v7757_v63 }
 0x7c9   :  { %v7759_v26 = vmul.f32 %v7758_v24, %v7758_v24 }
 0x7cb   :  { %v7760_v0 = vrot.slane %v7759_v26, 4 }
 0x7cd   :  { %v7761_v1 = vadd.f32 %v7760_v0, %v7759_v26 }
 0x7cf   :  { %v7762_v44 = vrot.slane %v7761_v1, 2 }
 0x7d1   :  { %v7763_v2 = vadd.f32 %v7762_v44, %v7761_v1 }
 0x7d3   :  { %v7764_v59 = vrot.slane %v7763_v2, 1 }
 0x7d5   :  { %v7765_v39 = vadd.f32 %v7764_v59, %v7763_v2 }
 0x7d7   :  { %v7766_v3 = vmul.f32 0.125, %v7765_v39 }
 0x7d9   :  { %v7767_v4 = vadd.f32 1e-05, %v7766_v3 }
 0x7db   :  { %10381 = vrsqrt.f32 %v7767_v4 }
 0x7e5   :  { %v10382_v40 = vpop.eup %10381 }
 0x7e6   :  { %v7769_v10 = vmul.f32 %v10382_v40, %v7758_v24 }
 0x7e8   :  { %v7776_v50 = vmul.f32 %v11152_v31, %v7769_v10 }
 0x7ea   :  { %v7783_v15 = vadd.f32 %v11154_v57, %v7776_v50 }
 0x7ec   :  { %v7784_v6 = vmul.f32 %v7783_v15, %v7783_v15 }
 0x7ee   :  { %7785 = vadd.xlane.f32.xlu0 %v7784_v6 }
 0x7ef   :  { %10640 = shalt.err (!%p10637_p8)
}
 0x7f0   :  { %s10641_s4 = scalar_lea.hbm %s11205_s12, 128 }
 0x7f1   :  { %p10642_p9 = scmp.ne.s32.totalorder %s11205_s12, %s10641_s4  ;;  %p10645_p10 = scmp.lt.u32.totalorder %s10641_s4, %s11205_s12 }
 0x7f3   :  { %p10647_p11 = pnand %p10645_p10, %p10642_p9 }
 0x7f5   :  { %10650 = shalt.err (!%p10647_p11)
}
 0x7f6   :  { %7800 = dma.vmem_to_hbm [thread:$0]  %s7798_s28, 128, %s11205_s12, [#allocation5]  }
 0x7f7   :  { %s10708_s15 = smov [#allocation22]  }
 0x7f8   :  { %s7807_s1 = sshll.u32 %s10708_s15, 4  ;;  %s7808_s1 = int_to_ptr.vmem [resolvable:$true] %s7807_s1 }
 0x7f9   :  { %s10651_s17 = scalar_lea.vmem %s7808_s1, 128  ;;  %p10656_p13 = scmp.lt.s32.totalorder %s7808_s1, %s7808_s1 }
 0x7fa   :  { %p10652_p12 = scmp.ne.s32.totalorder %s7808_s1, %s10651_s17  ;;  %p10657_p0 = scmp.lt.s32.totalorder %s10651_s17, %s10651_s17 }
 0x7fc   :  { %p10658_p1 = por %p10657_p0, %p10656_p13 }
 0x7fe   :  { %p10659_p2 = pnand %p10658_p1, %p10652_p12 }
 0x87b   :  { %v7786_v31 = vpop.xlane.xlu0 %7785 }
 0x87c   :  { %v7787_v57 = vmax.f32 %v7786_v31, 1e-24 }
 0x87e   :  { %10383 = vrsqrt.f32 %v7787_v57 }
 0x888   :  { %v10384_v49 = vpop.eup %10383 }
 0x889   :  { %v7789_v7 = vmul.f32 %v10384_v49, %v7783_v15 }
 0x88b   :  { %7790 = vst [vmem:[#allocation22] sm:$0xff] %v7789_v7 }
 0x88c   :  { %10662 = shalt.err (!%p10659_p2)
}
 0x88d   :  { %s10663_s12 = scalar_lea.hbm %s11206_s13, 128 }
 0x88e   :  { %p10664_p3 = scmp.ne.s32.totalorder %s11206_s13, %s10663_s12  ;;  %p10667_p4 = scmp.lt.u32.totalorder %s10663_s12, %s11206_s13 }
 0x890   :  { %p10669_p5 = pnand %p10667_p4, %p10664_p3 }
 0x892   :  { %10672 = shalt.err (!%p10669_p5)
}
 0x893   :  { %7810 = dma.vmem_to_hbm [thread:$0]  %s7808_s1, 128, %s11206_s13, [#allocation23]  }
 0x894   :  { %10685 = dma.done.wait [#allocation5], 128  }
 0x895   :  { %10686 = vsyncadd [#allocation5], 4294967168 }
 0x896   :  { %10687 = dma.done.wait [#allocation23], 128  }
 0x897   :  { %10688 = vsyncadd [#allocation23], 4294967168 }
 0x898   :  { %7817 = vsyncpa [#allocation4], 1 }
 0x899   :  { %7818 = vsyncpa [#allocation7], 1 }
 0x89a   :  { %7819 = vsyncpa [#allocation10], 1 }
 0x89b   :  { %7820 = vsyncpa [#allocation13], 1 }
 0x89c   :  { %7821 = vsyncpa [#allocation16], 1 }
 0x89d   :  { %7822 = vsyncpa [#allocation19], 1 }
 0x89e   :  { %7823 = vsyncpa [#allocation5], 1 }
 0x89f   :  { %7824 = vsyncpa [#allocation23], 1 }

</bundles_post_ra>
